<compile_context>
chip_gen: v7x
topology: tpu7x:2x2x1
jax: 0.10.0
libtpu: 0.0.40
codegen_flags: <defaults>
</compile_context>

<pallas_src>
import functools

import jax
import jax.numpy as jnp
from jax import lax
from jax.experimental import pallas as pl
from jax.experimental.pallas import tpu as pltpu

VMEM = pltpu.MemorySpace.VMEM


# ---------------------------------------------------------------- helpers ---
def _quantize(x, num_bits):
    """STEQuantFn.forward: global min/max affine fake-quant (dequantized)."""
    qmax = float(2 ** num_bits - 1)
    mn = jnp.min(x)
    mx = jnp.max(x)
    scale = (mx - mn) / qmax
    scale_safe = jnp.where(scale > 0.0, scale, 1.0)   # guard constant tensors
    return jnp.clip(jnp.round((x - mn) / scale_safe), 0.0, qmax) * scale + mn


# ----------------------------------------------------------- fused kernel ---
def _gat_fused_kernel(x_ref, gid_ref, adjt_ref,
                      w1_ref, lb1_ref, adst1_ref, asrc1_ref, esel1_ref,
                      hm1_ref, b1_ref,
                      w2_ref, lb2_ref, adst2_ref, asrc2_ref, esel2_ref,
                      hm2_ref, b2_ref,
                      o_ref, *, n, heads1, out1, heads2, out2,
                      group_bits, alpha_bits, negative_slope):
    gid = gid_ref[...]                          # [N, 1] float group ids
    adj_t1 = adjt_ref[...]                      # [H1*N, N] head-tiled adjacency
    adj = adj_t1[0:n, :]                        # [N, N]
    qmax_a = float(2 ** alpha_bits - 1)

    # -- per-node-group fake quantization (single sweep, masks via compares) --
    def group_quant(fea):
        row_min = jnp.min(fea, axis=1, keepdims=True)        # [N, 1]
        row_max = jnp.max(fea, axis=1, keepdims=True)        # [N, 1]
        scale_rows = jnp.zeros_like(row_min)
        zp_rows = jnp.zeros_like(row_min)
        qmax_rows = jnp.zeros_like(row_min)
        for g, nb in enumerate(group_bits):
            qmax_g = float(2 ** nb - 1)
            m = (gid == float(g)).astype(jnp.float32)        # [N, 1]
            g_min = jnp.min(jnp.where(m > 0.0, row_min, jnp.inf))
            g_max = jnp.max(jnp.where(m > 0.0, row_max, -jnp.inf))
            valid = g_max >= g_min                           # False: empty group
            g_scale = jnp.where(valid, (g_max - g_min) / qmax_g, 0.0)
            g_zp = jnp.where(valid, g_min, 0.0)
            scale_rows = scale_rows + m * g_scale
            zp_rows = zp_rows + m * g_zp
            qmax_rows = qmax_rows + m * qmax_g
        scale_safe = jnp.where(scale_rows > 0.0, scale_rows, 1.0)
        q = jnp.clip(jnp.round((fea - zp_rows) / scale_safe), 0.0, qmax_rows)
        return jnp.where(qmax_rows > 0.0, q * scale_rows + zp_rows, fea)

    # -------------------------- one quantized GAT layer, fully batched -------
    def layer(xin, w_ref, lb_ref, adst_ref, asrc_ref, esel_ref, hm_ref, b_ref,
              adj_t, heads, out_ch):
        # 1. quantized linear projection (W pre-quantized & pre-transposed)
        fea = jnp.dot(xin, w_ref[...],
                      preferred_element_type=jnp.float32) + lb_ref[...]
        # 2. per-node-group fake quant
        fea_q = group_quant(fea)                              # [N, H*C]

        # 3. attention logit terms, all heads at once (MXU)
        a_dst = jnp.dot(fea_q, adst_ref[...],
                        preferred_element_type=jnp.float32)   # [N, H]
        a_src = jnp.dot(fea_q, asrc_ref[...],
                        preferred_element_type=jnp.float32)   # [N, H]
        esel = esel_ref[...]                                  # [H*N, H] selector
        # dst term as a column over (head, dst) rows
        a_dst_tile = (jnp.concatenate([a_dst] * heads, axis=0)
                      if heads > 1 else a_dst)                # [H*N, H]
        dst_col = jnp.sum(a_dst_tile * esel, axis=1, keepdims=True)  # [H*N, 1]
        # src term broadcast over dst rows within each head block
        src_blk = lax.dot_general(esel, a_src,
                                  (((1,), (1,)), ((), ())),
                                  preferred_element_type=jnp.float32)  # [H*N, N]
        lg = dst_col + src_blk                                # [H*N, N] logits

        # 4. global STEQuant of edge logits (single masked min/max pass)
        edge_m = adj_t > 0.0
        mn = jnp.min(jnp.where(edge_m, lg, jnp.inf))
        mx = jnp.max(jnp.where(edge_m, lg, -jnp.inf))
        a_scale = (mx - mn) / qmax_a
        a_scale_safe = jnp.where(a_scale > 0.0, a_scale, 1.0)
        alpha = (jnp.clip(jnp.round((lg - mn) / a_scale_safe), 0.0, qmax_a)
                 * a_scale + mn)

        # 5. leaky_relu -> masked per-(dst, head) softmax (axis=-1 reductions)
        alpha = jnp.where(alpha >= 0.0, alpha, negative_slope * alpha)
        alpha = jnp.where(edge_m, alpha, -1e30)
        amax = jnp.max(alpha, axis=1, keepdims=True)
        e = jnp.exp(alpha - amax) * adj_t                     # exact zero non-edges
        denom = jnp.sum(e, axis=1, keepdims=True) + 1e-16     # PyG softmax eps
        w = e / denom                                         # exact division

        # 6. aggregation: ONE MXU matmul, then head-mask + block-sum -> concat
        full = jnp.dot(w, fea_q,
                       preferred_element_type=jnp.float32)    # [H*N, H*C]
        if heads > 1:
            full = full * hm_ref[...]                         # keep head-diag blocks
            out = full[0:n, :]
            for h in range(1, heads):
                out = out + full[h * n:(h + 1) * n, :]        # sublane-aligned adds
        else:
            out = full                                        # concat == mean for H=1
        return out + b_ref[...]

    # ------------------------------ layer 1 + relu + layer 2 + softmax -------
    h1 = layer(x_ref[...], w1_ref, lb1_ref, adst1_ref, asrc1_ref, esel1_ref,
               hm1_ref, b1_ref, adj_t1, heads1, out1)
    h1 = jnp.maximum(h1, 0.0)                                 # fused inter-layer relu
    h2 = layer(h1, w2_ref, lb2_ref, adst2_ref, asrc2_ref, esel2_ref,
               hm2_ref, b2_ref, adj, heads2, out2)
    m = jnp.max(h2, axis=1, keepdims=True)                    # fused final softmax
    ex = jnp.exp(h2 - m)
    o_ref[...] = ex / jnp.sum(ex, axis=1, keepdims=True)


# --------------------------------------------------------------- wrappers ---
def _prep_layer_params(params, heads, out_ch, n, weight_bit):
    """Hoisted, input-only constant prep for one layer."""
    fout = heads * out_ch
    w_qt = _quantize(params["lin_w"], weight_bit).T               # [Fin, Fout]
    att_q = _quantize(params["att"], weight_bit)                  # [H, 2C]
    att_dst = att_q[:, :out_ch]                                   # x_i (dst) term
    att_src = att_q[:, out_ch:]                                   # x_j (src) term
    eye_h = jnp.eye(heads, dtype=jnp.float32)
    # block-diag projection columns [Fout, H]: col h holds att_*[h] in rows h*C:(h+1)*C
    adst_cols = (att_dst[:, :, None] * eye_h[:, None, :]).reshape(fout, heads)
    asrc_cols = (att_src[:, :, None] * eye_h[:, None, :]).reshape(fout, heads)
    # head-block selector [H*N, H] and aggregation head mask [H*N, Fout]
    esel = jnp.repeat(eye_h, n, axis=0)
    headmask = jnp.repeat(esel, out_ch, axis=1)
    return (w_qt,
            params["lin_b"].reshape(1, fout).astype(jnp.float32),
            adst_cols, asrc_cols, esel, headmask,
            params["bias"].reshape(1, fout).astype(jnp.float32))


def gat_forward(x, adj, bit_assign, bit_values, p1, p2, heads, hidden, classes,
                weight_bit=4, negative_slope=0.2):
    n = x.shape[0]
    # per-node group id (0..G-1) as a lane-cheap [N, 1] float vector
    gid = jnp.zeros((n,), jnp.float32)
    for g, b in enumerate(bit_values):
        gid = jnp.where(bit_assign == int(b), float(g), gid)
    gid = gid.reshape(n, 1)

    adj_t1 = jnp.concatenate([adj] * heads, axis=0)               # [H1*N, N]

    l1 = _prep_layer_params(p1, heads, hidden, n, weight_bit)
    l2 = _prep_layer_params(p2, 1, classes, n, weight_bit)

    kern = functools.partial(
        _gat_fused_kernel, n=n, heads1=heads, out1=hidden, heads2=1, out2=classes,
        group_bits=tuple(int(b) for b in bit_values), alpha_bits=weight_bit,
        negative_slope=negative_slope)

    n_in = 3 + len(l1) + len(l2)
    return pl.pallas_call(
        kern,
        out_shape=jax.ShapeDtypeStruct((n, classes), jnp.float32),
        in_specs=[pl.BlockSpec(memory_space=VMEM)] * n_in,
        out_specs=pl.BlockSpec(memory_space=VMEM),
    )(x, gid, adj_t1, *l1, *l2)


# ------------------------------------------------------------------- main ---
if __name__ == "__main__":
    N, F_IN, HIDDEN, HEADS, CLASSES = 32, 16, 8, 4, 4
    WEIGHT_BIT = 4
    BIT_VALUES = (2, 4, 8)                        # unique node bit-widths

    key = jax.random.PRNGKey(0)
    ks = jax.random.split(key, 8)

    def glorot(k, shape):
        fan_in, fan_out = shape[-1], shape[-2]
        a = (6.0 / (fan_in + fan_out)) ** 0.5
        return jax.random.uniform(k, shape, jnp.float32, -a, a)

    # node features
    x = jax.random.normal(ks[0], (N, F_IN), jnp.float32)

    # deterministic edge list (src -> dst); self loops removed then re-added
    # (as in the module's forward).
    ar = jnp.arange(N)
    src = jnp.concatenate([ar, ar, jnp.arange(0, N, 7)])
    dst = jnp.concatenate([(ar + 1) % N, (ar + 5) % N, jnp.arange(0, N, 7)])
    adj = jnp.zeros((N, N), jnp.float32).at[dst, src].set(1.0)
    eye = jnp.eye(N, dtype=jnp.float32)
    adj = adj * (1.0 - eye) + eye                 # remove + add self loops

    # per-node bit assignment
    bit_assign = jnp.array([BIT_VALUES[i % 3] for i in range(N)], jnp.int32)

    # conv1: in=F_IN, out=HIDDEN, heads=HEADS, concat=True
    p1 = {
        "lin_w": glorot(ks[1], (HEADS * HIDDEN, F_IN)),
        "lin_b": 0.01 * jax.random.normal(ks[2], (HEADS * HIDDEN,), jnp.float32),
        "att": glorot(ks[3], (HEADS, 2 * HIDDEN)),
        "bias": 0.01 * jax.random.normal(ks[4], (HEADS * HIDDEN,), jnp.float32),
    }
    # conv2: in=HEADS*HIDDEN, out=CLASSES, heads=1, concat=False
    p2 = {
        "lin_w": glorot(ks[5], (CLASSES, HEADS * HIDDEN)),
        "lin_b": 0.01 * jax.random.normal(ks[6], (CLASSES,), jnp.float32),
        "att": glorot(ks[7], (1, 2 * CLASSES)),
        "bias": jnp.zeros((CLASSES,), jnp.float32),
    }

    out = gat_forward(x, adj, bit_assign, BIT_VALUES, p1, p2,
                      HEADS, HIDDEN, CLASSES, weight_bit=WEIGHT_BIT)
    out = jax.block_until_ready(out)

    assert out.shape == (N, CLASSES)
    assert bool(jnp.all(jnp.isfinite(out)))
    # rows of the final softmax must sum to ~1
    assert bool(jnp.all(jnp.abs(jnp.sum(out, axis=1) - 1.0) < 1e-4))
    print("KERNEL_OK")
</pallas_src>

<mosaic_0001>
module attributes {stable_mosaic.version = 11 : i64} {
  func.func @_gat_fused_kernel(%arg0: memref<32x16xf32, #tpu.memory_space<vmem>>, %arg1: memref<32x1xf32, #tpu.memory_space<vmem>>, %arg2: memref<128x32xf32, #tpu.memory_space<vmem>>, %arg3: memref<16x32xf32, #tpu.memory_space<vmem>>, %arg4: memref<1x32xf32, #tpu.memory_space<vmem>>, %arg5: memref<32x4xf32, #tpu.memory_space<vmem>>, %arg6: memref<32x4xf32, #tpu.memory_space<vmem>>, %arg7: memref<128x4xf32, #tpu.memory_space<vmem>>, %arg8: memref<128x32xf32, #tpu.memory_space<vmem>>, %arg9: memref<1x32xf32, #tpu.memory_space<vmem>>, %arg10: memref<32x4xf32, #tpu.memory_space<vmem>>, %arg11: memref<1x4xf32, #tpu.memory_space<vmem>>, %arg12: memref<4x1xf32, #tpu.memory_space<vmem>>, %arg13: memref<4x1xf32, #tpu.memory_space<vmem>>, %arg14: memref<32x1xf32, #tpu.memory_space<vmem>>, %arg15: memref<32x4xf32, #tpu.memory_space<vmem>>, %arg16: memref<1x4xf32, #tpu.memory_space<vmem>>, %arg17: memref<32x4xf32, #tpu.memory_space<vmem>>) attributes {dimension_semantics = [], scalar_prefetch = 0 : i64, scratch_operands = 0 : i64, tpu.core_type = #tpu.core_type<tc>} {
    %c0 = arith.constant 0 : index
    %c0_0 = arith.constant 0 : index
    %0 = vector.load %arg1[%c0, %c0_0] : memref<32x1xf32, #tpu.memory_space<vmem>>, vector<32x1xf32>
    %c0_1 = arith.constant 0 : index
    %c0_2 = arith.constant 0 : index
    %1 = vector.load %arg2[%c0_1, %c0_2] : memref<128x32xf32, #tpu.memory_space<vmem>>, vector<128x32xf32>
    %2 = vector.extract_strided_slice %1 {offsets = [0, 0], sizes = [32, 32], strides = [1, 1]} : vector<128x32xf32> to vector<32x32xf32>
    %c0_3 = arith.constant 0 : index
    %c0_4 = arith.constant 0 : index
    %3 = vector.load %arg0[%c0_3, %c0_4] : memref<32x16xf32, #tpu.memory_space<vmem>>, vector<32x16xf32>
    %c0_5 = arith.constant 0 : index
    %c0_6 = arith.constant 0 : index
    %4 = vector.load %arg3[%c0_5, %c0_6] : memref<16x32xf32, #tpu.memory_space<vmem>>, vector<16x32xf32>
    %cst = arith.constant dense<0.000000e+00> : vector<32x32xf32>
    %5 = tpu.matmul %3, %4, %cst {dimension_numbers = #tpu.dot_dimension_numbers<[1], [0], [0], [1], [0, 0, 1, 1], [], []>} : vector<32x16xf32>, vector<16x32xf32>, vector<32x32xf32> -> vector<32x32xf32>
    %c0_7 = arith.constant 0 : index
    %c0_8 = arith.constant 0 : index
    %6 = vector.load %arg4[%c0_7, %c0_8] : memref<1x32xf32, #tpu.memory_space<vmem>>, vector<1x32xf32>
    %7 = vector.broadcast %6 : vector<1x32xf32> to vector<32x32xf32>
    %8 = arith.addf %5, %7 : vector<32x32xf32>
    %cst_9 = arith.constant dense<0x7F800000> : vector<32xf32>
    %9 = vector.multi_reduction <minimumf>, %8, %cst_9 [1] : vector<32x32xf32> to vector<32xf32>
    %10 = vector.shape_cast %9 : vector<32xf32> to vector<32x1xf32>
    %cst_10 = arith.constant dense<0xFF800000> : vector<32xf32>
    %11 = vector.multi_reduction <maximumf>, %8, %cst_10 [1] : vector<32x32xf32> to vector<32xf32>
    %12 = vector.shape_cast %11 : vector<32xf32> to vector<32x1xf32>
    %cst_11 = arith.constant 0.000000e+00 : f32
    %13 = vector.broadcast %cst_11 : f32 to vector<32x1xf32>
    %cst_12 = arith.constant 0.000000e+00 : f32
    %14 = vector.broadcast %cst_12 : f32 to vector<32x1xf32>
    %cst_13 = arith.constant 0.000000e+00 : f32
    %15 = vector.broadcast %cst_13 : f32 to vector<32x1xf32>
    %cst_14 = arith.constant 0.000000e+00 : f32
    %16 = vector.broadcast %cst_14 : f32 to vector<32x1xf32>
    %17 = arith.cmpf oeq, %0, %16 : vector<32x1xf32>
    %18 = arith.extui %17 : vector<32x1xi1> to vector<32x1xi32>
    %19 = arith.sitofp %18 : vector<32x1xi32> to vector<32x1xf32>
    %cst_15 = arith.constant 0.000000e+00 : f32
    %20 = vector.broadcast %cst_15 : f32 to vector<32x1xf32>
    %21 = arith.cmpf ogt, %19, %20 : vector<32x1xf32>
    %cst_16 = arith.constant 0x7F800000 : f32
    %22 = vector.broadcast %cst_16 : f32 to vector<32x1xf32>
    %23 = arith.select %21, %10, %22 : vector<32x1xi1>, vector<32x1xf32>
    %24 = vector.shape_cast %23 : vector<32x1xf32> to vector<1x32x1xf32>
    %cst_17 = arith.constant dense<0x7F800000> : vector<1xf32>
    %25 = vector.multi_reduction <minimumf>, %24, %cst_17 [1, 2] : vector<1x32x1xf32> to vector<1xf32>
    %26 = vector.shape_cast %25 : vector<1xf32> to vector<1x1x1xf32>
    %27 = vector.extract %26[0, 0, 0] : f32 from vector<1x1x1xf32>
    %cst_18 = arith.constant 0.000000e+00 : f32
    %28 = vector.broadcast %cst_18 : f32 to vector<32x1xf32>
    %29 = arith.cmpf ogt, %19, %28 : vector<32x1xf32>
    %cst_19 = arith.constant 0xFF800000 : f32
    %30 = vector.broadcast %cst_19 : f32 to vector<32x1xf32>
    %31 = arith.select %29, %12, %30 : vector<32x1xi1>, vector<32x1xf32>
    %32 = vector.shape_cast %31 : vector<32x1xf32> to vector<1x32x1xf32>
    %cst_20 = arith.constant dense<0xFF800000> : vector<1xf32>
    %33 = vector.multi_reduction <maximumf>, %32, %cst_20 [1, 2] : vector<1x32x1xf32> to vector<1xf32>
    %34 = vector.shape_cast %33 : vector<1xf32> to vector<1x1x1xf32>
    %35 = vector.extract %34[0, 0, 0] : f32 from vector<1x1x1xf32>
    %36 = arith.cmpf oge, %35, %27 : f32
    %37 = arith.subf %35, %27 : f32
    %cst_21 = arith.constant 3.000000e+00 : f32
    %38 = arith.divf %37, %cst_21 : f32
    %cst_22 = arith.constant 0.000000e+00 : f32
    %39 = arith.select %36, %38, %cst_22 : f32
    %cst_23 = arith.constant 0.000000e+00 : f32
    %40 = arith.select %36, %27, %cst_23 : f32
    %41 = vector.broadcast %39 : f32 to vector<32x1xf32>
    %42 = arith.mulf %19, %41 : vector<32x1xf32>
    %43 = arith.addf %13, %42 : vector<32x1xf32>
    %44 = vector.broadcast %40 : f32 to vector<32x1xf32>
    %45 = arith.mulf %19, %44 : vector<32x1xf32>
    %46 = arith.addf %14, %45 : vector<32x1xf32>
    %cst_24 = arith.constant 3.000000e+00 : f32
    %47 = vector.broadcast %cst_24 : f32 to vector<32x1xf32>
    %48 = arith.mulf %19, %47 : vector<32x1xf32>
    %49 = arith.addf %15, %48 : vector<32x1xf32>
    %cst_25 = arith.constant 1.000000e+00 : f32
    %50 = vector.broadcast %cst_25 : f32 to vector<32x1xf32>
    %51 = arith.cmpf oeq, %0, %50 : vector<32x1xf32>
    %52 = arith.extui %51 : vector<32x1xi1> to vector<32x1xi32>
    %53 = arith.sitofp %52 : vector<32x1xi32> to vector<32x1xf32>
    %cst_26 = arith.constant 0.000000e+00 : f32
    %54 = vector.broadcast %cst_26 : f32 to vector<32x1xf32>
    %55 = arith.cmpf ogt, %53, %54 : vector<32x1xf32>
    %cst_27 = arith.constant 0x7F800000 : f32
    %56 = vector.broadcast %cst_27 : f32 to vector<32x1xf32>
    %57 = arith.select %55, %10, %56 : vector<32x1xi1>, vector<32x1xf32>
    %58 = vector.shape_cast %57 : vector<32x1xf32> to vector<1x32x1xf32>
    %cst_28 = arith.constant dense<0x7F800000> : vector<1xf32>
    %59 = vector.multi_reduction <minimumf>, %58, %cst_28 [1, 2] : vector<1x32x1xf32> to vector<1xf32>
    %60 = vector.shape_cast %59 : vector<1xf32> to vector<1x1x1xf32>
    %61 = vector.extract %60[0, 0, 0] : f32 from vector<1x1x1xf32>
    %cst_29 = arith.constant 0.000000e+00 : f32
    %62 = vector.broadcast %cst_29 : f32 to vector<32x1xf32>
    %63 = arith.cmpf ogt, %53, %62 : vector<32x1xf32>
    %cst_30 = arith.constant 0xFF800000 : f32
    %64 = vector.broadcast %cst_30 : f32 to vector<32x1xf32>
    %65 = arith.select %63, %12, %64 : vector<32x1xi1>, vector<32x1xf32>
    %66 = vector.shape_cast %65 : vector<32x1xf32> to vector<1x32x1xf32>
    %cst_31 = arith.constant dense<0xFF800000> : vector<1xf32>
    %67 = vector.multi_reduction <maximumf>, %66, %cst_31 [1, 2] : vector<1x32x1xf32> to vector<1xf32>
    %68 = vector.shape_cast %67 : vector<1xf32> to vector<1x1x1xf32>
    %69 = vector.extract %68[0, 0, 0] : f32 from vector<1x1x1xf32>
    %70 = arith.cmpf oge, %69, %61 : f32
    %71 = arith.subf %69, %61 : f32
    %cst_32 = arith.constant 1.500000e+01 : f32
    %72 = arith.divf %71, %cst_32 : f32
    %cst_33 = arith.constant 0.000000e+00 : f32
    %73 = arith.select %70, %72, %cst_33 : f32
    %cst_34 = arith.constant 0.000000e+00 : f32
    %74 = arith.select %70, %61, %cst_34 : f32
    %75 = vector.broadcast %73 : f32 to vector<32x1xf32>
    %76 = arith.mulf %53, %75 : vector<32x1xf32>
    %77 = arith.addf %43, %76 : vector<32x1xf32>
    %78 = vector.broadcast %74 : f32 to vector<32x1xf32>
    %79 = arith.mulf %53, %78 : vector<32x1xf32>
    %80 = arith.addf %46, %79 : vector<32x1xf32>
    %cst_35 = arith.constant 1.500000e+01 : f32
    %81 = vector.broadcast %cst_35 : f32 to vector<32x1xf32>
    %82 = arith.mulf %53, %81 : vector<32x1xf32>
    %83 = arith.addf %49, %82 : vector<32x1xf32>
    %cst_36 = arith.constant 2.000000e+00 : f32
    %84 = vector.broadcast %cst_36 : f32 to vector<32x1xf32>
    %85 = arith.cmpf oeq, %0, %84 : vector<32x1xf32>
    %86 = arith.extui %85 : vector<32x1xi1> to vector<32x1xi32>
    %87 = arith.sitofp %86 : vector<32x1xi32> to vector<32x1xf32>
    %cst_37 = arith.constant 0.000000e+00 : f32
    %88 = vector.broadcast %cst_37 : f32 to vector<32x1xf32>
    %89 = arith.cmpf ogt, %87, %88 : vector<32x1xf32>
    %cst_38 = arith.constant 0x7F800000 : f32
    %90 = vector.broadcast %cst_38 : f32 to vector<32x1xf32>
    %91 = arith.select %89, %10, %90 : vector<32x1xi1>, vector<32x1xf32>
    %92 = vector.shape_cast %91 : vector<32x1xf32> to vector<1x32x1xf32>
    %cst_39 = arith.constant dense<0x7F800000> : vector<1xf32>
    %93 = vector.multi_reduction <minimumf>, %92, %cst_39 [1, 2] : vector<1x32x1xf32> to vector<1xf32>
    %94 = vector.shape_cast %93 : vector<1xf32> to vector<1x1x1xf32>
    %95 = vector.extract %94[0, 0, 0] : f32 from vector<1x1x1xf32>
    %cst_40 = arith.constant 0.000000e+00 : f32
    %96 = vector.broadcast %cst_40 : f32 to vector<32x1xf32>
    %97 = arith.cmpf ogt, %87, %96 : vector<32x1xf32>
    %cst_41 = arith.constant 0xFF800000 : f32
    %98 = vector.broadcast %cst_41 : f32 to vector<32x1xf32>
    %99 = arith.select %97, %12, %98 : vector<32x1xi1>, vector<32x1xf32>
    %100 = vector.shape_cast %99 : vector<32x1xf32> to vector<1x32x1xf32>
    %cst_42 = arith.constant dense<0xFF800000> : vector<1xf32>
    %101 = vector.multi_reduction <maximumf>, %100, %cst_42 [1, 2] : vector<1x32x1xf32> to vector<1xf32>
    %102 = vector.shape_cast %101 : vector<1xf32> to vector<1x1x1xf32>
    %103 = vector.extract %102[0, 0, 0] : f32 from vector<1x1x1xf32>
    %104 = arith.cmpf oge, %103, %95 : f32
    %105 = arith.subf %103, %95 : f32
    %cst_43 = arith.constant 2.550000e+02 : f32
    %106 = arith.divf %105, %cst_43 : f32
    %cst_44 = arith.constant 0.000000e+00 : f32
    %107 = arith.select %104, %106, %cst_44 : f32
    %cst_45 = arith.constant 0.000000e+00 : f32
    %108 = arith.select %104, %95, %cst_45 : f32
    %109 = vector.broadcast %107 : f32 to vector<32x1xf32>
    %110 = arith.mulf %87, %109 : vector<32x1xf32>
    %111 = arith.addf %77, %110 : vector<32x1xf32>
    %112 = vector.broadcast %108 : f32 to vector<32x1xf32>
    %113 = arith.mulf %87, %112 : vector<32x1xf32>
    %114 = arith.addf %80, %113 : vector<32x1xf32>
    %cst_46 = arith.constant 2.550000e+02 : f32
    %115 = vector.broadcast %cst_46 : f32 to vector<32x1xf32>
    %116 = arith.mulf %87, %115 : vector<32x1xf32>
    %117 = arith.addf %83, %116 : vector<32x1xf32>
    %cst_47 = arith.constant 0.000000e+00 : f32
    %118 = vector.broadcast %cst_47 : f32 to vector<32x1xf32>
    %119 = arith.cmpf ogt, %111, %118 : vector<32x1xf32>
    %cst_48 = arith.constant 1.000000e+00 : f32
    %120 = vector.broadcast %cst_48 : f32 to vector<32x1xf32>
    %121 = arith.select %119, %111, %120 : vector<32x1xi1>, vector<32x1xf32>
    %122 = vector.broadcast %114 : vector<32x1xf32> to vector<32x32xf32>
    %123 = arith.subf %8, %122 : vector<32x32xf32>
    %124 = vector.broadcast %121 : vector<32x1xf32> to vector<32x32xf32>
    %125 = arith.divf %123, %124 : vector<32x32xf32>
    %126 = math.roundeven %125 : vector<32x32xf32>
    %cst_49 = arith.constant 0.000000e+00 : f32
    %127 = vector.broadcast %cst_49 : f32 to vector<32x32xf32>
    %128 = arith.maximumf %127, %126 : vector<32x32xf32>
    %129 = vector.broadcast %117 : vector<32x1xf32> to vector<32x32xf32>
    %130 = arith.minimumf %129, %128 : vector<32x32xf32>
    %cst_50 = arith.constant 0.000000e+00 : f32
    %131 = vector.broadcast %cst_50 : f32 to vector<32x1xf32>
    %132 = arith.cmpf ogt, %117, %131 : vector<32x1xf32>
    %133 = vector.broadcast %111 : vector<32x1xf32> to vector<32x32xf32>
    %134 = arith.mulf %130, %133 : vector<32x32xf32>
    %135 = vector.broadcast %114 : vector<32x1xf32> to vector<32x32xf32>
    %136 = arith.addf %134, %135 : vector<32x32xf32>
    %137 = vector.shape_cast %132 : vector<32x1xi1> to vector<32x1xi1>
    %138 = vector.broadcast %137 : vector<32x1xi1> to vector<32x32xi1>
    %139 = arith.select %138, %136, %8 : vector<32x32xi1>, vector<32x32xf32>
    %c0_51 = arith.constant 0 : index
    %c0_52 = arith.constant 0 : index
    %140 = vector.load %arg5[%c0_51, %c0_52] : memref<32x4xf32, #tpu.memory_space<vmem>>, vector<32x4xf32>
    %cst_53 = arith.constant dense<0.000000e+00> : vector<32x4xf32>
    %141 = tpu.matmul %139, %140, %cst_53 {dimension_numbers = #tpu.dot_dimension_numbers<[1], [0], [0], [1], [0, 0, 1, 1], [], []>} : vector<32x32xf32>, vector<32x4xf32>, vector<32x4xf32> -> vector<32x4xf32>
    %c0_54 = arith.constant 0 : index
    %c0_55 = arith.constant 0 : index
    %142 = vector.load %arg6[%c0_54, %c0_55] : memref<32x4xf32, #tpu.memory_space<vmem>>, vector<32x4xf32>
    %cst_56 = arith.constant dense<0.000000e+00> : vector<32x4xf32>
    %143 = tpu.matmul %139, %142, %cst_56 {dimension_numbers = #tpu.dot_dimension_numbers<[1], [0], [0], [1], [0, 0, 1, 1], [], []>} : vector<32x32xf32>, vector<32x4xf32>, vector<32x4xf32> -> vector<32x4xf32>
    %c0_57 = arith.constant 0 : index
    %c0_58 = arith.constant 0 : index
    %144 = vector.load %arg7[%c0_57, %c0_58] : memref<128x4xf32, #tpu.memory_space<vmem>>, vector<128x4xf32>
    %145 = tpu.concatenate %141, %141, %141, %141 in 0 : vector<32x4xf32>, vector<32x4xf32>, vector<32x4xf32>, vector<32x4xf32> -> vector<128x4xf32>
    %146 = arith.mulf %145, %144 : vector<128x4xf32>
    %cst_59 = arith.constant dense<0.000000e+00> : vector<128xf32>
    %147 = vector.multi_reduction <add>, %146, %cst_59 [1] : vector<128x4xf32> to vector<128xf32>
    %148 = vector.shape_cast %147 : vector<128xf32> to vector<128x1xf32>
    %cst_60 = arith.constant dense<0.000000e+00> : vector<128x32xf32>
    %149 = tpu.matmul %144, %143, %cst_60 {dimension_numbers = #tpu.dot_dimension_numbers<[1], [1], [0], [0], [0, 0, 1, 0], [], []>} : vector<128x4xf32>, vector<32x4xf32>, vector<128x32xf32> -> vector<128x32xf32>
    %150 = vector.broadcast %148 : vector<128x1xf32> to vector<128x32xf32>
    %151 = arith.addf %150, %149 : vector<128x32xf32>
    %cst_61 = arith.constant 0.000000e+00 : f32
    %152 = vector.broadcast %cst_61 : f32 to vector<128x32xf32>
    %153 = arith.cmpf ogt, %1, %152 : vector<128x32xf32>
    %cst_62 = arith.constant 0x7F800000 : f32
    %154 = vector.broadcast %cst_62 : f32 to vector<128x32xf32>
    %155 = arith.select %153, %151, %154 : vector<128x32xi1>, vector<128x32xf32>
    %156 = vector.shape_cast %155 : vector<128x32xf32> to vector<1x128x32xf32>
    %cst_63 = arith.constant dense<0x7F800000> : vector<1xf32>
    %157 = vector.multi_reduction <minimumf>, %156, %cst_63 [1, 2] : vector<1x128x32xf32> to vector<1xf32>
    %158 = vector.shape_cast %157 : vector<1xf32> to vector<1x1x1xf32>
    %159 = vector.extract %158[0, 0, 0] : f32 from vector<1x1x1xf32>
    %cst_64 = arith.constant 0xFF800000 : f32
    %160 = vector.broadcast %cst_64 : f32 to vector<128x32xf32>
    %161 = arith.select %153, %151, %160 : vector<128x32xi1>, vector<128x32xf32>
    %162 = vector.shape_cast %161 : vector<128x32xf32> to vector<1x128x32xf32>
    %cst_65 = arith.constant dense<0xFF800000> : vector<1xf32>
    %163 = vector.multi_reduction <maximumf>, %162, %cst_65 [1, 2] : vector<1x128x32xf32> to vector<1xf32>
    %164 = vector.shape_cast %163 : vector<1xf32> to vector<1x1x1xf32>
    %165 = vector.extract %164[0, 0, 0] : f32 from vector<1x1x1xf32>
    %166 = arith.subf %165, %159 : f32
    %cst_66 = arith.constant 1.500000e+01 : f32
    %167 = arith.divf %166, %cst_66 : f32
    %cst_67 = arith.constant 0.000000e+00 : f32
    %168 = arith.cmpf ogt, %167, %cst_67 : f32
    %cst_68 = arith.constant 1.000000e+00 : f32
    %169 = arith.select %168, %167, %cst_68 : f32
    %170 = vector.broadcast %159 : f32 to vector<128x32xf32>
    %171 = arith.subf %151, %170 : vector<128x32xf32>
    %172 = vector.broadcast %169 : f32 to vector<128x32xf32>
    %173 = arith.divf %171, %172 : vector<128x32xf32>
    %174 = math.roundeven %173 : vector<128x32xf32>
    %cst_69 = arith.constant 0.000000e+00 : f32
    %cst_70 = arith.constant 1.500000e+01 : f32
    %175 = vector.broadcast %cst_69 : f32 to vector<128x32xf32>
    %176 = arith.maximumf %175, %174 : vector<128x32xf32>
    %177 = vector.broadcast %cst_70 : f32 to vector<128x32xf32>
    %178 = arith.minimumf %177, %176 : vector<128x32xf32>
    %179 = vector.broadcast %167 : f32 to vector<128x32xf32>
    %180 = arith.mulf %178, %179 : vector<128x32xf32>
    %181 = vector.broadcast %159 : f32 to vector<128x32xf32>
    %182 = arith.addf %180, %181 : vector<128x32xf32>
    %cst_71 = arith.constant 0.000000e+00 : f32
    %183 = vector.broadcast %cst_71 : f32 to vector<128x32xf32>
    %184 = arith.cmpf oge, %182, %183 : vector<128x32xf32>
    %cst_72 = arith.constant 2.000000e-01 : f32
    %185 = vector.broadcast %cst_72 : f32 to vector<128x32xf32>
    %186 = arith.mulf %185, %182 : vector<128x32xf32>
    %187 = arith.select %184, %182, %186 : vector<128x32xi1>, vector<128x32xf32>
    %cst_73 = arith.constant -1.000000e+30 : f32
    %188 = vector.broadcast %cst_73 : f32 to vector<128x32xf32>
    %189 = arith.select %153, %187, %188 : vector<128x32xi1>, vector<128x32xf32>
    %cst_74 = arith.constant dense<0xFF800000> : vector<128xf32>
    %190 = vector.multi_reduction <maximumf>, %189, %cst_74 [1] : vector<128x32xf32> to vector<128xf32>
    %191 = vector.shape_cast %190 : vector<128xf32> to vector<128x1xf32>
    %192 = vector.broadcast %191 : vector<128x1xf32> to vector<128x32xf32>
    %193 = arith.subf %189, %192 : vector<128x32xf32>
    %194 = math.exp %193 : vector<128x32xf32>
    %195 = arith.mulf %194, %1 : vector<128x32xf32>
    %cst_75 = arith.constant dense<0.000000e+00> : vector<128xf32>
    %196 = vector.multi_reduction <add>, %195, %cst_75 [1] : vector<128x32xf32> to vector<128xf32>
    %197 = vector.shape_cast %196 : vector<128xf32> to vector<128x1xf32>
    %cst_76 = arith.constant 1.000000e-16 : f32
    %198 = vector.broadcast %cst_76 : f32 to vector<128x1xf32>
    %199 = arith.addf %197, %198 : vector<128x1xf32>
    %200 = vector.broadcast %199 : vector<128x1xf32> to vector<128x32xf32>
    %201 = arith.divf %195, %200 : vector<128x32xf32>
    %cst_77 = arith.constant dense<0.000000e+00> : vector<128x32xf32>
    %202 = tpu.matmul %201, %139, %cst_77 {dimension_numbers = #tpu.dot_dimension_numbers<[1], [0], [0], [1], [0, 0, 1, 1], [], []>} : vector<128x32xf32>, vector<32x32xf32>, vector<128x32xf32> -> vector<128x32xf32>
    %c0_78 = arith.constant 0 : index
    %c0_79 = arith.constant 0 : index
    %203 = vector.load %arg8[%c0_78, %c0_79] : memref<128x32xf32, #tpu.memory_space<vmem>>, vector<128x32xf32>
    %204 = arith.mulf %202, %203 : vector<128x32xf32>
    %205 = vector.extract_strided_slice %204 {offsets = [0, 0], sizes = [32, 32], strides = [1, 1]} : vector<128x32xf32> to vector<32x32xf32>
    %206 = vector.extract_strided_slice %204 {offsets = [32, 0], sizes = [32, 32], strides = [1, 1]} : vector<128x32xf32> to vector<32x32xf32>
    %207 = arith.addf %205, %206 : vector<32x32xf32>
    %208 = vector.extract_strided_slice %204 {offsets = [64, 0], sizes = [32, 32], strides = [1, 1]} : vector<128x32xf32> to vector<32x32xf32>
    %209 = arith.addf %207, %208 : vector<32x32xf32>
    %210 = vector.extract_strided_slice %204 {offsets = [96, 0], sizes = [32, 32], strides = [1, 1]} : vector<128x32xf32> to vector<32x32xf32>
    %211 = arith.addf %209, %210 : vector<32x32xf32>
    %c0_80 = arith.constant 0 : index
    %c0_81 = arith.constant 0 : index
    %212 = vector.load %arg9[%c0_80, %c0_81] : memref<1x32xf32, #tpu.memory_space<vmem>>, vector<1x32xf32>
    %213 = vector.broadcast %212 : vector<1x32xf32> to vector<32x32xf32>
    %214 = arith.addf %211, %213 : vector<32x32xf32>
    %cst_82 = arith.constant 0.000000e+00 : f32
    %215 = vector.broadcast %cst_82 : f32 to vector<32x32xf32>
    %216 = arith.maximumf %214, %215 : vector<32x32xf32>
    %c0_83 = arith.constant 0 : index
    %c0_84 = arith.constant 0 : index
    %217 = vector.load %arg10[%c0_83, %c0_84] : memref<32x4xf32, #tpu.memory_space<vmem>>, vector<32x4xf32>
    %cst_85 = arith.constant dense<0.000000e+00> : vector<32x4xf32>
    %218 = tpu.matmul %216, %217, %cst_85 {dimension_numbers = #tpu.dot_dimension_numbers<[1], [0], [0], [1], [0, 0, 1, 1], [], []>} : vector<32x32xf32>, vector<32x4xf32>, vector<32x4xf32> -> vector<32x4xf32>
    %c0_86 = arith.constant 0 : index
    %c0_87 = arith.constant 0 : index
    %219 = vector.load %arg11[%c0_86, %c0_87] : memref<1x4xf32, #tpu.memory_space<vmem>>, vector<1x4xf32>
    %220 = vector.broadcast %219 : vector<1x4xf32> to vector<32x4xf32>
    %221 = arith.addf %218, %220 : vector<32x4xf32>
    %cst_88 = arith.constant dense<0x7F800000> : vector<32xf32>
    %222 = vector.multi_reduction <minimumf>, %221, %cst_88 [1] : vector<32x4xf32> to vector<32xf32>
    %223 = vector.shape_cast %222 : vector<32xf32> to vector<32x1xf32>
    %cst_89 = arith.constant dense<0xFF800000> : vector<32xf32>
    %224 = vector.multi_reduction <maximumf>, %221, %cst_89 [1] : vector<32x4xf32> to vector<32xf32>
    %225 = vector.shape_cast %224 : vector<32xf32> to vector<32x1xf32>
    %cst_90 = arith.constant 0.000000e+00 : f32
    %226 = vector.broadcast %cst_90 : f32 to vector<32x1xf32>
    %cst_91 = arith.constant 0.000000e+00 : f32
    %227 = vector.broadcast %cst_91 : f32 to vector<32x1xf32>
    %cst_92 = arith.constant 0.000000e+00 : f32
    %228 = vector.broadcast %cst_92 : f32 to vector<32x1xf32>
    %cst_93 = arith.constant 0.000000e+00 : f32
    %229 = vector.broadcast %cst_93 : f32 to vector<32x1xf32>
    %230 = arith.cmpf oeq, %0, %229 : vector<32x1xf32>
    %231 = arith.extui %230 : vector<32x1xi1> to vector<32x1xi32>
    %232 = arith.sitofp %231 : vector<32x1xi32> to vector<32x1xf32>
    %cst_94 = arith.constant 0.000000e+00 : f32
    %233 = vector.broadcast %cst_94 : f32 to vector<32x1xf32>
    %234 = arith.cmpf ogt, %232, %233 : vector<32x1xf32>
    %cst_95 = arith.constant 0x7F800000 : f32
    %235 = vector.broadcast %cst_95 : f32 to vector<32x1xf32>
    %236 = arith.select %234, %223, %235 : vector<32x1xi1>, vector<32x1xf32>
    %237 = vector.shape_cast %236 : vector<32x1xf32> to vector<1x32x1xf32>
    %cst_96 = arith.constant dense<0x7F800000> : vector<1xf32>
    %238 = vector.multi_reduction <minimumf>, %237, %cst_96 [1, 2] : vector<1x32x1xf32> to vector<1xf32>
    %239 = vector.shape_cast %238 : vector<1xf32> to vector<1x1x1xf32>
    %240 = vector.extract %239[0, 0, 0] : f32 from vector<1x1x1xf32>
    %cst_97 = arith.constant 0.000000e+00 : f32
    %241 = vector.broadcast %cst_97 : f32 to vector<32x1xf32>
    %242 = arith.cmpf ogt, %232, %241 : vector<32x1xf32>
    %cst_98 = arith.constant 0xFF800000 : f32
    %243 = vector.broadcast %cst_98 : f32 to vector<32x1xf32>
    %244 = arith.select %242, %225, %243 : vector<32x1xi1>, vector<32x1xf32>
    %245 = vector.shape_cast %244 : vector<32x1xf32> to vector<1x32x1xf32>
    %cst_99 = arith.constant dense<0xFF800000> : vector<1xf32>
    %246 = vector.multi_reduction <maximumf>, %245, %cst_99 [1, 2] : vector<1x32x1xf32> to vector<1xf32>
    %247 = vector.shape_cast %246 : vector<1xf32> to vector<1x1x1xf32>
    %248 = vector.extract %247[0, 0, 0] : f32 from vector<1x1x1xf32>
    %249 = arith.cmpf oge, %248, %240 : f32
    %250 = arith.subf %248, %240 : f32
    %cst_100 = arith.constant 3.000000e+00 : f32
    %251 = arith.divf %250, %cst_100 : f32
    %cst_101 = arith.constant 0.000000e+00 : f32
    %252 = arith.select %249, %251, %cst_101 : f32
    %cst_102 = arith.constant 0.000000e+00 : f32
    %253 = arith.select %249, %240, %cst_102 : f32
    %254 = vector.broadcast %252 : f32 to vector<32x1xf32>
    %255 = arith.mulf %232, %254 : vector<32x1xf32>
    %256 = arith.addf %226, %255 : vector<32x1xf32>
    %257 = vector.broadcast %253 : f32 to vector<32x1xf32>
    %258 = arith.mulf %232, %257 : vector<32x1xf32>
    %259 = arith.addf %227, %258 : vector<32x1xf32>
    %cst_103 = arith.constant 3.000000e+00 : f32
    %260 = vector.broadcast %cst_103 : f32 to vector<32x1xf32>
    %261 = arith.mulf %232, %260 : vector<32x1xf32>
    %262 = arith.addf %228, %261 : vector<32x1xf32>
    %cst_104 = arith.constant 1.000000e+00 : f32
    %263 = vector.broadcast %cst_104 : f32 to vector<32x1xf32>
    %264 = arith.cmpf oeq, %0, %263 : vector<32x1xf32>
    %265 = arith.extui %264 : vector<32x1xi1> to vector<32x1xi32>
    %266 = arith.sitofp %265 : vector<32x1xi32> to vector<32x1xf32>
    %cst_105 = arith.constant 0.000000e+00 : f32
    %267 = vector.broadcast %cst_105 : f32 to vector<32x1xf32>
    %268 = arith.cmpf ogt, %266, %267 : vector<32x1xf32>
    %cst_106 = arith.constant 0x7F800000 : f32
    %269 = vector.broadcast %cst_106 : f32 to vector<32x1xf32>
    %270 = arith.select %268, %223, %269 : vector<32x1xi1>, vector<32x1xf32>
    %271 = vector.shape_cast %270 : vector<32x1xf32> to vector<1x32x1xf32>
    %cst_107 = arith.constant dense<0x7F800000> : vector<1xf32>
    %272 = vector.multi_reduction <minimumf>, %271, %cst_107 [1, 2] : vector<1x32x1xf32> to vector<1xf32>
    %273 = vector.shape_cast %272 : vector<1xf32> to vector<1x1x1xf32>
    %274 = vector.extract %273[0, 0, 0] : f32 from vector<1x1x1xf32>
    %cst_108 = arith.constant 0.000000e+00 : f32
    %275 = vector.broadcast %cst_108 : f32 to vector<32x1xf32>
    %276 = arith.cmpf ogt, %266, %275 : vector<32x1xf32>
    %cst_109 = arith.constant 0xFF800000 : f32
    %277 = vector.broadcast %cst_109 : f32 to vector<32x1xf32>
    %278 = arith.select %276, %225, %277 : vector<32x1xi1>, vector<32x1xf32>
    %279 = vector.shape_cast %278 : vector<32x1xf32> to vector<1x32x1xf32>
    %cst_110 = arith.constant dense<0xFF800000> : vector<1xf32>
    %280 = vector.multi_reduction <maximumf>, %279, %cst_110 [1, 2] : vector<1x32x1xf32> to vector<1xf32>
    %281 = vector.shape_cast %280 : vector<1xf32> to vector<1x1x1xf32>
    %282 = vector.extract %281[0, 0, 0] : f32 from vector<1x1x1xf32>
    %283 = arith.cmpf oge, %282, %274 : f32
    %284 = arith.subf %282, %274 : f32
    %cst_111 = arith.constant 1.500000e+01 : f32
    %285 = arith.divf %284, %cst_111 : f32
    %cst_112 = arith.constant 0.000000e+00 : f32
    %286 = arith.select %283, %285, %cst_112 : f32
    %cst_113 = arith.constant 0.000000e+00 : f32
    %287 = arith.select %283, %274, %cst_113 : f32
    %288 = vector.broadcast %286 : f32 to vector<32x1xf32>
    %289 = arith.mulf %266, %288 : vector<32x1xf32>
    %290 = arith.addf %256, %289 : vector<32x1xf32>
    %291 = vector.broadcast %287 : f32 to vector<32x1xf32>
    %292 = arith.mulf %266, %291 : vector<32x1xf32>
    %293 = arith.addf %259, %292 : vector<32x1xf32>
    %cst_114 = arith.constant 1.500000e+01 : f32
    %294 = vector.broadcast %cst_114 : f32 to vector<32x1xf32>
    %295 = arith.mulf %266, %294 : vector<32x1xf32>
    %296 = arith.addf %262, %295 : vector<32x1xf32>
    %cst_115 = arith.constant 2.000000e+00 : f32
    %297 = vector.broadcast %cst_115 : f32 to vector<32x1xf32>
    %298 = arith.cmpf oeq, %0, %297 : vector<32x1xf32>
    %299 = arith.extui %298 : vector<32x1xi1> to vector<32x1xi32>
    %300 = arith.sitofp %299 : vector<32x1xi32> to vector<32x1xf32>
    %cst_116 = arith.constant 0.000000e+00 : f32
    %301 = vector.broadcast %cst_116 : f32 to vector<32x1xf32>
    %302 = arith.cmpf ogt, %300, %301 : vector<32x1xf32>
    %cst_117 = arith.constant 0x7F800000 : f32
    %303 = vector.broadcast %cst_117 : f32 to vector<32x1xf32>
    %304 = arith.select %302, %223, %303 : vector<32x1xi1>, vector<32x1xf32>
    %305 = vector.shape_cast %304 : vector<32x1xf32> to vector<1x32x1xf32>
    %cst_118 = arith.constant dense<0x7F800000> : vector<1xf32>
    %306 = vector.multi_reduction <minimumf>, %305, %cst_118 [1, 2] : vector<1x32x1xf32> to vector<1xf32>
    %307 = vector.shape_cast %306 : vector<1xf32> to vector<1x1x1xf32>
    %308 = vector.extract %307[0, 0, 0] : f32 from vector<1x1x1xf32>
    %cst_119 = arith.constant 0.000000e+00 : f32
    %309 = vector.broadcast %cst_119 : f32 to vector<32x1xf32>
    %310 = arith.cmpf ogt, %300, %309 : vector<32x1xf32>
    %cst_120 = arith.constant 0xFF800000 : f32
    %311 = vector.broadcast %cst_120 : f32 to vector<32x1xf32>
    %312 = arith.select %310, %225, %311 : vector<32x1xi1>, vector<32x1xf32>
    %313 = vector.shape_cast %312 : vector<32x1xf32> to vector<1x32x1xf32>
    %cst_121 = arith.constant dense<0xFF800000> : vector<1xf32>
    %314 = vector.multi_reduction <maximumf>, %313, %cst_121 [1, 2] : vector<1x32x1xf32> to vector<1xf32>
    %315 = vector.shape_cast %314 : vector<1xf32> to vector<1x1x1xf32>
    %316 = vector.extract %315[0, 0, 0] : f32 from vector<1x1x1xf32>
    %317 = arith.cmpf oge, %316, %308 : f32
    %318 = arith.subf %316, %308 : f32
    %cst_122 = arith.constant 2.550000e+02 : f32
    %319 = arith.divf %318, %cst_122 : f32
    %cst_123 = arith.constant 0.000000e+00 : f32
    %320 = arith.select %317, %319, %cst_123 : f32
    %cst_124 = arith.constant 0.000000e+00 : f32
    %321 = arith.select %317, %308, %cst_124 : f32
    %322 = vector.broadcast %320 : f32 to vector<32x1xf32>
    %323 = arith.mulf %300, %322 : vector<32x1xf32>
    %324 = arith.addf %290, %323 : vector<32x1xf32>
    %325 = vector.broadcast %321 : f32 to vector<32x1xf32>
    %326 = arith.mulf %300, %325 : vector<32x1xf32>
    %327 = arith.addf %293, %326 : vector<32x1xf32>
    %cst_125 = arith.constant 2.550000e+02 : f32
    %328 = vector.broadcast %cst_125 : f32 to vector<32x1xf32>
    %329 = arith.mulf %300, %328 : vector<32x1xf32>
    %330 = arith.addf %296, %329 : vector<32x1xf32>
    %cst_126 = arith.constant 0.000000e+00 : f32
    %331 = vector.broadcast %cst_126 : f32 to vector<32x1xf32>
    %332 = arith.cmpf ogt, %324, %331 : vector<32x1xf32>
    %cst_127 = arith.constant 1.000000e+00 : f32
    %333 = vector.broadcast %cst_127 : f32 to vector<32x1xf32>
    %334 = arith.select %332, %324, %333 : vector<32x1xi1>, vector<32x1xf32>
    %335 = vector.broadcast %327 : vector<32x1xf32> to vector<32x4xf32>
    %336 = arith.subf %221, %335 : vector<32x4xf32>
    %337 = vector.broadcast %334 : vector<32x1xf32> to vector<32x4xf32>
    %338 = arith.divf %336, %337 : vector<32x4xf32>
    %339 = math.roundeven %338 : vector<32x4xf32>
    %cst_128 = arith.constant 0.000000e+00 : f32
    %340 = vector.broadcast %cst_128 : f32 to vector<32x4xf32>
    %341 = arith.maximumf %340, %339 : vector<32x4xf32>
    %342 = vector.broadcast %330 : vector<32x1xf32> to vector<32x4xf32>
    %343 = arith.minimumf %342, %341 : vector<32x4xf32>
    %cst_129 = arith.constant 0.000000e+00 : f32
    %344 = vector.broadcast %cst_129 : f32 to vector<32x1xf32>
    %345 = arith.cmpf ogt, %330, %344 : vector<32x1xf32>
    %346 = vector.broadcast %324 : vector<32x1xf32> to vector<32x4xf32>
    %347 = arith.mulf %343, %346 : vector<32x4xf32>
    %348 = vector.broadcast %327 : vector<32x1xf32> to vector<32x4xf32>
    %349 = arith.addf %347, %348 : vector<32x4xf32>
    %350 = vector.shape_cast %345 : vector<32x1xi1> to vector<32x1xi1>
    %351 = vector.broadcast %350 : vector<32x1xi1> to vector<32x4xi1>
    %352 = arith.select %351, %349, %221 : vector<32x4xi1>, vector<32x4xf32>
    %c0_130 = arith.constant 0 : index
    %c0_131 = arith.constant 0 : index
    %353 = vector.load %arg12[%c0_130, %c0_131] : memref<4x1xf32, #tpu.memory_space<vmem>>, vector<4x1xf32>
    %cst_132 = arith.constant dense<0.000000e+00> : vector<32x1xf32>
    %354 = tpu.matmul %352, %353, %cst_132 {dimension_numbers = #tpu.dot_dimension_numbers<[1], [0], [0], [1], [0, 0, 1, 1], [], []>} : vector<32x4xf32>, vector<4x1xf32>, vector<32x1xf32> -> vector<32x1xf32>
    %c0_133 = arith.constant 0 : index
    %c0_134 = arith.constant 0 : index
    %355 = vector.load %arg13[%c0_133, %c0_134] : memref<4x1xf32, #tpu.memory_space<vmem>>, vector<4x1xf32>
    %cst_135 = arith.constant dense<0.000000e+00> : vector<32x1xf32>
    %356 = tpu.matmul %352, %355, %cst_135 {dimension_numbers = #tpu.dot_dimension_numbers<[1], [0], [0], [1], [0, 0, 1, 1], [], []>} : vector<32x4xf32>, vector<4x1xf32>, vector<32x1xf32> -> vector<32x1xf32>
    %c0_136 = arith.constant 0 : index
    %c0_137 = arith.constant 0 : index
    %357 = vector.load %arg14[%c0_136, %c0_137] : memref<32x1xf32, #tpu.memory_space<vmem>>, vector<32x1xf32>
    %358 = arith.mulf %354, %357 : vector<32x1xf32>
    %cst_138 = arith.constant dense<0.000000e+00> : vector<32xf32>
    %359 = vector.multi_reduction <add>, %358, %cst_138 [1] : vector<32x1xf32> to vector<32xf32>
    %360 = vector.shape_cast %359 : vector<32xf32> to vector<32x1xf32>
    %cst_139 = arith.constant dense<0.000000e+00> : vector<32x32xf32>
    %361 = tpu.matmul %357, %356, %cst_139 {dimension_numbers = #tpu.dot_dimension_numbers<[1], [1], [0], [0], [0, 0, 1, 0], [], []>} : vector<32x1xf32>, vector<32x1xf32>, vector<32x32xf32> -> vector<32x32xf32>
    %362 = vector.broadcast %360 : vector<32x1xf32> to vector<32x32xf32>
    %363 = arith.addf %362, %361 : vector<32x32xf32>
    %cst_140 = arith.constant 0.000000e+00 : f32
    %364 = vector.broadcast %cst_140 : f32 to vector<32x32xf32>
    %365 = arith.cmpf ogt, %2, %364 : vector<32x32xf32>
    %cst_141 = arith.constant 0x7F800000 : f32
    %366 = vector.broadcast %cst_141 : f32 to vector<32x32xf32>
    %367 = arith.select %365, %363, %366 : vector<32x32xi1>, vector<32x32xf32>
    %368 = vector.shape_cast %367 : vector<32x32xf32> to vector<1x32x32xf32>
    %cst_142 = arith.constant dense<0x7F800000> : vector<1xf32>
    %369 = vector.multi_reduction <minimumf>, %368, %cst_142 [1, 2] : vector<1x32x32xf32> to vector<1xf32>
    %370 = vector.shape_cast %369 : vector<1xf32> to vector<1x1x1xf32>
    %371 = vector.extract %370[0, 0, 0] : f32 from vector<1x1x1xf32>
    %cst_143 = arith.constant 0xFF800000 : f32
    %372 = vector.broadcast %cst_143 : f32 to vector<32x32xf32>
    %373 = arith.select %365, %363, %372 : vector<32x32xi1>, vector<32x32xf32>
    %374 = vector.shape_cast %373 : vector<32x32xf32> to vector<1x32x32xf32>
    %cst_144 = arith.constant dense<0xFF800000> : vector<1xf32>
    %375 = vector.multi_reduction <maximumf>, %374, %cst_144 [1, 2] : vector<1x32x32xf32> to vector<1xf32>
    %376 = vector.shape_cast %375 : vector<1xf32> to vector<1x1x1xf32>
    %377 = vector.extract %376[0, 0, 0] : f32 from vector<1x1x1xf32>
    %378 = arith.subf %377, %371 : f32
    %cst_145 = arith.constant 1.500000e+01 : f32
    %379 = arith.divf %378, %cst_145 : f32
    %cst_146 = arith.constant 0.000000e+00 : f32
    %380 = arith.cmpf ogt, %379, %cst_146 : f32
    %cst_147 = arith.constant 1.000000e+00 : f32
    %381 = arith.select %380, %379, %cst_147 : f32
    %382 = vector.broadcast %371 : f32 to vector<32x32xf32>
    %383 = arith.subf %363, %382 : vector<32x32xf32>
    %384 = vector.broadcast %381 : f32 to vector<32x32xf32>
    %385 = arith.divf %383, %384 : vector<32x32xf32>
    %386 = math.roundeven %385 : vector<32x32xf32>
    %cst_148 = arith.constant 0.000000e+00 : f32
    %cst_149 = arith.constant 1.500000e+01 : f32
    %387 = vector.broadcast %cst_148 : f32 to vector<32x32xf32>
    %388 = arith.maximumf %387, %386 : vector<32x32xf32>
    %389 = vector.broadcast %cst_149 : f32 to vector<32x32xf32>
    %390 = arith.minimumf %389, %388 : vector<32x32xf32>
    %391 = vector.broadcast %379 : f32 to vector<32x32xf32>
    %392 = arith.mulf %390, %391 : vector<32x32xf32>
    %393 = vector.broadcast %371 : f32 to vector<32x32xf32>
    %394 = arith.addf %392, %393 : vector<32x32xf32>
    %cst_150 = arith.constant 0.000000e+00 : f32
    %395 = vector.broadcast %cst_150 : f32 to vector<32x32xf32>
    %396 = arith.cmpf oge, %394, %395 : vector<32x32xf32>
    %cst_151 = arith.constant 2.000000e-01 : f32
    %397 = vector.broadcast %cst_151 : f32 to vector<32x32xf32>
    %398 = arith.mulf %397, %394 : vector<32x32xf32>
    %399 = arith.select %396, %394, %398 : vector<32x32xi1>, vector<32x32xf32>
    %cst_152 = arith.constant -1.000000e+30 : f32
    %400 = vector.broadcast %cst_152 : f32 to vector<32x32xf32>
    %401 = arith.select %365, %399, %400 : vector<32x32xi1>, vector<32x32xf32>
    %cst_153 = arith.constant dense<0xFF800000> : vector<32xf32>
    %402 = vector.multi_reduction <maximumf>, %401, %cst_153 [1] : vector<32x32xf32> to vector<32xf32>
    %403 = vector.shape_cast %402 : vector<32xf32> to vector<32x1xf32>
    %404 = vector.broadcast %403 : vector<32x1xf32> to vector<32x32xf32>
    %405 = arith.subf %401, %404 : vector<32x32xf32>
    %406 = math.exp %405 : vector<32x32xf32>
    %407 = arith.mulf %406, %2 : vector<32x32xf32>
    %cst_154 = arith.constant dense<0.000000e+00> : vector<32xf32>
    %408 = vector.multi_reduction <add>, %407, %cst_154 [1] : vector<32x32xf32> to vector<32xf32>
    %409 = vector.shape_cast %408 : vector<32xf32> to vector<32x1xf32>
    %cst_155 = arith.constant 1.000000e-16 : f32
    %410 = vector.broadcast %cst_155 : f32 to vector<32x1xf32>
    %411 = arith.addf %409, %410 : vector<32x1xf32>
    %412 = vector.broadcast %411 : vector<32x1xf32> to vector<32x32xf32>
    %413 = arith.divf %407, %412 : vector<32x32xf32>
    %cst_156 = arith.constant dense<0.000000e+00> : vector<32x4xf32>
    %414 = tpu.matmul %413, %352, %cst_156 {dimension_numbers = #tpu.dot_dimension_numbers<[1], [0], [0], [1], [0, 0, 1, 1], [], []>} : vector<32x32xf32>, vector<32x4xf32>, vector<32x4xf32> -> vector<32x4xf32>
    %c0_157 = arith.constant 0 : index
    %c0_158 = arith.constant 0 : index
    %415 = vector.load %arg16[%c0_157, %c0_158] : memref<1x4xf32, #tpu.memory_space<vmem>>, vector<1x4xf32>
    %416 = vector.broadcast %415 : vector<1x4xf32> to vector<32x4xf32>
    %417 = arith.addf %414, %416 : vector<32x4xf32>
    %cst_159 = arith.constant dense<0xFF800000> : vector<32xf32>
    %418 = vector.multi_reduction <maximumf>, %417, %cst_159 [1] : vector<32x4xf32> to vector<32xf32>
    %419 = vector.shape_cast %418 : vector<32xf32> to vector<32x1xf32>
    %420 = vector.broadcast %419 : vector<32x1xf32> to vector<32x4xf32>
    %421 = arith.subf %417, %420 : vector<32x4xf32>
    %422 = math.exp %421 : vector<32x4xf32>
    %cst_160 = arith.constant dense<0.000000e+00> : vector<32xf32>
    %423 = vector.multi_reduction <add>, %422, %cst_160 [1] : vector<32x4xf32> to vector<32xf32>
    %424 = vector.shape_cast %423 : vector<32xf32> to vector<32x1xf32>
    %425 = vector.broadcast %424 : vector<32x1xf32> to vector<32x4xf32>
    %426 = arith.divf %422, %425 : vector<32x4xf32>
    %c0_161 = arith.constant 0 : index
    %c0_162 = arith.constant 0 : index
    %427 = vector.load %arg17[%c0_161, %c0_162] : memref<32x4xf32, #tpu.memory_space<vmem>>, vector<32x4xf32>
    tpu.vector_store %arg17[%c0_161, %c0_162], %426 {strides = array<i32>} : memref<32x4xf32, #tpu.memory_space<vmem>>, vector<32x4xf32>,
    return
  }
}

</mosaic_0001>

<bundles_post_ra>
// kernel: tpu_custom_call.1
= control target key start
LH: loop header
LB: loop body
LE: loop exit
PB: predicated region body
PF: predicated region fallthrough
CT: control target
= control target key end

     0   :  { %vm89_vm0 = vcmask 130048   ;;  %vm187_vm1 = vcmask 261120   ;;  %v3561_v28 = vmov 0.0   ;;  %s5047_s3 = inlined_call_operand.vmem [shape: f32[16,32], index: 3, kind: input, shape index: {}]   ;;  %s5048_s15 = inlined_call_operand.vmem [shape: f32[32,4], index: 15, kind: input, shape index: {}]   ;;  %s5049_s0 = inlined_call_operand.vmem [shape: f32[32,16], index: 0, kind: input, shape index: {}]   ;;  %s5050_s4 = inlined_call_operand.vmem [shape: f32[1,32], index: 4, kind: input, shape index: {}]   ;;  %s5051_s1 = inlined_call_operand.vmem [shape: f32[32,1], index: 1, kind: input, shape index: {}]   ;;  %s5052_s5 = inlined_call_operand.vmem [shape: f32[32,4], index: 5, kind: input, shape index: {}]   ;;  %s5053_s6 = inlined_call_operand.vmem [shape: f32[32,4], index: 6, kind: input, shape index: {}]   ;;  %s5054_s7 = inlined_call_operand.vmem [shape: f32[128,4], index: 7, kind: input, shape index: {}]   ;;  %s5055_s2 = inlined_call_operand.vmem [shape: f32[128,32], index: 2, kind: input, shape index: {}]   ;;  %s5056_s10 = inlined_call_operand.vmem [shape: f32[32,4], index: 10, kind: input, shape index: {}]   ;;  %s5057_s8 = inlined_call_operand.vmem [shape: f32[128,32], index: 8, kind: input, shape index: {}]   ;;  %s5058_s9 = inlined_call_operand.vmem [shape: f32[1,32], index: 9, kind: input, shape index: {}]   ;;  %s5059_s11 = inlined_call_operand.vmem [shape: f32[1,4], index: 11, kind: input, shape index: {}]   ;;  %s5060_s13 = inlined_call_operand.vmem [shape: f32[4,1], index: 13, kind: input, shape index: {}]   ;;  %s5061_s12 = inlined_call_operand.vmem [shape: f32[4,1], index: 12, kind: input, shape index: {}]   ;;  %s5062_s14 = inlined_call_operand.vmem [shape: f32[32,1], index: 14, kind: input, shape index: {}]   ;;  %s5063_s16 = inlined_call_operand.vmem [shape: f32[1,4], index: 16, kind: input, shape index: {}]   ;;  %s5064_s17 = inlined_call_operand.vmem [shape: f32[32,4], index: 17, kind: output, shape index: {}]  }
   0x1   :  { %5122 = sst [smem:[#allocation22_spill]] %s5047_s3  ;;  %v76_v2 = vld [vmem:[%s5049_s0] sm:$0xff]  ;;  %v77_v4 = vld [vmem:[%s5049_s0 + $0x8] sm:$0xff]  ;;  %v78_v5 = vld [vmem:[%s5049_s0 + $0x10] sm:$0xff] }
   0x2   :  { %s5123_s26 = sld [smem:[#allocation22_spill]]  ;;  %3153 = vmatprep.mubr.msk.f32.mxu0 %vm89_vm0, %v76_v2  ;;  %v79_v6 = vld [vmem:[%s5049_s0 + $0x18] sm:$0xff]  ;;  %v2963_v7 = vld [vmem:[%s5050_s4] ss:$0 sm:$0xff]  ;;  %v57_v24 = vld [vmem:[%s5051_s1 + $0x8] sm:$0xff] }
   0x3   :  { %vm213_vm2 = vcmp.eq.f32.partialorder %v57_v24, 0.0  ;;  %v56_v25 = vld [vmem:[%s5051_s1] sm:$0xff]  ;;  %v59_v26 = vld [vmem:[%s5051_s1 + $0x18] sm:$0xff]  ;;  %vm303_vm3 = vcmp.eq.f32.partialorder %v57_v24, 1.0  ;;  %vm392_vm4 = vcmp.eq.f32.partialorder %v57_v24, 2.0  ;;  %v58_v27 = vld [vmem:[%s5051_s1 + $0x10] sm:$0xff] }
   0x4   :  { %v3710_v29 = vsel %vm213_vm2, 1.0, %v3561_v28  ;;  %vm212_vm5 = vcmp.eq.f32.partialorder %v56_v25, 0.0  ;;  %vm302_vm6 = vcmp.eq.f32.partialorder %v56_v25, 1.0  ;;  %vm215_vm7 = vcmp.eq.f32.partialorder %v59_v26, 0.0 }
   0x5   :  { %5124 = vst [vmem:[#allocation2_spill] sm:$0xff] %v3710_v29  ;;  %v3712_v30 = vsel %vm303_vm3, 1.0, %v3561_v28  ;;  %v3714_v31 = vsel %vm392_vm4, 1.0, %v3561_v28  ;;  %vm214_vm8 = vcmp.eq.f32.partialorder %v58_v27, 0.0  ;;  %vm5092_vm9 = vcmp.gt.f32.partialorder %v3710_v29, 0.0 }
   0x6   :  { %5125 = vst [vmem:[#allocation3_spill] sm:$0xff] %v3712_v30  ;;  %5126 = vst [vmem:[#allocation4_spill] sm:$0xff] %v3714_v31  ;;  %vm304_vm10 = vcmp.eq.f32.partialorder %v58_v27, 1.0  ;;  %vm305_vm11 = vcmp.eq.f32.partialorder %v59_v26, 1.0  ;;  %v3717_v32 = vsel %vm212_vm5, 1.0, %v3561_v28  ;;  %v3719_v33 = vsel %vm302_vm6, 1.0, %v3561_v28 }
   0x7   :  { %5127 = vst [vmem:[#allocation5_spill] sm:$0xff] %v3717_v32  ;;  %5128 = vst [vmem:[#allocation6_spill] sm:$0xff] %v3719_v33  ;;  %vm391_vm12 = vcmp.eq.f32.partialorder %v56_v25, 2.0  ;;  %vm394_vm13 = vcmp.eq.f32.partialorder %v59_v26, 2.0  ;;  %v3723_v36 = vsel %vm215_vm7, 1.0, %v3561_v28  ;;  %vm5086_vm14 = vcmp.gt.f32.partialorder %v3712_v30, 0.0 }
   0x8   :  { %v80_v0 = vld [vmem:[%s5123_s26] sm:$0xff]  ;;  %v81_v1 = vld [vmem:[%s5123_s26 + $0x8] sm:$0xff]  ;;  %5129 = vst [vmem:[#allocation7_spill] sm:$0xff] %v3723_v36  ;;  %vm393_vm15 = vcmp.eq.f32.partialorder %v58_v27, 2.0  ;;  %v3727_v37 = vsel %vm214_vm8, 1.0, %v3561_v28  ;;  %vm5076_vm2 = vcmask 7168  }
   0x9   :  { %v3309_v3 = vpack.c.bf16 %v81_v1, %v80_v0  ;;  %5130 = vst [vmem:[#allocation8_spill] sm:$0xff] %v3727_v37  ;;  %v3729_v38 = vsel %vm304_vm10, 1.0, %v3561_v28  ;;  %v3731_v39 = vsel %vm305_vm11, 1.0, %v3561_v28  ;;  %vm5080_vm3 = vcmp.gt.f32.partialorder %v3717_v32, 0.0 }
   0xa   :  { %5131 = vst [vmem:[#allocation9_spill] sm:$0xff] %v3729_v38  ;;  %5132 = vst [vmem:[#allocation10_spill] sm:$0xff] %v3731_v39  ;;  %vm5079_vm4 = vcmp.gt.f32.partialorder %v3719_v33, 0.0  ;;  %v3735_v40 = vsel %vm391_vm12, 1.0, %v3561_v28  ;;  %v3737_v41 = vsel %vm394_vm13, 1.0, %v3561_v28  ;;  %vm5075_vm5 = vcmp.gt.f32.partialorder %v3723_v36, 0.0 }
   0xb   :  { %3310 = vmatprep.subr.bf16.mxu0 %v3309_v3  ;;  %5133 = vst [vmem:[#allocation11_spill] sm:$0xff] %v3735_v40  ;;  %5134 = vst [vmem:[#allocation12_spill] sm:$0xff] %v3737_v41  ;;  %v3744_v44 = vsel %vm393_vm15, 1.0, %v3561_v28  ;;  %vm5072_vm6 = vcmp.gt.f32.partialorder %v3727_v37, 0.0  ;;  %vm5067_vm7 = vcmp.gt.f32.partialorder %v3729_v38, 0.0  ;;  %vm5074_vm8 = vcmp.gt.f32.partialorder %v3731_v39, 0.0 }
   0xc   :  { %3312 = vmatpush3.bf16.msra.mxu0 %v3309_v3  ;;  %5135 = vst [vmem:[#allocation13_spill] sm:$0xff] %v3744_v44  ;;  %vm5078_vm10 = vcmp.gt.f32.partialorder %v3735_v40, 0.0  ;;  %vm5073_vm11 = vcmp.gt.f32.partialorder %v3737_v41, 0.0  ;;  %vm5066_vm12 = vcmp.gt.f32.partialorder %v3744_v44, 0.0 }
   0xf   :  { %3154 = vmatmul.mubr.msk.f32.vlgmr.msra.gmra.mrb[0].mxu0 %vm89_vm0, %v77_v4 }
  0x10   :  { %3156 = vmatprep.mubr.msk.f32.mxu0 %vm89_vm0, %v78_v5 }
  0x13   :  { %3157 = vmatmul.mubr.msk.f32.gmra.mrb[2].mxu0 %vm89_vm0, %v79_v6  ;;  %vm5077_vm0 = vcmp.gt.f32.partialorder %v3714_v31, 0.0 }
  0xe2   :  { %v3155_v8 = vpop.f32.mrb[0].mxu0 }
  0xe3   :  { %v3674_v9 = vadd.f32 %v3155_v8, %v2963_v7  ;;  %v168_v10 = vpop.f32.mrb[1].mxu0 }
  0xe4   :  { %v3676_v11 = vadd.f32 %v2963_v7, %v168_v10 }
  0xe5   :  { %v203_v12 = vsel %vm187_vm1, %v3674_v9, -inf  ;;  %v191_v13 = vsel %vm187_vm1, %v3674_v9, inf }
  0xe6   :  { %204 = vmax.xlane.f32.xlu1 %v203_v12  ;;  %192 = vmin.xlane.f32.xlu0 %v191_v13  ;;  %v3158_v14 = vpop.f32.mrb[2].mxu0  ;;  %v188_v19 = vsel %vm187_vm1, %v3676_v11, inf  ;;  %v200_v21 = vsel %vm187_vm1, %v3676_v11, -inf }
  0xe7   :  { %v3682_v15 = vadd.f32 %v3158_v14, %v2963_v7  ;;  %v178_v16 = vpop.f32.mrb[3].mxu0 }
  0xe8   :  { %v3684_v17 = vadd.f32 %v2963_v7, %v178_v16 }
  0xe9   :  { %v197_v18 = vsel %vm187_vm1, %v3682_v15, inf  ;;  %v209_v22 = vsel %vm187_vm1, %v3682_v15, -inf }
  0xea   :  { %198 = vmin.xlane.f32.xlu1 %v197_v18  ;;  %189 = vmin.xlane.f32.xlu0 %v188_v19  ;;  %v194_v20 = vsel %vm187_vm1, %v3684_v17, inf  ;;  %v206_v23 = vsel %vm187_vm1, %v3684_v17, -inf }
  0xee   :  { %195 = vmin.xlane.f32.xlu1 %v194_v20  ;;  %201 = vmax.xlane.f32.xlu0 %v200_v21 }
  0xf2   :  { %210 = vmax.xlane.f32.xlu1 %v209_v22  ;;  %207 = vmax.xlane.f32.xlu0 %v206_v23 }
 0x173   :  { %v3721_v34 = vpop.xlane.xlu1 %204  ;;  %v193_v35 = vpop.xlane.xlu0 %192 }
 0x174   :  { %v229_v42 = vsel %vm5092_vm9, %v193_v35, inf  ;;  %v319_v43 = vsel %vm5086_vm14, %v193_v35, inf  ;;  %v250_v47 = vsel %vm5092_vm9, %v3721_v34, -inf  ;;  %v408_v52 = vsel %vm5077_vm0, %v193_v35, inf }
 0x175   :  { %v234_v50 = vsel %vm5076_vm2, %v229_v42, inf  ;;  %v323_v51 = vsel %vm5076_vm2, %v319_v43, inf  ;;  %v254_v55 = vsel %vm5076_vm2, %v250_v47, -inf  ;;  %v339_v56 = vsel %vm5086_vm14, %v3721_v34, -inf }
 0x177   :  { %v199_v45 = vpop.xlane.xlu1 %198  ;;  %v190_v46 = vpop.xlane.xlu0 %189 }
 0x178   :  { %v228_v48 = vsel %vm5080_vm3, %v190_v46, inf  ;;  %v318_v49 = vsel %vm5079_vm4, %v190_v46, inf  ;;  %v231_v53 = vsel %vm5075_vm5, %v199_v45, inf  ;;  %v321_v54 = vsel %vm5074_vm8, %v199_v45, inf }
 0x179   :  { %v233_v59 = vsel %vm5076_vm2, %v228_v48, inf  ;;  %v322_v60 = vsel %vm5076_vm2, %v318_v49, inf  ;;  %v407_v61 = vsel %vm5078_vm10, %v190_v46, inf  ;;  %v410_v62 = vsel %vm5073_vm11, %v199_v45, inf }
 0x17a   :  { %v236_v4 = vsel %vm5076_vm2, %v231_v53, inf  ;;  %v325_v6 = vsel %vm5076_vm2, %v321_v54, inf  ;;  %v237_v7 = vmin.f32 %v233_v59, %v234_v50  ;;  %v326_v10 = vmin.f32 %v322_v60, %v323_v51 }
 0x17b   :  { %v196_v57 = vpop.xlane.xlu1 %195  ;;  %v202_v58 = vpop.xlane.xlu0 %201  ;;  %v411_v18 = vsel %vm5076_vm2, %v407_v61, inf  ;;  %v414_v20 = vsel %vm5076_vm2, %v410_v62, inf }
 0x17c   :  { %v230_v63 = vsel %vm5072_vm6, %v196_v57, inf  ;;  %v320_v0 = vsel %vm5067_vm7, %v196_v57, inf  ;;  %v249_v1 = vsel %vm5080_vm3, %v202_v58, -inf  ;;  %v409_v2 = vsel %vm5066_vm12, %v196_v57, inf }
 0x17d   :  { %v235_v3 = vsel %vm5076_vm2, %v230_v63, inf  ;;  %v324_v5 = vsel %vm5076_vm2, %v320_v0, inf  ;;  %v253_v12 = vsel %vm5076_vm2, %v249_v1, -inf  ;;  %v413_v19 = vsel %vm5076_vm2, %v409_v2, inf }
 0x17e   :  { %v238_v8 = vmin.f32 %v235_v3, %v236_v4  ;;  %v327_v16 = vmin.f32 %v324_v5, %v325_v6  ;;  %v338_v24 = vsel %vm5079_vm4, %v202_v58, -inf  ;;  %v257_v27 = vmax.f32 %v253_v12, %v254_v55 }
 0x17f   :  { %v211_v13 = vpop.xlane.xlu1 %210  ;;  %v208_v14 = vpop.xlane.xlu0 %207  ;;  %v416_v42 = vmin.f32 %v413_v19, %v414_v20  ;;  %v342_v46 = vsel %vm5076_vm2, %v338_v24, -inf  ;;  %v427_v54 = vsel %vm5078_vm10, %v202_v58, -inf  ;;  %v412_v55 = vsel %vm5076_vm2, %v408_v52, inf }
 0x180   :  { %v239_v21 = vmin.f32 %v237_v7, %v238_v8  ;;  %v251_v22 = vsel %vm5072_vm6, %v208_v14, -inf  ;;  %v252_v23 = vsel %vm5075_vm5, %v211_v13, -inf  ;;  %v340_v28 = vsel %vm5067_vm7, %v208_v14, -inf }
 0x181   :  { %v255_v25 = vsel %vm5076_vm2, %v251_v22, -inf  ;;  %v256_v26 = vsel %vm5076_vm2, %v252_v23, -inf  ;;  %v341_v43 = vsel %vm5074_vm8, %v211_v13, -inf  ;;  %v344_v45 = vsel %vm5076_vm2, %v340_v28, -inf }
 0x182   :  { %240 = vmin.xlane.f32.xlu0 %v239_v21  ;;  %v258_v35 = vmax.f32 %v255_v25, %v256_v26  ;;  %v345_v47 = vsel %vm5076_vm2, %v341_v43, -inf  ;;  %v429_v48 = vsel %vm5066_vm12, %v208_v14, -inf  ;;  %v430_v49 = vsel %vm5073_vm11, %v211_v13, -inf }
 0x183   :  { %v328_v50 = vmin.f32 %v326_v10, %v327_v16  ;;  %v347_v53 = vmax.f32 %v344_v45, %v345_v47  ;;  %v343_v57 = vsel %vm5076_vm2, %v339_v56, -inf  ;;  %v433_v59 = vsel %vm5076_vm2, %v429_v48, -inf }
 0x184   :  { %v259_v51 = vmax.f32 %v257_v27, %v258_v35  ;;  %v434_v60 = vsel %vm5076_vm2, %v430_v49, -inf  ;;  %v415_v61 = vmin.f32 %v411_v18, %v412_v55  ;;  %v346_v62 = vmax.f32 %v342_v46, %v343_v57 }
 0x185   :  { %v428_v63 = vsel %vm5077_vm0, %v3721_v34, -inf  ;;  %v431_v0 = vsel %vm5076_vm2, %v427_v54, -inf  ;;  %v436_v2 = vmax.f32 %v433_v59, %v434_v60  ;;  %v3562_v4 = vmov 0  }
 0x186   :  { %329 = vmin.xlane.f32.xlu0 %v328_v50  ;;  %260 = vmax.xlane.f32.xlu1 %v259_v51  ;;  %v417_v1 = vmin.f32 %v415_v61, %v416_v42  ;;  %v348_v58 = vmax.f32 %v346_v62, %v347_v53  ;;  %v432_v52 = vsel %vm5076_vm2, %v428_v63, -inf }
 0x187   :  { %v435_v56 = vmax.f32 %v431_v0, %v432_v52  ;;  %3440 = vset.pattern.permute.xlu1 %v3562_v4  ;;  %3439 = vset.pattern.permute.xlu0 %v3562_v4 }
 0x189   :  { %v437_v3 = vmax.f32 %v435_v56, %v436_v2 }
 0x18a   :  { %418 = vmin.xlane.f32.xlu0 %v417_v1  ;;  %349 = vmax.xlane.f32.xlu1 %v348_v58 }
 0x18e   :  { %438 = vmax.xlane.f32.xlu1 %v437_v3 }
 0x20f   :  { %v241_v5 = vpop.xlane.xlu0 %240 }
 0x210   :  { %v242_v6 = vrot.slane %v241_v5, 4 }
 0x212   :  { %v243_v34 = vmin.f32 %v241_v5, %v242_v6 }
 0x213   :  { %v261_v7 = vpop.xlane.xlu1 %260  ;;  %v330_v8 = vpop.xlane.xlu0 %329 }
 0x214   :  { %v262_v10 = vrot.slane %v261_v7, 4  ;;  %v331_v12 = vrot.slane %v330_v8, 4  ;;  %v244_v13 = vrot.slane %v243_v34, 2 }
 0x216   :  { %v263_v14 = vmax.f32 %v261_v7, %v262_v10  ;;  %v332_v16 = vmin.f32 %v330_v8, %v331_v12  ;;  %v245_v18 = vmin.f32 %v243_v34, %v244_v13  ;;  %v295_v34 = vmul.f32 3.0, %v3710_v29 }
 0x217   :  { %v350_v19 = vpop.xlane.xlu1 %349  ;;  %v419_v20 = vpop.xlane.xlu0 %418  ;;  %v384_v7 = vmul.f32 15.0, %v3712_v30 }
 0x218   :  { %v351_v21 = vrot.slane %v350_v19, 4  ;;  %v420_v22 = vrot.slane %v419_v20, 4  ;;  %v246_v23 = vrot.slane %v245_v18, 1  ;;  %v264_v24 = vrot.slane %v263_v14, 2 }
 0x219   :  { %v333_v25 = vrot.slane %v332_v16, 2 }
 0x21a   :  { %v352_v26 = vmax.f32 %v350_v19, %v351_v21  ;;  %v421_v27 = vmin.f32 %v419_v20, %v420_v22  ;;  %v247_v28 = vmin.f32 %v245_v18, %v246_v23  ;;  %v265_v35 = vmax.f32 %v263_v14, %v264_v24 }
 0x21b   :  { %v439_v42 = vpop.xlane.xlu1 %438  ;;  %v334_v43 = vmin.f32 %v332_v16, %v333_v25  ;;  %v388_v23 = vadd.f32 %v384_v7, %v295_v34  ;;  %v473_v25 = vmul.f32 255.0, %v3714_v31  ;;  %v475_v7 = vmul.f32 255.0, %v3737_v41 }
 0x21c   :  { %v440_v45 = vrot.slane %v439_v42, 4  ;;  %3377 = vpush %v247_v28  ;;  %v266_v46 = vrot.slane %v265_v35, 1  ;;  %v353_v47 = vrot.slane %v352_v26, 2  ;;  %v422_v48 = vrot.slane %v421_v27, 2 }
 0x21d   :  { %v335_v49 = vrot.slane %v334_v43, 1 }
 0x21e   :  { %v441_v50 = vmax.f32 %v439_v42, %v440_v45  ;;  %v267_v51 = vmax.f32 %v265_v35, %v266_v46  ;;  %v354_v53 = vmax.f32 %v352_v26, %v353_v47  ;;  %v423_v54 = vmin.f32 %v421_v27, %v422_v48 }
 0x21f   :  { %v336_v55 = vmin.f32 %v334_v43, %v335_v49  ;;  %v294_v26 = vmul.f32 3.0, %v3717_v32  ;;  %v383_v27 = vmul.f32 15.0, %v3719_v33  ;;  %v477_v48 = vadd.f32 %v473_v25, %v388_v23 }
 0x220   :  { %3379 = vpush %v267_v51  ;;  %v355_v57 = vrot.slane %v354_v53, 1  ;;  %v424_v59 = vrot.slane %v423_v54, 1  ;;  %v442_v60 = vrot.slane %v441_v50, 2 }
 0x221   :  { %3381 = vpush %v336_v55  ;;  %v387_v49 = vadd.f32 %v383_v27, %v294_v26  ;;  %vm573_vm15 = vcmp.gt.f32.partialorder %v477_v48, 0.0  ;;  %v296_v27 = vmul.f32 3.0, %v3727_v37 }
 0x222   :  { %v356_v61 = vmax.f32 %v354_v53, %v355_v57  ;;  %v425_v62 = vmin.f32 %v423_v54, %v424_v59  ;;  %v443_v63 = vmax.f32 %v441_v50, %v442_v60  ;;  %v472_v50 = vmul.f32 255.0, %v3735_v40 }
 0x224   :  { %3383 = vpush %v356_v61  ;;  %v444_v0 = vrot.slane %v443_v63, 1  ;;  %v476_v60 = vadd.f32 %v472_v50, %v387_v49  ;;  %v297_v61 = vmul.f32 3.0, %v3723_v36  ;;  %v631_v49 = vld [vmem:[%s5052_s5 + $0x18] sm:$0xff]  ;;  %v731_v50 = vld [vmem:[%s5053_s6 + $0x10] sm:$0xff] }
 0x225   :  { %3385 = vpush %v425_v62  ;;  %v386_v62 = vmul.f32 15.0, %v3731_v39 }
 0x226   :  { %v445_v1 = vmax.f32 %v443_v63, %v444_v0 }
 0x227   :  { %v390_v34 = vadd.f32 %v386_v62, %v297_v61 }
 0x228   :  { %3387 = vpush %v445_v1 }
 0x24d   :  { %s3378_s1 = spop %3377 }
 0x251   :  { %s3380_s3 = spop %3379 }
 0x252   :  { %p269_p0 = scmp.ge.f32.partialorder %s3380_s3, %s3378_s1  ;;  %s270_s30 = ssub.f32 %s3380_s3, %s3378_s1 }
 0x253   :  { %s3382_s19 = spop %3381 }
 0x254   :  { %s273_s18 = smul.f32 0.33333334, %s270_s30  ;;  %s5257_s1 = smov (!%p269_p0, %s3378_s1), 0.0 }
 0x255   :  { %s3384_s15 = spop %3383  ;;  %v3827_v2 = vstv %s5257_s1 }
 0x256   :  { %s5259_s18 = smov (!%p269_p0, %s273_s18), 0.0  ;;  %p358_p1 = scmp.ge.f32.partialorder %s3384_s15, %s3382_s19  ;;  %v286_v6 = vmul.f32 %v3717_v32, %v3827_v2  ;;  %v287_v21 = vmul.f32 %v3710_v29, %v3827_v2  ;;  %v288_v42 = vmul.f32 %v3727_v37, %v3827_v2 }
 0x257   :  { %s359_s20 = ssub.f32 %s3384_s15, %s3382_s19  ;;  %s3386_s21 = spop %3385  ;;  %v276_v56 = vstv %s5259_s18 }
 0x258   :  { %s5261_s19 = smov (!%p358_p1, %s3382_s19), 0.0  ;;  %v277_v8 = vmul.f32 %v3717_v32, %v276_v56  ;;  %v278_v53 = vmul.f32 %v3710_v29, %v276_v56  ;;  %v279_v63 = vmul.f32 %v3727_v37, %v276_v56 }
 0x259   :  { %s362_s22 = smul.f32 0.06666667, %s359_s20  ;;  %s3388_s23 = spop %3387  ;;  %v3825_v58 = vstv %s5261_s19 }
 0x25a   :  { %p447_p2 = scmp.ge.f32.partialorder %s3388_s23, %s3386_s21  ;;  %s448_s0 = ssub.f32 %s3388_s23, %s3386_s21  ;;  %v375_v3 = vmul.f32 %v3719_v33, %v3825_v58  ;;  %v376_v16 = vmul.f32 %v3712_v30, %v3825_v58  ;;  %v377_v35 = vmul.f32 %v3729_v38, %v3825_v58 }
 0x25b   :  { %s5263_s22 = smov (!%p358_p1, %s362_s22), 0.0 }
 0x25c   :  { %v365_v52 = vstv %s5263_s22  ;;  %s451_s4 = smul.f32 0.003921569, %s448_s0  ;;  %s5265_s21 = smov (!%p447_p2, %s3386_s21), 0.0  ;;  %v379_v13 = vadd.f32 %v375_v3, %v286_v6  ;;  %v380_v28 = vadd.f32 %v376_v16, %v287_v21  ;;  %v381_v51 = vadd.f32 %v377_v35, %v288_v42  ;;  %v629_v35 = vld [vmem:[%s5052_s5 + $0x8] sm:$0xff]  ;;  %v729_v42 = vld [vmem:[%s5053_s6] sm:$0xff] }
 0x25d   :  { %v366_v5 = vmul.f32 %v3719_v33, %v365_v52  ;;  %v3837_v10 = vstv %s5265_s21  ;;  %v367_v47 = vmul.f32 %v3712_v30, %v365_v52  ;;  %v368_v55 = vmul.f32 %v3729_v38, %v365_v52 }
 0x25e   :  { %s5267_s4 = smov (!%p447_p2, %s451_s4), 0.0  ;;  %v464_v14 = vmul.f32 %v3735_v40, %v3837_v10  ;;  %v465_v22 = vmul.f32 %v3714_v31, %v3837_v10  ;;  %v466_v46 = vmul.f32 %v3744_v44, %v3837_v10  ;;  %v369_v3 = vmul.f32 %v3731_v39, %v365_v52 }
 0x25f   :  { %v454_v12 = vstv %s5267_s4  ;;  %v370_v18 = vadd.f32 %v366_v5, %v277_v8  ;;  %v371_v59 = vadd.f32 %v367_v47, %v278_v53  ;;  %v372_v5 = vadd.f32 %v368_v55, %v279_v63  ;;  %v732_v53 = vld [vmem:[%s5053_s6 + $0x18] sm:$0xff] }
 0x260   :  { %v455_v19 = vmul.f32 %v3735_v40, %v454_v12  ;;  %v468_v20 = vadd.f32 %v464_v14, %v379_v13  ;;  %v469_v43 = vadd.f32 %v465_v22, %v380_v28  ;;  %v456_v54 = vmul.f32 %v3714_v31, %v454_v12 }
 0x261   :  { %v470_v57 = vadd.f32 %v466_v46, %v381_v51  ;;  %v457_v1 = vmul.f32 %v3744_v44, %v454_v12  ;;  %v605_v6 = vsel %vm573_vm15, 1, %v3562_v4  ;;  %v280_v8 = vmul.f32 %v3723_v36, %v276_v56 }
 0x262   :  { %v3848_v24 = vadd.f32 %v455_v19, %v370_v18  ;;  %490 = vperm.xlu1 %3440, %v468_v20   ;;  %v460_v0 = vadd.f32 %v456_v54, %v371_v59  ;;  %v458_v14 = vmul.f32 %v3737_v41, %v454_v12  ;;  %v479_v19 = vadd.f32 %v475_v7, %v390_v34 }
 0x263   :  { %v461_v13 = vadd.f32 %v457_v1, %v372_v5  ;;  %v373_v16 = vadd.f32 %v369_v3, %v280_v8  ;;  %v378_v21 = vmul.f32 %v3731_v39, %v3825_v58  ;;  %v289_v56 = vmul.f32 %v3723_v36, %v3827_v2 }
 0x264   :  { %vm480_vm13 = vcmp.gt.f32.partialorder %v3848_v24, 0.0  ;;  %vm575_vm7 = vcmp.gt.f32.partialorder %v479_v19, 0.0  ;;  %v467_v12 = vmul.f32 %v3737_v41, %v3837_v10  ;;  %v385_v58 = vmul.f32 15.0, %v3729_v38  ;;  %v628_v10 = vld [vmem:[%s5052_s5] sm:$0xff] }
 0x265   :  { %v484_v45 = vsel %vm480_vm13, %v3848_v24, 1.0  ;;  %vm481_vm13 = vcmp.gt.f32.partialorder %v460_v0, 0.0  ;;  %vm482_vm12 = vcmp.gt.f32.partialorder %v461_v13, 0.0  ;;  %v462_v52 = vadd.f32 %v458_v14, %v373_v16 }
 0x266   :  { %514 = vperm.xlu0 %3439, %v484_v45   ;;  %495 = vperm.xlu1 %3440, %v469_v43   ;;  %v485_v18 = vsel %vm481_vm13, %v460_v0, 1.0  ;;  %v486_v20 = vsel %vm482_vm12, %v461_v13, 1.0  ;;  %v382_v23 = vadd.f32 %v378_v21, %v289_v56  ;;  %v607_v25 = vsel %vm575_vm7, 1, %v3562_v4 }
 0x267   :  { %vm483_vm15 = vcmp.gt.f32.partialorder %v462_v52, 0.0  ;;  %vm572_vm12 = vcmp.gt.f32.partialorder %v476_v60, 0.0  ;;  %v389_v2 = vadd.f32 %v385_v58, %v296_v27  ;;  %v474_v28 = vmul.f32 255.0, %v3744_v44 }
 0x268   :  { %v487_v22 = vsel %vm483_vm15, %v462_v52, 1.0  ;;  %v471_v26 = vadd.f32 %v467_v12, %v382_v23  ;;  %v604_v43 = vsel %vm572_vm12, 1, %v3562_v4  ;;  %v3313_v45 = vpack.c.bf16 %v629_v35, %v628_v10 }
 0x269   :  { %v478_v47 = vadd.f32 %v474_v28, %v389_v2  ;;  %v3325_v54 = vpack.c.bf16 %v732_v53, %v731_v50 }
 0x26a   :  { %555 = vperm.xlu0 %3439, %v477_v48   ;;  %500 = vperm.xlu1 %3440, %v470_v57   ;;  %v630_v48 = vld [vmem:[%s5052_s5 + $0x10] sm:$0xff] }
 0x26b   :  { %3314 = vmatprep.subr.bf16.mxu1 %v3313_v45  ;;  %v3317_v51 = vpack.c.bf16 %v631_v49, %v630_v48  ;;  %vm574_vm7 = vcmp.gt.f32.partialorder %v478_v47, 0.0 }
 0x26c   :  { %3316 = vmatpush3.bf16.msra.mxu1 %v3313_v45  ;;  %v606_v55 = vsel %vm574_vm7, 1, %v3562_v4 }
 0x26d   :  { %3318 = vmatprep.subr.bf16.mxu1 %v3317_v51 }
 0x26e   :  { %583 = vperm.xlu0 %3439, %v460_v0   ;;  %550 = vperm.xlu1 %3440, %v476_v60  }
 0x270   :  { %3320 = vmatpush3.bf16.msra.mxu1 %v3317_v51 }
 0x272   :  { %612 = vperm.xlu0 %3439, %v605_v6   ;;  %519 = vperm.xlu1 %3440, %v485_v18  }
 0x276   :  { %565 = vperm.xlu0 %3439, %v479_v19   ;;  %524 = vperm.xlu1 %3440, %v486_v20  }
 0x27a   :  { %593 = vperm.xlu0 %3439, %v462_v52   ;;  %529 = vperm.xlu1 %3440, %v487_v22  }
 0x27e   :  { %618 = vperm.xlu0 %3439, %v607_v25   ;;  %505 = vperm.xlu1 %3440, %v471_v26  }
 0x282   :  { %578 = vperm.xlu1 %3440, %v3848_v24   ;;  %v730_v24 = vld [vmem:[%s5053_s6 + $0x8] sm:$0xff] }
 0x283   :  { %v3321_v46 = vpack.c.bf16 %v730_v24, %v729_v42 }
 0x285   :  { %3322 = vmatprep.subr.bf16.mxu0 %v3321_v46 }
 0x286   :  { %609 = vperm.xlu1 %3440, %v604_v43   ;;  %3324 = vmatpush3.bf16.msra.mxu0 %v3321_v46 }
 0x287   :  { %3326 = vmatprep.subr.bf16.mxu0 %v3325_v54 }
 0x28a   :  { %560 = vperm.xlu1 %3440, %v478_v47   ;;  %3328 = vmatpush3.bf16.msra.mxu0 %v3325_v54 }
 0x28e   :  { %588 = vperm.xlu1 %3440, %v461_v13  }
 0x292   :  { %615 = vperm.xlu1 %3440, %v606_v55  }
 0x2e1   :  { %v491_v57 = vpop.permute.xlu1 %490 }
 0x2e2   :  { %v508_v3 = vsub.f32 %v3676_v11, %v491_v57 }
 0x2e5   :  { %v515_v59 = vpop.permute.xlu0 %514  ;;  %v496_v60 = vpop.permute.xlu1 %495 }
 0x2e6   :  { %3441 = vrcp.f32 %v515_v59  ;;  %v509_v8 = vsub.f32 %v3674_v9, %v496_v60 }
 0x2e9   :  { %v501_v61 = vpop.permute.xlu1 %500  ;;  %v3914_v0 = vpop.permute.xlu0 %555 }
 0x2ea   :  { %5137 = vst [vmem:[#allocation15_spill] sm:$0xff] %v3914_v0  ;;  %v510_v21 = vsub.f32 %v3684_v17, %v501_v61 }
 0x2ed   :  { %v3912_v62 = vpop.permute.xlu1 %550  ;;  %v584_v34 = vpop.permute.xlu0 %583 }
 0x2ee   :  { %5136 = vst [vmem:[#allocation14_spill] sm:$0xff] %v3912_v62 }
 0x2f0   :  { %v3442_v63 = vpop.eup %3441 }
 0x2f1   :  { %v520_v1 = vpop.permute.xlu1 %519  ;;  %v533_v5 = vmul.f32 %v3442_v63, %v508_v3  ;;  %v3918_v18 = vpop.permute.xlu0 %612 }
 0x2f2   :  { %3443 = vrcp.f32 %v520_v1  ;;  %5138 = vst [vmem:[#allocation16_spill] sm:$0xff] %v3918_v18  ;;  %vm5071_vm15 = vcmp.eq.s32.totalorder %v3918_v18, 1 }
 0x2f3   :  { %v3389_v4 = vround.rtne.f32 %v533_v5 }
 0x2f5   :  { %v525_v6 = vpop.permute.xlu1 %524  ;;  %v544_v14 = vmax.f32 %v3389_v4, 0.0  ;;  %v3922_v26 = vpop.permute.xlu0 %565  ;;  %v3982_v4 = vld [vmem:[%s5054_s7 + $0x68] sm:$0xff] }
 0x2f6   :  { %3445 = vrcp.f32 %v525_v6  ;;  %5139 = vst [vmem:[#allocation17_spill] sm:$0xff] %v3922_v26 }
 0x2f7   :  { %v568_v56 = vmin.f32 %v3912_v62, %v544_v14 }
 0x2f9   :  { %v530_v7 = vpop.permute.xlu1 %529  ;;  %v594_v47 = vpop.permute.xlu0 %593 }
 0x2fa   :  { %3447 = vrcp.f32 %v530_v7  ;;  %v3987_v7 = vld [vmem:[%s5054_s7 + $0x20] sm:$0xff] }
 0x2fc   :  { %v3444_v13 = vpop.eup %3443 }
 0x2fd   :  { %v535_v16 = vmul.f32 %v3444_v13, %v509_v8  ;;  %v506_v19 = vpop.permute.xlu1 %505  ;;  %v3944_v63 = vpop.permute.xlu0 %618  ;;  %v3992_v8 = vld [vmem:[%s5054_s7 + $0x40] sm:$0xff] }
 0x2fe   :  { %v511_v27 = vsub.f32 %v3682_v15, %v506_v19  ;;  %5142 = vst [vmem:[#allocation20_spill] sm:$0xff] %v3944_v63  ;;  %vm5069_vm12 = vcmp.eq.s32.totalorder %v3944_v63, 1  ;;  %v3997_v13 = vld [vmem:[%s5054_s7 + $0x60] sm:$0xff]  ;;  %v4259_v63 = vld [vmem:[%s5055_s2 + $0x78] sm:$0xff] }
 0x2ff   :  { %v3390_v52 = vround.rtne.f32 %v535_v16 }
 0x300   :  { %v3446_v20 = vpop.eup %3445 }
 0x301   :  { %v545_v12 = vmax.f32 %v3390_v52, 0.0  ;;  %v579_v22 = vpop.permute.xlu1 %578  ;;  %v537_v25 = vmul.f32 %v3446_v20, %v510_v21 }
 0x302   :  { %v596_v23 = vmul.f32 %v579_v22, %v568_v56 }
 0x303   :  { %v569_v58 = vmin.f32 %v3914_v0, %v545_v12  ;;  %v3391_v43 = vround.rtne.f32 %v537_v25 }
 0x304   :  { %v3448_v2 = vpop.eup %3447  ;;  %v600_v28 = vadd.f32 %v596_v23, %v491_v57 }
 0x305   :  { %v539_v10 = vmul.f32 %v3448_v2, %v511_v27  ;;  %v3926_v35 = vpop.permute.xlu1 %609  ;;  %v597_v42 = vmul.f32 %v584_v34, %v569_v58  ;;  %v546_v51 = vmax.f32 %v3391_v43, 0.0  ;;  %v3977_v34 = vld [vmem:[%s5054_s7 + $0x48] sm:$0xff]  ;;  %v821_v43 = vld [vmem:[%s5054_s7 + $0x18] sm:$0xff] }
 0x306   :  { %5140 = vst [vmem:[#allocation18_spill] sm:$0xff] %v3926_v35  ;;  %vm5068_vm13 = vcmp.eq.s32.totalorder %v3926_v35, 1 }
 0x307   :  { %v3392_v45 = vround.rtne.f32 %v539_v10  ;;  %v624_v24 = vsel %vm5068_vm13, %v600_v28, %v3676_v11  ;;  %v601_v46 = vadd.f32 %v597_v42, %v496_v60  ;;  %vm5093_vm13 = vcmask 31744  }
 0x308   :  { %3167 = vmatprep.mubr.msk.f32.mxu1 %vm187_vm1, %v624_v24  ;;  %3181 = vmatprep.mubr.msk.f32.mxu0 %vm187_vm1, %v624_v24 }
 0x309   :  { %v547_v48 = vmax.f32 %v3392_v45, 0.0  ;;  %v3935_v49 = vpop.permute.xlu1 %560  ;;  %v625_v50 = vsel %vm5071_vm15, %v601_v46, %v3674_v9  ;;  %v825_v45 = vld [vmem:[%s5054_s7 + $0x38] sm:$0xff] }
 0x30a   :  { %5141 = vst [vmem:[#allocation19_spill] sm:$0xff] %v3935_v49  ;;  %3168 = vmatmul.mubr.msk.f32.vlgmr.msra.gmra.mrb[0].mxu1 %vm187_vm1, %v625_v50  ;;  %3182 = vmatmul.mubr.msk.f32.vlgmr.msra.gmra.mrb[4].mxu0 %vm187_vm1, %v625_v50  ;;  %v3341_v11 = vpack.c.bf16 %v625_v50, %v624_v24  ;;  %v570_v54 = vmin.f32 %v3935_v49, %v546_v51  ;;  %v829_v24 = vld [vmem:[%s5054_s7 + $0x58] sm:$0xff]  ;;  %v828_v50 = vld [vmem:[%s5054_s7 + $0x50] sm:$0xff] }
 0x30b   :  { %v571_v53 = vmin.f32 %v3922_v26, %v547_v48  ;;  %v833_v46 = vld [vmem:[%s5054_s7 + $0x78] sm:$0xff]  ;;  %v824_v48 = vld [vmem:[%s5054_s7 + $0x30] sm:$0xff] }
 0x30c   :  { %3342 = vmatprep.subr.bf16.mxu0 %v3341_v11 }
 0x30d   :  { %v599_v55 = vmul.f32 %v594_v47, %v571_v53  ;;  %v589_v57 = vpop.permute.xlu1 %588  ;;  %3344 = vmatpush3.bf16.msra.mxu0 %v3341_v11  ;;  %v820_v47 = vld [vmem:[%s5054_s7 + $0x10] sm:$0xff] }
 0x30e   :  { %v598_v59 = vmul.f32 %v589_v57, %v570_v54 }
 0x30f   :  { %v603_v60 = vadd.f32 %v599_v55, %v506_v19 }
 0x310   :  { %v602_v1 = vadd.f32 %v598_v59, %v501_v61  ;;  %v3972_v61 = vld [vmem:[%s5054_s7 + $0x8] sm:$0xff] }
 0x311   :  { %v3946_v9 = vpop.permute.xlu1 %615  ;;  %v627_v5 = vsel %vm5069_vm12, %v603_v60, %v3682_v15  ;;  %v3967_v15 = vld [vmem:[%s5054_s7 + $0x28] sm:$0xff]  ;;  %vm4001_vm12 = vmpackc.low %vm5093_vm13, %vm5093_vm13 }
 0x312   :  { %5143 = vst [vmem:[#allocation21_spill] sm:$0xff] %v3946_v9  ;;  %vm5070_vm7 = vcmp.eq.s32.totalorder %v3946_v9, 1 }
 0x313   :  { %v626_v3 = vsel %vm5070_vm7, %v602_v1, %v3684_v17  ;;  %v818_v17 = vld [vmem:[%s5054_s7] sm:$0xff] }
 0x314   :  { %3170 = vmatprep.mubr.msk.f32.mxu1 %vm187_vm1, %v626_v3  ;;  %3184 = vmatprep.mubr.msk.f32.mxu0 %vm187_vm1, %v626_v3  ;;  %v3345_v6 = vpack.c.bf16 %v627_v5, %v626_v3 }
 0x315   :  { %3171 = vmatmul.mubr.msk.f32.gmra.mrb[2].mxu1 %vm187_vm1, %v627_v5  ;;  %3185 = vmatmul.mubr.msk.f32.gmra.mrb[6].mxu0 %vm187_vm1, %v627_v5 }
 0x316   :  { %3346 = vmatprep.subr.bf16.mxu0 %v3345_v6  ;;  %3195 = vmatprep.mubr.msk.f32.mxu1 %vm5093_vm13, %v818_v17 }
 0x317   :  { %3348 = vmatpush3.bf16.msra.mxu0 %v3345_v6  ;;  %v832_v6 = vld [vmem:[%s5054_s7 + $0x70] sm:$0xff] }
 0x3dd   :  { %v3169_v14 = vpop.f32.mrb[0].mxu1  ;;  %v3183_v16 = vpop.f32.mrb[4].mxu0 }
 0x3de   :  { %v710_v19 = vpop.f32.mrb[1].mxu1  ;;  %v799_v52 = vpop.f32.mrb[5].mxu0  ;;  %v839_v21 = vmul.f32 %v3169_v14, %v3967_v15  ;;  %v835_v56 = vmul.f32 %v3169_v14, %v3972_v61  ;;  %v843_v12 = vmul.f32 %v3169_v14, %v3977_v34  ;;  %v847_v22 = vmul.f32 %v3169_v14, %v3982_v4 }
 0x3df   :  { %v3329_v23 = vpack.c.bf16 %v3183_v16, %v799_v52  ;;  %v838_v25 = vmul.f32 %v3987_v7, %v710_v19  ;;  %v842_v27 = vmul.f32 %v3992_v8, %v710_v19  ;;  %v846_v58 = vmul.f32 %v3997_v13, %v710_v19 }
 0x3e0   :  { %v866_v2 = vsel %vm5093_vm13, %v839_v21, 0.0  ;;  %v854_v28 = vsel %vm5093_vm13, %v835_v56, 0.0  ;;  %v878_v10 = vsel %vm5093_vm13, %v843_v12, 0.0  ;;  %v890_v53 = vsel %vm5093_vm13, %v847_v22, 0.0 }
 0x3e1   :  { %3331 = vmatprep.subr.msk.bf16.mxu1 %vm4001_vm12, %v3329_v23  ;;  %867 = vadd.xlane.f32.xlu1 %v866_v2  ;;  %v863_v42 = vsel %vm5093_vm13, %v838_v25, 0.0  ;;  %v875_v54 = vsel %vm5093_vm13, %v842_v27, 0.0  ;;  %v834_v55 = vmul.f32 %v818_v17, %v710_v19  ;;  %v887_v56 = vsel %vm5093_vm13, %v846_v58, 0.0 }
 0x3e2   :  { %855 = vadd.xlane.f32.xlu0 %v854_v28  ;;  %3334 = vmatpush3.bf16.xpose.msk.msra.mxu1 %vm4001_vm12, %v3329_v23 }
 0x3e3   :  { %v851_v17 = vsel %vm5093_vm13, %v834_v55, 0.0 }
 0x3e5   :  { %879 = vadd.xlane.f32.xlu1 %v878_v10 }
 0x3e6   :  { %864 = vadd.xlane.f32.xlu0 %v863_v42 }
 0x3e8   :  { %v3172_v51 = vpop.f32.mrb[2].mxu1  ;;  %v3186_v11 = vpop.f32.mrb[6].mxu0 }
 0x3e9   :  { %891 = vadd.xlane.f32.xlu1 %v890_v53  ;;  %v720_v57 = vpop.f32.mrb[3].mxu1  ;;  %v809_v59 = vpop.f32.mrb[7].mxu0  ;;  %v837_v60 = vmul.f32 %v3172_v51, %v821_v43  ;;  %v841_v1 = vmul.f32 %v3172_v51, %v825_v45  ;;  %v845_v3 = vmul.f32 %v3172_v51, %v829_v24  ;;  %v849_v5 = vmul.f32 %v3172_v51, %v833_v46  ;;  %v4120_v53 = vld [vmem:[%s5055_s2 + $0x20] sm:$0xff] }
 0x3ea   :  { %876 = vadd.xlane.f32.xlu0 %v875_v54  ;;  %v3335_v14 = vpack.c.bf16 %v3186_v11, %v809_v59  ;;  %v836_v16 = vmul.f32 %v820_v47, %v720_v57  ;;  %v840_v52 = vmul.f32 %v824_v48, %v720_v57  ;;  %v844_v21 = vmul.f32 %v828_v50, %v720_v57  ;;  %v4115_v11 = vld [vmem:[%s5055_s2 + $0x28] sm:$0xff]  ;;  %v4133_v59 = vld [vmem:[%s5055_s2 + $0x30] sm:$0xff] }
 0x3eb   :  { %v848_v19 = vmul.f32 %v832_v6, %v720_v57  ;;  %v860_v12 = vsel %vm5093_vm13, %v837_v60, 0.0  ;;  %v872_v23 = vsel %vm5093_vm13, %v841_v1, 0.0  ;;  %v884_v20 = vsel %vm5093_vm13, %v845_v3, 0.0  ;;  %v4128_v57 = vld [vmem:[%s5055_s2 + $0x38] sm:$0xff]  ;;  %v4141_v1 = vld [vmem:[%s5055_s2 + $0x48] sm:$0xff] }
 0x3ec   :  { %3337 = vmatprep.subr.msk.bf16.mxu1 %vm4001_vm12, %v3335_v14  ;;  %v857_v22 = vsel %vm5093_vm13, %v836_v16, 0.0  ;;  %v869_v25 = vsel %vm5093_vm13, %v840_v52, 0.0  ;;  %v881_v27 = vsel %vm5093_vm13, %v844_v21, 0.0  ;;  %vm1125_vm11 = vcmp.gt.f32.partialorder %v4115_v11, 0.0 }
 0x3ed   :  { %852 = vadd.xlane.f32.xlu1 %v851_v17  ;;  %3340 = vmatpush3.bf16.xpose.msk.msra.mxu1 %vm4001_vm12, %v3335_v14  ;;  %v893_v58 = vsel %vm5093_vm13, %v848_v19, 0.0  ;;  %vm1124_vm8 = vcmp.gt.f32.partialorder %v4120_v53, 0.0  ;;  %v4152_v14 = vld [vmem:[%s5055_s2 + $0x40] sm:$0xff]  ;;  %vm1127_vm5 = vcmp.gt.f32.partialorder %v4128_v57, 0.0  ;;  %vm1126_vm2 = vcmp.gt.f32.partialorder %v4133_v59, 0.0 }
 0x3ee   :  { %888 = vadd.xlane.f32.xlu0 %v887_v56  ;;  %vm5094_vm0 = vcmp.gt.f32.partialorder %v4141_v1, 0.0  ;;  %vm1128_vm10 = vcmp.gt.f32.partialorder %v4152_v14, 0.0 }
 0x3f1   :  { %861 = vadd.xlane.f32.xlu1 %v860_v12 }
 0x3f2   :  { %858 = vadd.xlane.f32.xlu0 %v857_v22 }
 0x3f4   :  { %3196 = vmatmul.mubr.msk.f32.vlgmr.msra.gmra.mrb[4].mxu1 %vm5093_vm13, %v3972_v61  ;;  %v896_v61 = vsel %vm5093_vm13, %v849_v5, 0.0 }
 0x3f5   :  { %873 = vadd.xlane.f32.xlu1 %v872_v23  ;;  %3198 = vmatprep.mubr.msk.f32.mxu1 %vm5093_vm13, %v820_v47  ;;  %v4108_v47 = vld [vmem:[%s5055_s2 + $0x10] sm:$0xff] }
 0x3f6   :  { %870 = vadd.xlane.f32.xlu0 %v869_v25  ;;  %vm1122_vm6 = vcmp.gt.f32.partialorder %v4108_v47, 0.0 }
 0x3f8   :  { %3199 = vmatmul.mubr.msk.f32.gmra.mrb[6].mxu1 %vm5093_vm13, %v821_v43 }
 0x3f9   :  { %885 = vadd.xlane.f32.xlu1 %v884_v20  ;;  %3201 = vmatprep.mubr.msk.f32.mxu1 %vm5093_vm13, %v3987_v7  ;;  %v4183_v20 = vld [vmem:[%s5055_s2 + $0x58] sm:$0xff] }
 0x3fa   :  { %882 = vadd.xlane.f32.xlu0 %v881_v27  ;;  %v4188_v27 = vld [vmem:[%s5055_s2 + $0x50] sm:$0xff]  ;;  %vm1131_vm4 = vcmp.gt.f32.partialorder %v4183_v20, 0.0 }
 0x3fb   :  { %vm5121_vm3 = vcmp.gt.f32.partialorder %v4188_v27, 0.0 }
 0x3fc   :  { %3202 = vmatmul.mubr.msk.f32.gmra.mrb[8].mxu1 %vm5093_vm13, %v3967_v15 }
 0x3fd   :  { %897 = vadd.xlane.f32.xlu1 %v896_v61  ;;  %3204 = vmatprep.mubr.msk.f32.mxu1 %vm5093_vm13, %v824_v48 }
 0x3fe   :  { %894 = vadd.xlane.f32.xlu0 %v893_v58 }
 0x400   :  { %3205 = vmatmul.mubr.msk.f32.gmra.mrb[10].mxu1 %vm5093_vm13, %v825_v45 }
 0x401   :  { %3207 = vmatprep.mubr.msk.f32.mxu1 %vm5093_vm13, %v3992_v8 }
 0x404   :  { %3208 = vmatmul.mubr.msk.f32.gmra.mrb[12].mxu1 %vm5093_vm13, %v3977_v34 }
 0x405   :  { %3210 = vmatprep.mubr.msk.f32.mxu1 %vm5093_vm13, %v828_v50 }
 0x408   :  { %3211 = vmatmul.mubr.msk.f32.gmra.mrb[14].mxu1 %vm5093_vm13, %v829_v24  ;;  %v4098_v24 = vld [vmem:[%s5055_s2] sm:$0xff] }
 0x409   :  { %3213 = vmatprep.mubr.msk.f32.mxu1 %vm5093_vm13, %v3997_v13  ;;  %vm1120_vm7 = vcmp.gt.f32.partialorder %v4098_v24, 0.0 }
 0x40c   :  { %3214 = vmatmul.mubr.msk.f32.gmra.mrb[16].mxu1 %vm5093_vm13, %v3982_v4  ;;  %v4093_v4 = vld [vmem:[%s5055_s2 + $0x8] sm:$0xff] }
 0x40d   :  { %3216 = vmatprep.mubr.msk.f32.mxu1 %vm5093_vm13, %v832_v6  ;;  %vm1121_vm12 = vcmp.gt.f32.partialorder %v4093_v4, 0.0 }
 0x410   :  { %3217 = vmatmul.mubr.msk.f32.gmra.mrb[18].mxu1 %vm5093_vm13, %v833_v46  ;;  %v4103_v46 = vld [vmem:[%s5055_s2 + $0x18] sm:$0xff]  ;;  %vm5118_vm13 = vcmp.gt.f32.partialorder %v4259_v63, 0.0 }
 0x411   :  { %vm1123_vm15 = vcmp.gt.f32.partialorder %v4103_v46, 0.0 }
 0x46e   :  { %v868_v15 = vpop.xlane.xlu1 %867 }
 0x46f   :  { %v856_v7 = vpop.xlane.xlu0 %855 }
 0x472   :  { %v4082_v8 = vpop.xlane.xlu1 %879 }
 0x473   :  { %v865_v2 = vpop.xlane.xlu0 %864 }
 0x476   :  { %v4084_v34 = vpop.xlane.xlu1 %891 }
 0x477   :  { %v4086_v28 = vpop.xlane.xlu0 %876 }
 0x47a   :  { %v853_v10 = vpop.xlane.xlu1 %852 }
 0x47b   :  { %v4088_v43 = vpop.xlane.xlu0 %888 }
 0x47e   :  { %v862_v50 = vpop.xlane.xlu1 %861 }
 0x47f   :  { %v859_v54 = vpop.xlane.xlu0 %858 }
 0x482   :  { %v874_v56 = vpop.xlane.xlu1 %873 }
 0x483   :  { %v871_v61 = vpop.xlane.xlu0 %870 }
 0x487   :  { %v883_v38 = vpop.xlane.xlu0 %882 }
 0x4c7   :  { %v3197_v42 = vpop.f32.mrb[4].mxu1 }
 0x4c8   :  { %v1025_v13 = vpop.f32.mrb[5].mxu1  ;;  %v4110_v51 = vadd.f32 %v3197_v42, %v856_v7 }
 0x4c9   :  { %v4123_v55 = vadd.f32 %v1025_v13, %v853_v10 }
 0x4ca   :  { %v1137_v16 = vsel %vm1121_vm12, %v4110_v51, inf  ;;  %v1193_v52 = vsel %vm1121_vm12, %v4110_v51, -inf }
 0x4cb   :  { %v3200_v45 = vpop.f32.mrb[6].mxu1  ;;  %v1136_v21 = vsel %vm1120_vm7, %v4123_v55, inf  ;;  %v1192_v17 = vsel %vm1120_vm7, %v4123_v55, -inf  ;;  %v4191_v58 = vsel %vm187_vm1, %v1137_v16, inf  ;;  %v4225_v16 = vld [vmem:[%s5055_s2 + $0x68] sm:$0xff] }
 0x4cc   :  { %v1035_v48 = vpop.f32.mrb[7].mxu1  ;;  %v4143_v3 = vadd.f32 %v3200_v45, %v862_v50  ;;  %v4203_v42 = vsel %vm187_vm1, %v1136_v21, inf  ;;  %v4206_v13 = vsel %vm187_vm1, %v1192_v17, -inf  ;;  %vm5120_vm14 = vcmp.gt.f32.partialorder %v4225_v16, 0.0 }
 0x4cd   :  { %v4168_v19 = vadd.f32 %v1035_v48, %v859_v54 }
 0x4ce   :  { %v1139_v7 = vsel %vm1123_vm15, %v4143_v3, inf }
 0x4cf   :  { %v3203_v60 = vpop.f32.mrb[8].mxu1  ;;  %v1138_v50 = vsel %vm1122_vm6, %v4168_v19, inf  ;;  %v1194_v54 = vsel %vm1122_vm6, %v4168_v19, -inf }
 0x4d0   :  { %v4145_v5 = vadd.f32 %v3203_v60, %v868_v15  ;;  %v1045_v6 = vpop.f32.mrb[9].mxu1  ;;  %v4194_v15 = vsel %vm187_vm1, %v1193_v52, -inf  ;;  %v4228_v52 = vsel %vm187_vm1, %v1139_v7, inf  ;;  %v1154_v9 = vsel %vm187_vm1, %v1138_v50, inf  ;;  %v4279_v50 = vld [vmem:[%s5055_s2 + $0x70] sm:$0xff] }
 0x4d1   :  { %v4177_v23 = vadd.f32 %v1045_v6, %v865_v2  ;;  %v1195_v2 = vsel %vm1123_vm15, %v4143_v3, -inf  ;;  %v4263_v26 = vsel %vm187_vm1, %v1194_v54, -inf }
 0x4d2   :  { %v1141_v12 = vsel %vm1125_vm11, %v4145_v5, inf  ;;  %v1197_v22 = vsel %vm1125_vm11, %v4145_v5, -inf  ;;  %v4231_v21 = vsel %vm187_vm1, %v1195_v2, -inf }
 0x4d3   :  { %v3206_v25 = vpop.f32.mrb[10].mxu1  ;;  %v1158_v60 = vsel %vm187_vm1, %v1141_v12, inf  ;;  %v1214_v6 = vsel %vm187_vm1, %v1197_v22, -inf  ;;  %v1140_v17 = vsel %vm1124_vm8, %v4177_v23, inf  ;;  %v4242_v22 = vld [vmem:[%s5055_s2 + $0x60] sm:$0xff] }
 0x4d4   :  { %v1055_v10 = vpop.f32.mrb[11].mxu1  ;;  %v4208_v45 = vadd.f32 %v3206_v25, %v874_v56  ;;  %v1196_v56 = vsel %vm1124_vm8, %v4177_v23, -inf  ;;  %v1159_v35 = vmin.f32 %v4191_v58, %v1158_v60  ;;  %v1215_v18 = vmax.f32 %v4194_v15, %v1214_v6 }
 0x4d5   :  { %v4210_v48 = vadd.f32 %v1055_v10, %v871_v61  ;;  %v1156_v49 = vsel %vm187_vm1, %v1140_v17, inf  ;;  %v1212_v62 = vsel %vm187_vm1, %v1196_v56, -inf  ;;  %vm5119_vm9 = vcmp.gt.f32.partialorder %v4242_v22, 0.0 }
 0x4d6   :  { %v1143_v25 = vsel %vm1127_vm5, %v4208_v45, inf  ;;  %v1199_v61 = vsel %vm1127_vm5, %v4208_v45, -inf  ;;  %v1213_v37 = vmax.f32 %v4206_v13, %v1212_v62 }
 0x4d7   :  { %v3209_v12 = vpop.f32.mrb[12].mxu1  ;;  %v1142_v7 = vsel %vm1126_vm2, %v4210_v48, inf  ;;  %v1198_v2 = vsel %vm1126_vm2, %v4210_v48, -inf  ;;  %v1162_v58 = vsel %vm187_vm1, %v1143_v25, inf  ;;  %v1218_v15 = vsel %vm187_vm1, %v1199_v61, -inf  ;;  %v886_v25 = vpop.xlane.xlu1 %885 }
 0x4d8   :  { %v1065_v10 = vpop.f32.mrb[13].mxu1  ;;  %v4271_v0 = vadd.f32 %v3209_v12, %v4082_v8  ;;  %v1160_v54 = vsel %vm187_vm1, %v1142_v7, inf  ;;  %v1216_v60 = vsel %vm187_vm1, %v1198_v2, -inf  ;;  %v1157_v61 = vmin.f32 %v4203_v42, %v1156_v49 }
 0x4d9   :  { %v4274_v44 = vadd.f32 %v1065_v10, %v4086_v28  ;;  %v1163_v41 = vmin.f32 %v4228_v52, %v1162_v58  ;;  %v1219_v39 = vmax.f32 %v4231_v21, %v1218_v15  ;;  %v1161_v36 = vmin.f32 %v1154_v9, %v1160_v54 }
 0x4da   :  { %v1145_v8 = vsel %vm5094_vm0, %v4271_v0, inf  ;;  %v1201_v28 = vsel %vm5094_vm0, %v4271_v0, -inf  ;;  %vm5117_vm0 = vcmp.gt.f32.partialorder %v4279_v50, 0.0  ;;  %v1217_v31 = vmax.f32 %v4263_v26, %v1216_v60 }
 0x4db   :  { %v3212_v6 = vpop.f32.mrb[14].mxu1  ;;  %v1144_v17 = vsel %vm1128_vm10, %v4274_v44, inf  ;;  %v1200_v56 = vsel %vm1128_vm10, %v4274_v44, -inf  ;;  %v1166_v7 = vsel %vm187_vm1, %v1145_v8, inf  ;;  %v1222_v2 = vsel %vm187_vm1, %v1201_v28, -inf  ;;  %v898_v21 = vpop.xlane.xlu1 %897 }
 0x4dc   :  { %v1075_v12 = vpop.f32.mrb[15].mxu1  ;;  %v1164_v10 = vsel %vm187_vm1, %v1144_v17, inf  ;;  %v1220_v49 = vsel %vm187_vm1, %v1200_v56, -inf  ;;  %v4309_v42 = vadd.f32 %v3212_v6, %v886_v25  ;;  %v1167_v17 = vmin.f32 %v1159_v35, %v1166_v7  ;;  %v895_v56 = vpop.xlane.xlu0 %894 }
 0x4dd   :  { %v4311_v8 = vadd.f32 %v1075_v12, %v883_v38  ;;  %v1223_v40 = vmax.f32 %v1215_v18, %v1222_v2  ;;  %v1165_v33 = vmin.f32 %v1157_v61, %v1164_v10  ;;  %v1221_v58 = vmax.f32 %v1213_v37, %v1220_v49 }
 0x4de   :  { %v1147_v9 = vsel %vm1131_vm4, %v4309_v42, inf  ;;  %v1203_v26 = vsel %vm1131_vm4, %v4309_v42, -inf }
 0x4df   :  { %v3215_v28 = vpop.f32.mrb[16].mxu1  ;;  %v1146_v38 = vsel %vm5121_vm3, %v4311_v8, inf  ;;  %v1202_v18 = vsel %vm5121_vm3, %v4311_v8, -inf  ;;  %v1170_v35 = vsel %vm187_vm1, %v1147_v9, inf }
 0x4e0   :  { %v4314_v32 = vadd.f32 %v3215_v28, %v4084_v34  ;;  %v1085_v62 = vpop.f32.mrb[17].mxu1  ;;  %v1226_v34 = vsel %vm187_vm1, %v1203_v26, -inf  ;;  %v1168_v13 = vsel %vm187_vm1, %v1146_v38, inf  ;;  %v1224_v52 = vsel %vm187_vm1, %v1202_v18, -inf }
 0x4e1   :  { %v1171_v15 = vmin.f32 %v1163_v41, %v1170_v35  ;;  %v1227_v54 = vmax.f32 %v1219_v39, %v1226_v34  ;;  %v1169_v60 = vmin.f32 %v1161_v36, %v1168_v13  ;;  %v4339_v61 = vadd.f32 %v1085_v62, %v4088_v43 }
 0x4e2   :  { %v1149_v12 = vsel %vm5120_vm14, %v4314_v32, inf  ;;  %v1205_v25 = vsel %vm5120_vm14, %v4314_v32, -inf  ;;  %v1225_v37 = vmax.f32 %v1217_v31, %v1224_v52 }
 0x4e3   :  { %v3218_v6 = vpop.f32.mrb[18].mxu1  ;;  %v1174_v39 = vsel %vm187_vm1, %v1149_v12, inf  ;;  %v1230_v36 = vsel %vm187_vm1, %v1205_v25, -inf  ;;  %v1148_v10 = vsel %vm5119_vm9, %v4339_v61, inf  ;;  %v1204_v49 = vsel %vm5119_vm9, %v4339_v61, -inf }
 0x4e4   :  { %v4341_v7 = vadd.f32 %v3218_v6, %v898_v21  ;;  %v1095_v2 = vpop.f32.mrb[19].mxu1  ;;  %v1172_v28 = vsel %vm187_vm1, %v1148_v10, inf  ;;  %v1228_v62 = vsel %vm187_vm1, %v1204_v49, -inf  ;;  %v1231_v34 = vmax.f32 %v1223_v40, %v1230_v36 }
 0x4e5   :  { %v4345_v41 = vadd.f32 %v1095_v2, %v895_v56  ;;  %v1229_v35 = vmax.f32 %v1221_v58, %v1228_v62  ;;  %v1173_v6 = vmin.f32 %v1165_v33, %v1172_v28  ;;  %v1175_v12 = vmin.f32 %v1167_v17, %v1174_v39 }
 0x4e6   :  { %v1151_v43 = vsel %vm5118_vm13, %v4341_v7, inf  ;;  %v1207_v31 = vsel %vm5118_vm13, %v4341_v7, -inf }
 0x4e7   :  { %v1178_v9 = vsel %vm187_vm1, %v1151_v43, inf  ;;  %v1234_v26 = vsel %vm187_vm1, %v1207_v31, -inf  ;;  %v1150_v38 = vsel %vm5117_vm0, %v4345_v41, inf  ;;  %v1206_v18 = vsel %vm5117_vm0, %v4345_v41, -inf }
 0x4e8   :  { %v1176_v13 = vsel %vm187_vm1, %v1150_v38, inf  ;;  %v1232_v52 = vsel %vm187_vm1, %v1206_v18, -inf  ;;  %v1235_v21 = vmax.f32 %v1227_v54, %v1234_v26  ;;  %v1179_v2 = vmin.f32 %v1171_v15, %v1178_v9 }
 0x4e9   :  { %v1233_v56 = vmax.f32 %v1225_v37, %v1232_v52  ;;  %v1177_v25 = vmin.f32 %v1169_v60, %v1176_v13  ;;  %v1236_v10 = vmax.f32 %v1229_v35, %v1231_v34  ;;  %v1180_v43 = vmin.f32 %v1173_v6, %v1175_v12 }
 0x4eb   :  { %v1237_v49 = vmax.f32 %v1233_v56, %v1235_v21  ;;  %v1181_v31 = vmin.f32 %v1177_v25, %v1179_v2 }
 0x4ed   :  { %v1238_v30 = vmax.f32 %v1236_v10, %v1237_v49  ;;  %v1182_v29 = vmin.f32 %v1180_v43, %v1181_v31 }
 0x4ef   :  { %1239 = vmax.xlane.f32.xlu1 %v1238_v30  ;;  %1183 = vmin.xlane.f32.xlu0 %v1182_v29 }
 0x57c   :  { %v1240_v58 = vpop.xlane.xlu1 %1239  ;;  %v1184_v36 = vpop.xlane.xlu0 %1183 }
 0x57d   :  { %v1241_v40 = vrot.slane %v1240_v58, 4  ;;  %v1185_v62 = vrot.slane %v1184_v36, 4 }
 0x57f   :  { %v1242_v38 = vmax.f32 %v1240_v58, %v1241_v40  ;;  %v1186_v18 = vmin.f32 %v1184_v36, %v1185_v62 }
 0x581   :  { %v1243_v54 = vrot.slane %v1242_v38, 2  ;;  %v1187_v33 = vrot.slane %v1186_v18, 2 }
 0x583   :  { %v1244_v37 = vmax.f32 %v1242_v38, %v1243_v54  ;;  %v1188_v17 = vmin.f32 %v1186_v18, %v1187_v33 }
 0x585   :  { %v1245_v60 = vrot.slane %v1244_v37, 1  ;;  %v1189_v15 = vrot.slane %v1188_v17, 1 }
 0x587   :  { %v1246_v39 = vmax.f32 %v1244_v37, %v1245_v60  ;;  %v1190_v28 = vmin.f32 %v1188_v17, %v1189_v15 }
 0x589   :  { %3393 = vpush %v1190_v28 }
 0x58a   :  { %3395 = vpush %v1246_v39 }
 0x5ba   :  { %s3394_s0 = spop %3393 }
 0x5bb   :  { %s3396_s4 = spop %3395  ;;  %v4371_v30 = vstv %s3394_s0 }
 0x5bc   :  { %s1248_s24 = ssub.f32 %s3396_s4, %s3394_s0  ;;  %v1255_v9 = vsub.f32 %v4123_v55, %v4371_v30  ;;  %v1256_v26 = vsub.f32 %v4110_v51, %v4371_v30  ;;  %v1257_v35 = vsub.f32 %v4168_v19, %v4371_v30  ;;  %v1258_v34 = vsub.f32 %v4143_v3, %v4371_v30 }
 0x5bd   :  { %v1259_v13 = vsub.f32 %v4177_v23, %v4371_v30  ;;  %v1260_v52 = vsub.f32 %v4145_v5, %v4371_v30  ;;  %v1261_v21 = vsub.f32 %v4210_v48, %v4371_v30  ;;  %v1262_v55 = vsub.f32 %v4208_v45, %v4371_v30 }
 0x5be   :  { %s1251_s25 = smul.f32 0.06666667, %s1248_s24  ;;  %v1263_v51 = vsub.f32 %v4274_v44, %v4371_v30  ;;  %v1264_v19 = vsub.f32 %v4271_v0, %v4371_v30  ;;  %v1265_v3 = vsub.f32 %v4311_v8, %v4371_v30  ;;  %v1266_v23 = vsub.f32 %v4309_v42, %v4371_v30 }
 0x5bf   :  { %v1267_v5 = vsub.f32 %v4339_v61, %v4371_v30  ;;  %v1268_v45 = vsub.f32 %v4314_v32, %v4371_v30  ;;  %v1269_v48 = vsub.f32 %v4345_v41, %v4371_v30  ;;  %v1270_v56 = vsub.f32 %v4341_v7, %v4371_v30 }
 0x5c0   :  { %p1252_p3 = scmp.gt.f32.partialorder %s1251_s25, 0.0  ;;  %v4407_v12 = vstv %s1251_s25 }
 0x5c2   :  { %s1253_s26 = scalar_select %p1252_p3, %s1251_s25, 1.0 }
 0x5c4   :  { %v1271_v29 = vstv %s1253_s26 }
 0x5c5   :  { %3449 = vrcp.f32 %v1271_v29 }
 0x5cf   :  { %v4399_v6 = vpop.eup %3449 }
 0x5d0   :  { %v1274_v25 = vmul.f32 %v4399_v6, %v1256_v26  ;;  %v1273_v2 = vmul.f32 %v4399_v6, %v1255_v9  ;;  %v1276_v10 = vmul.f32 %v4399_v6, %v1258_v34  ;;  %v1275_v49 = vmul.f32 %v4399_v6, %v1257_v35 }
 0x5d1   :  { %v1278_v43 = vmul.f32 %v4399_v6, %v1260_v52  ;;  %v1277_v31 = vmul.f32 %v4399_v6, %v1259_v13  ;;  %v1280_v58 = vmul.f32 %v4399_v6, %v1262_v55  ;;  %v1279_v40 = vmul.f32 %v4399_v6, %v1261_v21 }
 0x5d2   :  { %v3398_v36 = vround.rtne.f32 %v1274_v25  ;;  %v3397_v62 = vround.rtne.f32 %v1273_v2  ;;  %v3400_v38 = vround.rtne.f32 %v1276_v10  ;;  %v3399_v18 = vround.rtne.f32 %v1275_v49 }
 0x5d3   :  { %v3402_v54 = vround.rtne.f32 %v1278_v43  ;;  %v3401_v33 = vround.rtne.f32 %v1277_v31  ;;  %v3404_v37 = vround.rtne.f32 %v1280_v58  ;;  %v3403_v17 = vround.rtne.f32 %v1279_v40 }
 0x5d4   :  { %v1306_v60 = vmax.f32 %v3398_v36, 0.0  ;;  %v1305_v15 = vmax.f32 %v3397_v62, 0.0  ;;  %v1308_v39 = vmax.f32 %v3400_v38, 0.0  ;;  %v1307_v28 = vmax.f32 %v3399_v18, 0.0 }
 0x5d5   :  { %v1310_v29 = vmax.f32 %v3402_v54, 0.0  ;;  %v1309_v9 = vmax.f32 %v3401_v33, 0.0  ;;  %v1312_v26 = vmax.f32 %v3404_v37, 0.0  ;;  %v1311_v35 = vmax.f32 %v3403_v17, 0.0 }
 0x5d6   :  { %v1322_v34 = vmin.f32 %v1306_v60, 15.0  ;;  %v1321_v13 = vmin.f32 %v1305_v15, 15.0  ;;  %v1324_v52 = vmin.f32 %v1308_v39, 15.0  ;;  %v1323_v21 = vmin.f32 %v1307_v28, 15.0 }
 0x5d7   :  { %v1326_v55 = vmin.f32 %v1310_v29, 15.0  ;;  %v1325_v25 = vmin.f32 %v1309_v9, 15.0  ;;  %v1328_v2 = vmin.f32 %v1312_v26, 15.0  ;;  %v1327_v10 = vmin.f32 %v1311_v35, 15.0 }
 0x5d8   :  { %v1339_v49 = vmul.f32 %v4407_v12, %v1322_v34  ;;  %v1338_v43 = vmul.f32 %v4407_v12, %v1321_v13  ;;  %v1341_v31 = vmul.f32 %v4407_v12, %v1324_v52  ;;  %v1340_v58 = vmul.f32 %v4407_v12, %v1323_v21 }
 0x5d9   :  { %v1343_v40 = vmul.f32 %v4407_v12, %v1326_v55  ;;  %v1342_v36 = vmul.f32 %v4407_v12, %v1325_v25  ;;  %v1345_v62 = vmul.f32 %v4407_v12, %v1328_v2  ;;  %v1344_v38 = vmul.f32 %v4407_v12, %v1327_v10 }
 0x5da   :  { %v1355_v18 = vadd.f32 %v1339_v49, %v4371_v30  ;;  %v1354_v54 = vadd.f32 %v1338_v43, %v4371_v30  ;;  %v1357_v33 = vadd.f32 %v1341_v31, %v4371_v30  ;;  %v1356_v37 = vadd.f32 %v1340_v58, %v4371_v30 }
 0x5db   :  { %v1359_v17 = vadd.f32 %v1343_v40, %v4371_v30  ;;  %v1358_v60 = vadd.f32 %v1342_v36, %v4371_v30  ;;  %v1361_v15 = vadd.f32 %v1345_v62, %v4371_v30  ;;  %v1360_v39 = vadd.f32 %v1344_v38, %v4371_v30 }
 0x5dc   :  { %vm1371_vm0 = vcmp.ge.f32.partialorder %v1355_v18, 0.0  ;;  %v1387_v28 = vmul.f32 0.2, %v1355_v18  ;;  %vm1370_vm13 = vcmp.ge.f32.partialorder %v1354_v54, 0.0  ;;  %v1386_v29 = vmul.f32 0.2, %v1354_v54 }
 0x5dd   :  { %vm1373_vm9 = vcmp.ge.f32.partialorder %v1357_v33, 0.0  ;;  %v1389_v9 = vmul.f32 0.2, %v1357_v33  ;;  %vm1372_vm14 = vcmp.ge.f32.partialorder %v1356_v37, 0.0  ;;  %v1388_v26 = vmul.f32 0.2, %v1356_v37 }
 0x5de   :  { %v1403_v35 = vsel %vm1371_vm0, %v1355_v18, %v1387_v28  ;;  %v1402_v34 = vsel %vm1370_vm13, %v1354_v54, %v1386_v29  ;;  %vm1375_vm3 = vcmp.ge.f32.partialorder %v1359_v17, 0.0  ;;  %v1391_v13 = vmul.f32 0.2, %v1359_v17 }
 0x5df   :  { %v4435_v52 = vsel %vm1121_vm12, %v1403_v35, -1e+30  ;;  %v4439_v21 = vsel %vm1120_vm7, %v1402_v34, -1e+30  ;;  %v1405_v55 = vsel %vm1373_vm9, %v1357_v33, %v1389_v9  ;;  %v1404_v25 = vsel %vm1372_vm14, %v1356_v37, %v1388_v26 }
 0x5e0   :  { %v1437_v2 = vsel %vm187_vm1, %v4435_v52, -inf  ;;  %v1434_v10 = vsel %vm187_vm1, %v4439_v21, -inf  ;;  %v4447_v49 = vsel %vm1123_vm15, %v1405_v55, -1e+30  ;;  %v4451_v43 = vsel %vm1122_vm6, %v1404_v25, -1e+30 }
 0x5e1   :  { %1438 = vmax.xlane.f32.xlu1 %v1437_v2  ;;  %1435 = vmax.xlane.f32.xlu0 %v1434_v10  ;;  %v1443_v31 = vsel %vm187_vm1, %v4447_v49, -inf  ;;  %v1440_v58 = vsel %vm187_vm1, %v4451_v43, -inf  ;;  %v1407_v40 = vsel %vm1375_vm3, %v1359_v17, %v1391_v13  ;;  %vm1374_vm9 = vcmp.ge.f32.partialorder %v1358_v60, 0.0 }
 0x5e2   :  { %v4459_v36 = vsel %vm1125_vm11, %v1407_v40, -1e+30  ;;  %v1390_v62 = vmul.f32 0.2, %v1358_v60  ;;  %vm1377_vm14 = vcmp.ge.f32.partialorder %v1361_v15, 0.0  ;;  %vm1376_vm0 = vcmp.ge.f32.partialorder %v1360_v39, 0.0 }
 0x5e3   :  { %v1449_v38 = vsel %vm187_vm1, %v4459_v36, -inf  ;;  %v1393_v18 = vmul.f32 0.2, %v1361_v15  ;;  %v1392_v54 = vmul.f32 0.2, %v1360_v39  ;;  %v1282_v33 = vmul.f32 %v4399_v6, %v1264_v19 }
 0x5e4   :  { %v1406_v37 = vsel %vm1374_vm9, %v1358_v60, %v1390_v62  ;;  %v1281_v17 = vmul.f32 %v4399_v6, %v1263_v51  ;;  %v1284_v28 = vmul.f32 %v4399_v6, %v1266_v23  ;;  %v1283_v29 = vmul.f32 %v4399_v6, %v1265_v3 }
 0x5e5   :  { %1444 = vmax.xlane.f32.xlu1 %v1443_v31  ;;  %1441 = vmax.xlane.f32.xlu0 %v1440_v58  ;;  %v4481_v0 = vsel %vm1124_vm8, %v1406_v37, -1e+30  ;;  %v1409_v19 = vsel %vm1377_vm14, %v1361_v15, %v1393_v18  ;;  %v1408_v44 = vsel %vm1376_vm0, %v1360_v39, %v1392_v54  ;;  %v3406_v60 = vround.rtne.f32 %v1282_v33 }
 0x5e6   :  { %v1446_v51 = vsel %vm187_vm1, %v4481_v0, -inf  ;;  %v4487_v42 = vsel %vm1127_vm5, %v1409_v19, -1e+30  ;;  %v4491_v8 = vsel %vm1126_vm2, %v1408_v44, -1e+30  ;;  %v3405_v3 = vround.rtne.f32 %v1281_v17 }
 0x5e7   :  { %v1455_v23 = vsel %vm187_vm1, %v4487_v42, -inf  ;;  %v1452_v15 = vsel %vm187_vm1, %v4491_v8, -inf  ;;  %v1314_v39 = vmax.f32 %v3406_v60, 0.0  ;;  %v3408_v9 = vround.rtne.f32 %v1284_v28 }
 0x5e8   :  { %v1313_v26 = vmax.f32 %v3405_v3, 0.0  ;;  %v3407_v35 = vround.rtne.f32 %v1283_v29  ;;  %v1286_v34 = vmul.f32 %v4399_v6, %v1268_v45  ;;  %v1285_v13 = vmul.f32 %v4399_v6, %v1267_v5 }
 0x5e9   :  { %1450 = vmax.xlane.f32.xlu1 %v1449_v38  ;;  %1447 = vmax.xlane.f32.xlu0 %v1446_v51  ;;  %v1330_v55 = vmin.f32 %v1314_v39, 15.0  ;;  %v1316_v25 = vmax.f32 %v3408_v9, 0.0  ;;  %v1288_v2 = vmul.f32 %v4399_v6, %v1270_v56  ;;  %v1287_v32 = vmul.f32 %v4399_v6, %v1269_v48 }
 0x5ea   :  { %v1329_v45 = vmin.f32 %v1313_v26, 15.0  ;;  %v1315_v10 = vmax.f32 %v3407_v35, 0.0  ;;  %v3410_v31 = vround.rtne.f32 %v1286_v34  ;;  %v3409_v61 = vround.rtne.f32 %v1285_v13 }
 0x5eb   :  { %v1347_v5 = vmul.f32 %v4407_v12, %v1330_v55  ;;  %v1332_v58 = vmin.f32 %v1316_v25, 15.0  ;;  %v3412_v40 = vround.rtne.f32 %v1288_v2  ;;  %v3411_v62 = vround.rtne.f32 %v1287_v32 }
 0x5ec   :  { %v1346_v38 = vmul.f32 %v4407_v12, %v1329_v45  ;;  %v1331_v18 = vmin.f32 %v1315_v10, 15.0  ;;  %v1318_v7 = vmax.f32 %v3410_v31, 0.0  ;;  %v1317_v54 = vmax.f32 %v3409_v61, 0.0 }
 0x5ed   :  { %1456 = vmax.xlane.f32.xlu1 %v1455_v23  ;;  %1453 = vmax.xlane.f32.xlu0 %v1452_v15  ;;  %v1363_v41 = vadd.f32 %v1347_v5, %v4371_v30  ;;  %v1349_v6 = vmul.f32 %v4407_v12, %v1332_v58  ;;  %v1320_v48 = vmax.f32 %v3412_v40, 0.0  ;;  %v1319_v56 = vmax.f32 %v3411_v62, 0.0 }
 0x5ee   :  { %v1362_v33 = vadd.f32 %v1346_v38, %v4371_v30  ;;  %v1348_v37 = vmul.f32 %v4407_v12, %v1331_v18  ;;  %v1334_v17 = vmin.f32 %v1318_v7, 15.0  ;;  %v1333_v28 = vmin.f32 %v1317_v54, 15.0 }
 0x5ef   :  { %vm1379_vm2 = vcmp.ge.f32.partialorder %v1363_v41, 0.0  ;;  %v1395_v29 = vmul.f32 0.2, %v1363_v41  ;;  %v1365_v19 = vadd.f32 %v1349_v6, %v4371_v30  ;;  %v1336_v44 = vmin.f32 %v1320_v48, 15.0 }
 0x5f0   :  { %vm1378_vm3 = vcmp.ge.f32.partialorder %v1362_v33, 0.0  ;;  %v1394_v60 = vmul.f32 0.2, %v1362_v33  ;;  %v1364_v51 = vadd.f32 %v1348_v37, %v4371_v30  ;;  %v1351_v3 = vmul.f32 %v4407_v12, %v1334_v17 }
 0x5f1   :  { %v1411_v23 = vsel %vm1379_vm2, %v1363_v41, %v1395_v29  ;;  %vm1381_vm5 = vcmp.ge.f32.partialorder %v1365_v19, 0.0  ;;  %v1397_v15 = vmul.f32 0.2, %v1365_v19  ;;  %v1350_v39 = vmul.f32 %v4407_v12, %v1333_v28 }
 0x5f2   :  { %vm5146_vm8 = vcmp.gt.f32.partialorder %v4141_v1, 0.0  ;;  %v1410_v26 = vsel %vm1378_vm3, %v1362_v33, %v1394_v60  ;;  %vm1380_vm11 = vcmp.ge.f32.partialorder %v1364_v51, 0.0  ;;  %v1396_v35 = vmul.f32 0.2, %v1364_v51 }
 0x5f3   :  { %v4525_v9 = vsel %vm5146_vm8, %v1411_v23, -1e+30  ;;  %v4531_v13 = vsel %vm1128_vm10, %v1410_v26, -1e+30  ;;  %v1413_v55 = vsel %vm1381_vm5, %v1365_v19, %v1397_v15  ;;  %v1367_v25 = vadd.f32 %v1351_v3, %v4371_v30 }
 0x5f4   :  { %v1461_v34 = vsel %vm187_vm1, %v4525_v9, -inf  ;;  %v1458_v2 = vsel %vm187_vm1, %v4531_v13, -inf  ;;  %v4538_v32 = vsel %vm1131_vm4, %v1413_v55, -1e+30  ;;  %v1412_v45 = vsel %vm1380_vm11, %v1364_v51, %v1396_v35 }
 0x5f5   :  { %1462 = vmax.xlane.f32.xlu1 %v1461_v34  ;;  %v1366_v10 = vadd.f32 %v1350_v39, %v4371_v30  ;;  %1459 = vmax.xlane.f32.xlu0 %v1458_v2  ;;  %vm5147_vm13 = vcmp.gt.f32.partialorder %v4188_v27, 0.0  ;;  %vm1383_vm10 = vcmp.ge.f32.partialorder %v1367_v25, 0.0  ;;  %v1399_v61 = vmul.f32 0.2, %v1367_v25 }
 0x5f6   :  { %v4543_v31 = vsel %vm5147_vm13, %v1412_v45, -1e+30  ;;  %v1353_v58 = vmul.f32 %v4407_v12, %v1336_v44  ;;  %v1467_v40 = vsel %vm187_vm1, %v4538_v32, -inf  ;;  %v1335_v38 = vmin.f32 %v1319_v56, 15.0 }
 0x5f7   :  { %vm1382_vm9 = vcmp.ge.f32.partialorder %v1366_v10, 0.0  ;;  %v1398_v5 = vmul.f32 0.2, %v1366_v10  ;;  %v1415_v62 = vsel %vm1383_vm10, %v1367_v25, %v1399_v61  ;;  %v1464_v18 = vsel %vm187_vm1, %v4543_v31, -inf }
 0x5f8   :  { %vm5148_vm4 = vcmp.gt.f32.partialorder %v4225_v16, 0.0  ;;  %v1369_v41 = vadd.f32 %v1353_v58, %v4371_v30  ;;  %vm5149_vm14 = vcmp.gt.f32.partialorder %v4242_v22, 0.0  ;;  %v1352_v48 = vmul.f32 %v4407_v12, %v1335_v38 }
 0x5f9   :  { %1468 = vmax.xlane.f32.xlu1 %v1467_v40  ;;  %v4552_v7 = vsel %vm5148_vm4, %v1415_v62, -1e+30  ;;  %v1414_v54 = vsel %vm1382_vm9, %v1366_v10, %v1398_v5  ;;  %1465 = vmax.xlane.f32.xlu0 %v1464_v18  ;;  %vm5150_vm2 = vcmp.gt.f32.partialorder %v4259_v63, 0.0  ;;  %vm5151_vm5 = vcmp.gt.f32.partialorder %v4279_v50, 0.0 }
 0x5fa   :  { %v4557_v6 = vsel %vm5149_vm14, %v1414_v54, -1e+30  ;;  %vm1385_vm0 = vcmp.ge.f32.partialorder %v1369_v41, 0.0  ;;  %v1401_v56 = vmul.f32 0.2, %v1369_v41  ;;  %v1473_v33 = vsel %vm187_vm1, %v4552_v7, -inf }
 0x5fb   :  { %v1368_v37 = vadd.f32 %v1352_v48, %v4371_v30  ;;  %v1470_v17 = vsel %vm187_vm1, %v4557_v6, -inf  ;;  %vm5152_vm8 = vcmask 31744  }
 0x5fc   :  { %v1417_v28 = vsel %vm1385_vm0, %v1369_v41, %v1401_v56  ;;  %vm5153_vm11 = vmmov %vm5152_vm8 }
 0x5fd   :  { %1474 = vmax.xlane.f32.xlu1 %v1473_v33  ;;  %1471 = vmax.xlane.f32.xlu0 %v1470_v17  ;;  %v4567_v29 = vsel %vm5150_vm2, %v1417_v28, -1e+30  ;;  %vm1384_vm3 = vcmp.ge.f32.partialorder %v1368_v37, 0.0  ;;  %v1400_v19 = vmul.f32 0.2, %v1368_v37  ;;  %vm5154_vm13 = vmmov %vm5152_vm8 }
 0x5fe   :  { %v1479_v12 = vsel %vm187_vm1, %v4567_v29, -inf  ;;  %vm5155_vm10 = vmmov %vm5152_vm8 }
 0x5ff   :  { %v1416_v44 = vsel %vm1384_vm3, %v1368_v37, %v1400_v19  ;;  %vm5156_vm9 = vmmov %vm5152_vm8 }
 0x600   :  { %v4573_v30 = vsel %vm5151_vm5, %v1416_v44, -1e+30  ;;  %vm5157_vm4 = vmmov %vm5152_vm8 }
 0x601   :  { %1480 = vmax.xlane.f32.xlu1 %v1479_v12  ;;  %v1476_v60 = vsel %vm187_vm1, %v4573_v30, -inf  ;;  %vm5158_vm14 = vmmov %vm5157_vm4 }
 0x602   :  { %1477 = vmax.xlane.f32.xlu0 %v1476_v60  ;;  %vm5159_vm0 = vmmov %vm5157_vm4 }
 0x66e   :  { %v1439_v51 = vpop.xlane.xlu1 %1438  ;;  %v1436_v3 = vpop.xlane.xlu0 %1435 }
 0x66f   :  { %v1483_v23 = vsub.f32 %v4435_v52, %v1439_v51  ;;  %v1482_v15 = vsub.f32 %v4439_v21, %v1436_v3 }
 0x671   :  { %v1500_v39 = vmul.f32 1.442695, %v1483_v23  ;;  %v1498_v26 = vmul.f32 1.442695, %v1482_v15 }
 0x672   :  { %v1445_v35 = vpop.xlane.xlu1 %1444  ;;  %v1442_v34 = vpop.xlane.xlu0 %1441 }
 0x673   :  { %3451 = vpow2.f32 %v1500_v39  ;;  %v1485_v55 = vsub.f32 %v4447_v49, %v1445_v35  ;;  %v1484_v25 = vsub.f32 %v4451_v43, %v1442_v34 }
 0x674   :  { %3453 = vpow2.f32 %v1498_v26 }
 0x675   :  { %v1504_v2 = vmul.f32 1.442695, %v1485_v55  ;;  %v1502_v45 = vmul.f32 1.442695, %v1484_v25 }
 0x676   :  { %v1451_v10 = vpop.xlane.xlu1 %1450  ;;  %v1448_v61 = vpop.xlane.xlu0 %1447 }
 0x677   :  { %3455 = vpow2.f32 %v1504_v2  ;;  %v1487_v5 = vsub.f32 %v4459_v36, %v1451_v10  ;;  %v1486_v52 = vsub.f32 %v4481_v0, %v1448_v61 }
 0x678   :  { %3457 = vpow2.f32 %v1502_v45 }
 0x679   :  { %v1508_v21 = vmul.f32 1.442695, %v1487_v5  ;;  %v1506_v58 = vmul.f32 1.442695, %v1486_v52 }
 0x67a   :  { %v1457_v40 = vpop.xlane.xlu1 %1456  ;;  %v1454_v62 = vpop.xlane.xlu0 %1453 }
 0x67b   :  { %3459 = vpow2.f32 %v1508_v21  ;;  %v1489_v49 = vsub.f32 %v4487_v42, %v1457_v40  ;;  %v1488_v43 = vsub.f32 %v4491_v8, %v1454_v62 }
 0x67c   :  { %3461 = vpow2.f32 %v1506_v58 }
 0x67d   :  { %v3452_v38 = vpop.eup %3451  ;;  %v1512_v18 = vmul.f32 1.442695, %v1489_v49  ;;  %v1510_v54 = vmul.f32 1.442695, %v1488_v43 }
 0x67e   :  { %v3454_v41 = vpop.eup %3453  ;;  %v4586_v48 = vmul.f32 %v3452_v38, %v4093_v4 }
 0x67f   :  { %3463 = vpow2.f32 %v1512_v18  ;;  %v4589_v36 = vmul.f32 %v3454_v41, %v4098_v24 }
 0x680   :  { %3465 = vpow2.f32 %v1510_v54  ;;  %v1549_v0 = vsel %vm187_vm1, %v4586_v48, 0.0 }
 0x681   :  { %v3456_v56 = vpop.eup %3455  ;;  %1550 = vadd.xlane.f32.xlu1 %v1549_v0  ;;  %v1546_v8 = vsel %vm187_vm1, %v4589_v36, 0.0 }
 0x682   :  { %v1463_v42 = vpop.xlane.xlu1 %1462  ;;  %v3458_v33 = vpop.eup %3457  ;;  %1547 = vadd.xlane.f32.xlu0 %v1546_v8  ;;  %v4597_v28 = vmul.f32 %v3456_v56, %v4103_v46 }
 0x683   :  { %v1491_v37 = vsub.f32 %v4525_v9, %v1463_v42  ;;  %v1460_v17 = vpop.xlane.xlu0 %1459  ;;  %v4601_v12 = vmul.f32 %v3458_v33, %v4108_v47 }
 0x684   :  { %v1490_v19 = vsub.f32 %v4531_v13, %v1460_v17  ;;  %v1555_v60 = vsel %vm187_vm1, %v4597_v28, 0.0 }
 0x685   :  { %v1516_v44 = vmul.f32 1.442695, %v1491_v37  ;;  %v3460_v51 = vpop.eup %3459  ;;  %1556 = vadd.xlane.f32.xlu1 %v1555_v60  ;;  %v1552_v9 = vsel %vm187_vm1, %v4601_v12, 0.0 }
 0x686   :  { %v1514_v3 = vmul.f32 1.442695, %v1490_v19  ;;  %v1469_v23 = vpop.xlane.xlu1 %1468  ;;  %v3462_v15 = vpop.eup %3461  ;;  %1553 = vadd.xlane.f32.xlu0 %v1552_v9  ;;  %v4609_v13 = vmul.f32 %v3460_v51, %v4115_v11 }
 0x687   :  { %3467 = vpow2.f32 %v1516_v44  ;;  %v1493_v39 = vsub.f32 %v4538_v32, %v1469_v23  ;;  %v1466_v26 = vpop.xlane.xlu0 %1465  ;;  %v4613_v34 = vmul.f32 %v3462_v15, %v4120_v53 }
 0x688   :  { %3469 = vpow2.f32 %v1514_v3  ;;  %v1492_v35 = vsub.f32 %v4543_v31, %v1466_v26  ;;  %v1561_v25 = vsel %vm187_vm1, %v4609_v13, 0.0 }
 0x689   :  { %v1520_v55 = vmul.f32 1.442695, %v1493_v39  ;;  %v3464_v2 = vpop.eup %3463  ;;  %1562 = vadd.xlane.f32.xlu1 %v1561_v25  ;;  %v1558_v32 = vsel %vm187_vm1, %v4613_v34, 0.0 }
 0x68a   :  { %v1518_v45 = vmul.f32 1.442695, %v1492_v35  ;;  %v1475_v10 = vpop.xlane.xlu1 %1474  ;;  %v3466_v61 = vpop.eup %3465  ;;  %1559 = vadd.xlane.f32.xlu0 %v1558_v32  ;;  %v4621_v53 = vmul.f32 %v3464_v2, %v4128_v57 }
 0x68b   :  { %3471 = vpow2.f32 %v1520_v55  ;;  %v1495_v11 = vsub.f32 %v4552_v7, %v1475_v10  ;;  %v1472_v5 = vpop.xlane.xlu0 %1471  ;;  %v4625_v52 = vmul.f32 %v3466_v61, %v4133_v59 }
 0x68c   :  { %3473 = vpow2.f32 %v1518_v45  ;;  %v1494_v31 = vsub.f32 %v4557_v6, %v1472_v5  ;;  %v1567_v58 = vsel %vm187_vm1, %v4621_v53, 0.0 }
 0x68d   :  { %v1524_v21 = vmul.f32 1.442695, %v1495_v11  ;;  %1568 = vadd.xlane.f32.xlu1 %v1567_v58  ;;  %v1564_v7 = vsel %vm187_vm1, %v4625_v52, 0.0 }
 0x68e   :  { %v1522_v40 = vmul.f32 1.442695, %v1494_v31  ;;  %v1481_v62 = vpop.xlane.xlu1 %1480  ;;  %1565 = vadd.xlane.f32.xlu0 %v1564_v7 }
 0x68f   :  { %3475 = vpow2.f32 %v1524_v21  ;;  %v1497_v57 = vsub.f32 %v4567_v29, %v1481_v62  ;;  %v1478_v49 = vpop.xlane.xlu0 %1477 }
 0x690   :  { %3477 = vpow2.f32 %v1522_v40  ;;  %v1496_v59 = vsub.f32 %v4573_v30, %v1478_v49 }
 0x691   :  { %v3468_v6 = vpop.eup %3467  ;;  %v1528_v43 = vmul.f32 1.442695, %v1497_v57 }
 0x692   :  { %v3470_v38 = vpop.eup %3469  ;;  %v4634_v18 = vmul.f32 %v3468_v6, %v4141_v1  ;;  %v1526_v54 = vmul.f32 1.442695, %v1496_v59 }
 0x693   :  { %3479 = vpow2.f32 %v1528_v43  ;;  %v4637_v41 = vmul.f32 %v3470_v38, %v4152_v14 }
 0x694   :  { %v1573_v0 = vsel %vm187_vm1, %v4634_v18, 0.0  ;;  %3481 = vpow2.f32 %v1526_v54 }
 0x695   :  { %v3472_v29 = vpop.eup %3471  ;;  %1574 = vadd.xlane.f32.xlu1 %v1573_v0  ;;  %v1570_v56 = vsel %vm187_vm1, %v4637_v41, 0.0 }
 0x696   :  { %v3474_v42 = vpop.eup %3473  ;;  %1571 = vadd.xlane.f32.xlu0 %v1570_v56  ;;  %v4644_v30 = vmul.f32 %v3472_v29, %v4183_v20 }
 0x697   :  { %v4647_v1 = vmul.f32 %v3474_v42, %v4188_v27 }
 0x698   :  { %v1579_v14 = vsel %vm187_vm1, %v4644_v30, 0.0 }
 0x699   :  { %v3476_v8 = vpop.eup %3475  ;;  %1580 = vadd.xlane.f32.xlu1 %v1579_v14  ;;  %v1576_v33 = vsel %vm187_vm1, %v4647_v1, 0.0 }
 0x69a   :  { %v3478_v37 = vpop.eup %3477  ;;  %1577 = vadd.xlane.f32.xlu0 %v1576_v33  ;;  %v4654_v17 = vmul.f32 %v3476_v8, %v4225_v16 }
 0x69b   :  { %v4657_v19 = vmul.f32 %v3478_v37, %v4242_v22 }
 0x69c   :  { %v1585_v20 = vsel %vm187_vm1, %v4654_v17, 0.0 }
 0x69d   :  { %v3480_v27 = vpop.eup %3479  ;;  %1586 = vadd.xlane.f32.xlu1 %v1585_v20  ;;  %v1582_v44 = vsel %vm187_vm1, %v4657_v19, 0.0 }
 0x69e   :  { %1583 = vadd.xlane.f32.xlu0 %v1582_v44  ;;  %v4664_v60 = vmul.f32 %v3480_v27, %v4259_v63  ;;  %v3482_v51 = vpop.eup %3481 }
 0x69f   :  { %v4669_v3 = vmul.f32 %v3482_v51, %v4279_v50 }
 0x6a0   :  { %v1591_v16 = vsel %vm187_vm1, %v4664_v60, 0.0 }
 0x6a1   :  { %1592 = vadd.xlane.f32.xlu1 %v1591_v16  ;;  %v1588_v22 = vsel %vm187_vm1, %v4669_v3, 0.0 }
 0x6a2   :  { %1589 = vadd.xlane.f32.xlu0 %v1588_v22 }
 0x70e   :  { %v1551_v23 = vpop.xlane.xlu1 %1550 }
 0x70f   :  { %v1595_v9 = vadd.f32 1e-16, %v1551_v23  ;;  %v1548_v15 = vpop.xlane.xlu0 %1547 }
 0x710   :  { %v1594_v39 = vadd.f32 1e-16, %v1548_v15 }
 0x711   :  { %3483 = vrcp.f32 %v1595_v9 }
 0x712   :  { %3485 = vrcp.f32 %v1594_v39  ;;  %v1557_v63 = vpop.xlane.xlu1 %1556 }
 0x713   :  { %v1597_v26 = vadd.f32 1e-16, %v1557_v63  ;;  %v1554_v35 = vpop.xlane.xlu0 %1553 }
 0x714   :  { %v1596_v55 = vadd.f32 1e-16, %v1554_v35 }
 0x715   :  { %3487 = vrcp.f32 %v1597_v26 }
 0x716   :  { %3489 = vrcp.f32 %v1596_v55  ;;  %v1563_v25 = vpop.xlane.xlu1 %1562 }
 0x717   :  { %v1599_v50 = vadd.f32 1e-16, %v1563_v25  ;;  %v1560_v2 = vpop.xlane.xlu0 %1559 }
 0x718   :  { %v1598_v45 = vadd.f32 1e-16, %v1560_v2 }
 0x719   :  { %3491 = vrcp.f32 %v1599_v50 }
 0x71a   :  { %3493 = vrcp.f32 %v1598_v45  ;;  %v1569_v10 = vpop.xlane.xlu1 %1568 }
 0x71b   :  { %v3484_v32 = vpop.eup %3483  ;;  %v1601_v61 = vadd.f32 1e-16, %v1569_v10  ;;  %v1566_v11 = vpop.xlane.xlu0 %1565 }
 0x71c   :  { %v3486_v5 = vpop.eup %3485  ;;  %v1613_v31 = vmul.f32 %v3484_v32, %v4586_v48  ;;  %v1600_v21 = vadd.f32 1e-16, %v1566_v11  ;;  %v1840_v11 = vld [vmem:[%s5057_s8 + $0x28] sm:$0xff] }
 0x71d   :  { %3495 = vrcp.f32 %v1601_v61  ;;  %v1611_v58 = vmul.f32 %v3486_v5, %v4589_v36  ;;  %v1836_v61 = vld [vmem:[%s5057_s8 + $0x8] sm:$0xff]  ;;  %v1835_v5 = vld [vmem:[%s5057_s8] sm:$0xff] }
 0x71e   :  { %3497 = vrcp.f32 %v1600_v21 }
 0x71f   :  { %v3488_v40 = vpop.eup %3487  ;;  %3227 = vmatprep.mubr.msk.f32.mxu0 %vm187_vm1, %v1611_v58 }
 0x720   :  { %v3490_v62 = vpop.eup %3489  ;;  %3228 = vmatmul.mubr.msk.f32.vlgmr.msra.gmra.mrb[8].mxu0 %vm187_vm1, %v1613_v31  ;;  %v1617_v7 = vmul.f32 %v3488_v40, %v4597_v28  ;;  %v1839_v31 = vld [vmem:[%s5057_s8 + $0x20] sm:$0xff] }
 0x721   :  { %v1615_v49 = vmul.f32 %v3490_v62, %v4601_v12 }
 0x722   :  { %v1575_v57 = vpop.xlane.xlu1 %1574 }
 0x723   :  { %v1603_v6 = vadd.f32 1e-16, %v1575_v57  ;;  %v1572_v43 = vpop.xlane.xlu0 %1571  ;;  %v3492_v59 = vpop.eup %3491  ;;  %3230 = vmatprep.mubr.msk.f32.mxu0 %vm187_vm1, %v1615_v49  ;;  %v1838_v57 = vld [vmem:[%s5057_s8 + $0x18] sm:$0xff] }
 0x724   :  { %v1602_v48 = vadd.f32 1e-16, %v1572_v43  ;;  %v3494_v38 = vpop.eup %3493  ;;  %3231 = vmatmul.mubr.msk.f32.gmra.mrb[10].mxu0 %vm187_vm1, %v1617_v7  ;;  %v1621_v36 = vmul.f32 %v3492_v59, %v4609_v13  ;;  %v1837_v43 = vld [vmem:[%s5057_s8 + $0x10] sm:$0xff] }
 0x725   :  { %3499 = vrcp.f32 %v1603_v6  ;;  %v1619_v0 = vmul.f32 %v3494_v38, %v4613_v34  ;;  %v1842_v6 = vld [vmem:[%s5057_s8 + $0x38] sm:$0xff] }
 0x726   :  { %3501 = vrcp.f32 %v1602_v48  ;;  %v1581_v54 = vpop.xlane.xlu1 %1580  ;;  %v1841_v48 = vld [vmem:[%s5057_s8 + $0x30] sm:$0xff] }
 0x727   :  { %v1605_v28 = vadd.f32 1e-16, %v1581_v54  ;;  %v1578_v29 = vpop.xlane.xlu0 %1577  ;;  %v3496_v56 = vpop.eup %3495  ;;  %3233 = vmatprep.mubr.msk.f32.mxu0 %vm187_vm1, %v1619_v0 }
 0x728   :  { %v1604_v12 = vadd.f32 1e-16, %v1578_v29  ;;  %v3498_v42 = vpop.eup %3497  ;;  %3234 = vmatmul.mubr.msk.f32.gmra.mrb[12].mxu0 %vm187_vm1, %v1621_v36  ;;  %v1625_v14 = vmul.f32 %v3496_v56, %v4621_v53 }
 0x729   :  { %3503 = vrcp.f32 %v1605_v28  ;;  %v1623_v13 = vmul.f32 %v3498_v42, %v4625_v52 }
 0x72a   :  { %3505 = vrcp.f32 %v1604_v12  ;;  %v1587_v8 = vpop.xlane.xlu1 %1586 }
 0x72b   :  { %v1607_v33 = vadd.f32 1e-16, %v1587_v8  ;;  %v1584_v37 = vpop.xlane.xlu0 %1583  ;;  %3236 = vmatprep.mubr.msk.f32.mxu0 %vm187_vm1, %v1623_v13  ;;  %v1843_v8 = vld [vmem:[%s5057_s8 + $0x40] sm:$0xff] }
 0x72c   :  { %v1606_v20 = vadd.f32 1e-16, %v1584_v37  ;;  %3237 = vmatmul.mubr.msk.f32.gmra.mrb[14].mxu0 %vm187_vm1, %v1625_v14  ;;  %v1844_v14 = vld [vmem:[%s5057_s8 + $0x48] sm:$0xff] }
 0x72d   :  { %3507 = vrcp.f32 %v1607_v33 }
 0x72e   :  { %3509 = vrcp.f32 %v1606_v20  ;;  %v1593_v34 = vpop.xlane.xlu1 %1592 }
 0x72f   :  { %v3500_v27 = vpop.eup %3499  ;;  %v1609_v44 = vadd.f32 1e-16, %v1593_v34  ;;  %v1590_v16 = vpop.xlane.xlu0 %1589  ;;  %v1846_v34 = vld [vmem:[%s5057_s8 + $0x58] sm:$0xff] }
 0x730   :  { %v3502_v51 = vpop.eup %3501  ;;  %v1629_v53 = vmul.f32 %v3500_v27, %v4634_v18  ;;  %v1608_v22 = vadd.f32 1e-16, %v1590_v16 }
 0x731   :  { %3511 = vrcp.f32 %v1609_v44  ;;  %v1627_v52 = vmul.f32 %v3502_v51, %v4637_v41  ;;  %v1845_v44 = vld [vmem:[%s5057_s8 + $0x50] sm:$0xff] }
 0x732   :  { %3513 = vrcp.f32 %v1608_v22 }
 0x733   :  { %v3504_v23 = vpop.eup %3503  ;;  %3239 = vmatprep.mubr.msk.f32.mxu0 %vm187_vm1, %v1627_v52 }
 0x734   :  { %v3506_v9 = vpop.eup %3505  ;;  %3240 = vmatmul.mubr.msk.f32.gmra.mrb[16].mxu0 %vm187_vm1, %v1629_v53  ;;  %v1633_v15 = vmul.f32 %v3504_v23, %v4644_v30  ;;  %v1848_v23 = vld [vmem:[%s5057_s8 + $0x68] sm:$0xff] }
 0x735   :  { %v1631_v39 = vmul.f32 %v3506_v9, %v4647_v1 }
 0x737   :  { %v3508_v63 = vpop.eup %3507  ;;  %3242 = vmatprep.mubr.msk.f32.mxu0 %vm187_vm1, %v1631_v39 }
 0x738   :  { %v3510_v26 = vpop.eup %3509  ;;  %3243 = vmatmul.mubr.msk.f32.gmra.mrb[18].mxu0 %vm187_vm1, %v1633_v15  ;;  %v1637_v18 = vmul.f32 %v3508_v63, %v4654_v17  ;;  %v1894_v17 = vld [vmem:[%s5056_s10] sm:$0xff] }
 0x739   :  { %v1635_v41 = vmul.f32 %v3510_v26, %v4657_v19  ;;  %v1895_v19 = vld [vmem:[%s5056_s10 + $0x8] sm:$0xff]  ;;  %v1847_v15 = vld [vmem:[%s5057_s8 + $0x60] sm:$0xff] }
 0x73a   :  { %v3349_v25 = vpack.c.bf16 %v1895_v19, %v1894_v17  ;;  %v1849_v17 = vld [vmem:[%s5057_s8 + $0x70] sm:$0xff] }
 0x73b   :  { %v3512_v35 = vpop.eup %3511  ;;  %3245 = vmatprep.mubr.msk.f32.mxu0 %vm187_vm1, %v1635_v41  ;;  %v3024_v41 = vld [vmem:[%s5058_s9] ss:$0 sm:$0xff] }
 0x73c   :  { %3246 = vmatmul.mubr.msk.f32.gmra.mrb[20].mxu0 %vm187_vm1, %v1637_v18  ;;  %v3514_v55 = vpop.eup %3513  ;;  %v1641_v30 = vmul.f32 %v3512_v35, %v4664_v60  ;;  %3350 = vmatprep.subr.bf16.mxu0 %v3349_v25  ;;  %v1896_v60 = vld [vmem:[%s5056_s10 + $0x10] sm:$0xff] }
 0x73d   :  { %v1639_v1 = vmul.f32 %v3514_v55, %v4669_v3  ;;  %3352 = vmatpush3.bf16.msra.mxu0 %v3349_v25  ;;  %v1897_v3 = vld [vmem:[%s5056_s10 + $0x18] sm:$0xff] }
 0x73e   :  { %v3353_v50 = vpack.c.bf16 %v1897_v3, %v1896_v60 }
 0x73f   :  { %3248 = vmatprep.mubr.msk.f32.mxu0 %vm187_vm1, %v1639_v1 }
 0x740   :  { %3249 = vmatmul.mubr.msk.f32.gmra.mrb[22].mxu0 %vm187_vm1, %v1641_v30  ;;  %3354 = vmatprep.subr.bf16.mxu0 %v3353_v50  ;;  %v1850_v30 = vld [vmem:[%s5057_s8 + $0x78] sm:$0xff] }
 0x741   :  { %3356 = vmatpush3.bf16.msra.mxu0 %v3353_v50 }
 0x7f3   :  { %v3229_v2 = vpop.f32.mrb[8].mxu0 }
 0x7f4   :  { %v1756_v45 = vpop.f32.mrb[9].mxu0  ;;  %v1852_v58 = vmul.f32 %v3229_v2, %v1836_v61 }
 0x7f5   :  { %v1851_v7 = vmul.f32 %v1835_v5, %v1756_v45 }
 0x7f7   :  { %v3232_v10 = vpop.f32.mrb[10].mxu0 }
 0x7f8   :  { %v1766_v32 = vpop.f32.mrb[11].mxu0  ;;  %v1854_v54 = vmul.f32 %v3232_v10, %v1838_v57 }
 0x7f9   :  { %v1853_v29 = vmul.f32 %v1837_v43, %v1766_v32 }
 0x7fb   :  { %v3235_v21 = vpop.f32.mrb[12].mxu0 }
 0x7fc   :  { %v1856_v40 = vmul.f32 %v3235_v21, %v1840_v11  ;;  %v1776_v62 = vpop.f32.mrb[13].mxu0 }
 0x7fd   :  { %v1855_v49 = vmul.f32 %v1839_v31, %v1776_v62 }
 0x7fe   :  { %v1868_v59 = vadd.f32 %v1856_v40, %v1852_v58  ;;  %v3025_v58 = vld [vmem:[%s5059_s11] ss:$0 sm:$0xff] }
 0x7ff   :  { %v1867_v38 = vadd.f32 %v1855_v49, %v1851_v7  ;;  %v3238_v36 = vpop.f32.mrb[14].mxu0 }
 0x800   :  { %v1858_v0 = vmul.f32 %v3238_v36, %v1842_v6  ;;  %v1786_v28 = vpop.f32.mrb[15].mxu0 }
 0x801   :  { %v1857_v56 = vmul.f32 %v1841_v48, %v1786_v28 }
 0x802   :  { %v1870_v12 = vadd.f32 %v1858_v0, %v1854_v54 }
 0x803   :  { %v1869_v42 = vadd.f32 %v1857_v56, %v1853_v29 }
 0x807   :  { %v3241_v13 = vpop.f32.mrb[16].mxu0 }
 0x808   :  { %v1860_v33 = vmul.f32 %v3241_v13, %v1844_v14  ;;  %v1796_v37 = vpop.f32.mrb[17].mxu0  ;;  %v5160_v14 = vld [vmem:[#allocation2_spill] sm:$0xff] }
 0x809   :  { %v1859_v20 = vmul.f32 %v1843_v8, %v1796_v37  ;;  %vm5161_vm2 = vcmp.gt.f32.partialorder %v5160_v14, 0.0 }
 0x80a   :  { %v1872_v27 = vadd.f32 %v1868_v59, %v1860_v33  ;;  %v5162_v33 = vld [vmem:[#allocation3_spill] sm:$0xff] }
 0x80b   :  { %v1871_v51 = vadd.f32 %v1867_v38, %v1859_v20  ;;  %v3244_v16 = vpop.f32.mrb[18].mxu0  ;;  %vm5163_vm3 = vcmp.gt.f32.partialorder %v5162_v33, 0.0  ;;  %v5164_v20 = vld [vmem:[#allocation5_spill] sm:$0xff] }
 0x80c   :  { %v1862_v53 = vmul.f32 %v3244_v16, %v1846_v34  ;;  %v1806_v22 = vpop.f32.mrb[19].mxu0  ;;  %vm5165_vm5 = vcmp.gt.f32.partialorder %v5164_v20, 0.0 }
 0x80d   :  { %v1861_v52 = vmul.f32 %v1845_v44, %v1806_v22 }
 0x80e   :  { %v1874_v9 = vadd.f32 %v1870_v12, %v1862_v53 }
 0x80f   :  { %v1873_v39 = vadd.f32 %v1869_v42, %v1861_v52  ;;  %v3247_v63 = vpop.f32.mrb[20].mxu0 }
 0x810   :  { %v1864_v26 = vmul.f32 %v3247_v63, %v1848_v23  ;;  %v1816_v18 = vpop.f32.mrb[21].mxu0  ;;  %v5172_v23 = vld [vmem:[#allocation4_spill] sm:$0xff] }
 0x811   :  { %v1863_v35 = vmul.f32 %v1847_v15, %v1816_v18 }
 0x812   :  { %v1876_v55 = vadd.f32 %v1872_v27, %v1864_v26  ;;  %v5166_v27 = vld [vmem:[#allocation6_spill] sm:$0xff] }
 0x813   :  { %v1875_v1 = vadd.f32 %v1871_v51, %v1863_v35  ;;  %v3250_v25 = vpop.f32.mrb[22].mxu0  ;;  %v5168_v51 = vld [vmem:[#allocation11_spill] sm:$0xff] }
 0x814   :  { %v1887_v19 = vadd.f32 %v3024_v41, %v1876_v55  ;;  %v1866_v3 = vmul.f32 %v3250_v25, %v1850_v30  ;;  %v1826_v50 = vpop.f32.mrb[23].mxu0  ;;  %v5181_v30 = vld [vmem:[#allocation7_spill] sm:$0xff] }
 0x815   :  { %v1886_v60 = vadd.f32 %v3024_v41, %v1875_v1  ;;  %v1865_v2 = vmul.f32 %v1849_v17, %v1826_v50  ;;  %v5183_v17 = vld [vmem:[#allocation10_spill] sm:$0xff]  ;;  %v5187_v50 = vld [vmem:[#allocation8_spill] sm:$0xff] }
 0x816   :  { %v1878_v10 = vadd.f32 %v1874_v9, %v1866_v3  ;;  %v1891_v32 = vmax.f32 %v1887_v19, 0.0 }
 0x817   :  { %v1890_v45 = vmax.f32 %v1886_v60, 0.0  ;;  %v1877_v61 = vadd.f32 %v1873_v39, %v1865_v2  ;;  %v5185_v60 = vld [vmem:[#allocation12_spill] sm:$0xff] }
 0x818   :  { %v1889_v11 = vadd.f32 %v3024_v41, %v1878_v10 }
 0x819   :  { %3259 = vmatprep.mubr.msk.f32.mxu0 %vm187_vm1, %v1890_v45  ;;  %v1888_v5 = vadd.f32 %v3024_v41, %v1877_v61  ;;  %v5189_v45 = vld [vmem:[#allocation9_spill] sm:$0xff] }
 0x81a   :  { %3260 = vmatmul.mubr.msk.f32.vlgmr.msra.gmra.mrb[24].mxu0 %vm187_vm1, %v1891_v32  ;;  %v1893_v21 = vmax.f32 %v1889_v11, 0.0  ;;  %v5191_v32 = vld [vmem:[#allocation13_spill] sm:$0xff] }
 0x81b   :  { %v1892_v31 = vmax.f32 %v1888_v5, 0.0 }
 0x81d   :  { %3262 = vmatprep.mubr.msk.f32.mxu0 %vm187_vm1, %v1892_v31 }
 0x81e   :  { %3263 = vmatmul.mubr.msk.f32.gmra.mrb[26].mxu0 %vm187_vm1, %v1893_v21 }
 0x8ed   :  { %v3261_v40 = vpop.f32.mrb[24].mxu0 }
 0x8ee   :  { %v4775_v62 = vadd.f32 %v3261_v40, %v3025_v58  ;;  %v1983_v7 = vpop.f32.mrb[25].mxu0 }
 0x8ef   :  { %v4777_v57 = vadd.f32 %v3025_v58, %v1983_v7 }
 0x8f0   :  { %v2005_v49 = vsel %vm5152_vm8, %v4775_v62, inf  ;;  %v2017_v38 = vsel %vm5154_vm13, %v4775_v62, -inf  ;;  %vm5167_vm8 = vcmp.gt.f32.partialorder %v5166_v27, 0.0  ;;  %vm5170_vm13 = vmmov %vm5161_vm2 }
 0x8f1   :  { %2006 = vmin.xlane.f32.xlu1 %v2005_v49  ;;  %v2002_v6 = vsel %vm5153_vm11, %v4777_v57, inf  ;;  %v3264_v43 = vpop.f32.mrb[26].mxu0  ;;  %v2014_v54 = vsel %vm5155_vm10, %v4777_v57, -inf  ;;  %vm5169_vm11 = vcmp.gt.f32.partialorder %v5168_v51, 0.0  ;;  %vm5171_vm10 = vmmov %vm5165_vm5 }
 0x8f2   :  { %2003 = vmin.xlane.f32.xlu0 %v2002_v6  ;;  %v1993_v59 = vpop.f32.mrb[27].mxu0  ;;  %v4783_v48 = vadd.f32 %v3264_v43, %v3025_v58 }
 0x8f3   :  { %v4787_v36 = vadd.f32 %v3025_v58, %v1993_v59 }
 0x8f4   :  { %v2011_v0 = vsel %vm5156_vm9, %v4783_v48, inf  ;;  %v2023_v29 = vsel %vm5158_vm14, %v4783_v48, -inf  ;;  %vm5173_vm9 = vcmp.gt.f32.partialorder %v5172_v23, 0.0 }
 0x8f5   :  { %2018 = vmax.xlane.f32.xlu1 %v2017_v38  ;;  %v2008_v28 = vsel %vm5157_vm4, %v4787_v36, inf  ;;  %v2020_v56 = vsel %vm5159_vm0, %v4787_v36, -inf  ;;  %vm5174_vm4 = vcmask 7168  }
 0x8f6   :  { %2015 = vmax.xlane.f32.xlu0 %v2014_v54  ;;  %vm5175_vm14 = vmmov %vm5174_vm4 }
 0x8f7   :  { %vm5176_vm0 = vmmov %vm5174_vm4 }
 0x8f9   :  { %2012 = vmin.xlane.f32.xlu1 %v2011_v0 }
 0x8fa   :  { %2009 = vmin.xlane.f32.xlu0 %v2008_v28 }
 0x8fd   :  { %2024 = vmax.xlane.f32.xlu1 %v2023_v29 }
 0x8fe   :  { %2021 = vmax.xlane.f32.xlu0 %v2020_v56 }
 0x97e   :  { %v2007_v12 = vpop.xlane.xlu1 %2006 }
 0x97f   :  { %v2004_v42 = vpop.xlane.xlu0 %2003  ;;  %v2027_v8 = vsel %vm5161_vm2, %v2007_v12, inf  ;;  %v2092_v37 = vsel %vm5163_vm3, %v2007_v12, inf  ;;  %v2157_v9 = vsel %vm5173_vm9, %v2007_v12, inf  ;;  %vm5177_vm2 = vmmov %vm5176_vm0  ;;  %vm5188_vm9 = vcmp.gt.f32.partialorder %v5187_v50, 0.0 }
 0x980   :  { %v2026_v34 = vsel %vm5165_vm5, %v2004_v42, inf  ;;  %v2091_v44 = vsel %vm5167_vm8, %v2004_v42, inf  ;;  %v2156_v16 = vsel %vm5169_vm11, %v2004_v42, inf  ;;  %v2031_v15 = vsel %vm5174_vm4, %v2027_v8, inf  ;;  %vm5178_vm3 = vmmov %vm5176_vm0 }
 0x981   :  { %v2030_v63 = vsel %vm5175_vm14, %v2026_v34, inf  ;;  %v2095_v26 = vsel %vm5176_vm0, %v2091_v44, inf  ;;  %v2096_v18 = vsel %vm5177_vm2, %v2092_v37, inf  ;;  %v2160_v41 = vsel %vm5178_vm3, %v2156_v16, inf  ;;  %vm5179_vm5 = vmmov %vm5176_vm0 }
 0x982   :  { %v2019_v13 = vpop.xlane.xlu1 %2018  ;;  %vm5180_vm8 = vmmov %vm5176_vm0  ;;  %vm5182_vm11 = vcmp.gt.f32.partialorder %v5181_v30, 0.0  ;;  %vm5190_vm4 = vcmp.gt.f32.partialorder %v5189_v45, 0.0  ;;  %vm5192_vm14 = vcmp.gt.f32.partialorder %v5191_v32, 0.0  ;;  %v2034_v49 = vmin.f32 %v2030_v63, %v2031_v15 }
 0x983   :  { %v2016_v53 = vpop.xlane.xlu0 %2015  ;;  %v2047_v22 = vsel %vm5170_vm13, %v2019_v13, -inf  ;;  %vm5184_vm13 = vcmp.gt.f32.partialorder %v5183_v17, 0.0  ;;  %vm5193_vm2 = vmmov %vm5176_vm0  ;;  %v2099_v63 = vmin.f32 %v2095_v26, %v2096_v18 }
 0x984   :  { %v2046_v52 = vsel %vm5171_vm10, %v2016_v53, -inf  ;;  %v2051_v35 = vsel %vm5179_vm5, %v2047_v22, -inf  ;;  %vm5186_vm10 = vcmp.gt.f32.partialorder %v5185_v60, 0.0  ;;  %vm5194_vm3 = vmmov %vm5176_vm0 }
 0x985   :  { %v2050_v55 = vsel %vm5180_vm8, %v2046_v52, -inf  ;;  %vm5195_vm5 = vmmov %vm5176_vm0  ;;  %vm5196_vm8 = vcmp.gt.f32.partialorder %v5162_v33, 0.0 }
 0x986   :  { %v2013_v39 = vpop.xlane.xlu1 %2012  ;;  %v2112_v58 = vsel %vm5196_vm8, %v2019_v13, -inf  ;;  %v2054_v43 = vmax.f32 %v2050_v55, %v2051_v35  ;;  %vm5206_vm8 = vcmp.gt.f32.partialorder %v5185_v60, 0.0 }
 0x987   :  { %v2029_v1 = vsel %vm5182_vm11, %v2013_v39, inf  ;;  %v2094_v19 = vsel %vm5184_vm13, %v2013_v39, inf  ;;  %v2010_v25 = vpop.xlane.xlu0 %2009  ;;  %v2159_v3 = vsel %vm5186_vm10, %v2013_v39, inf  ;;  %vm5197_vm11 = vcmp.gt.f32.partialorder %v5166_v27, 0.0 }
 0x988   :  { %v2028_v2 = vsel %vm5188_vm9, %v2010_v25, inf  ;;  %v2093_v10 = vsel %vm5190_vm4, %v2010_v25, inf  ;;  %v2158_v61 = vsel %vm5192_vm14, %v2010_v25, inf  ;;  %v2033_v5 = vsel %vm5193_vm2, %v2029_v1, inf  ;;  %vm5200_vm9 = vmmov %vm5176_vm0 }
 0x989   :  { %v2032_v11 = vsel %vm5176_vm0, %v2028_v2, inf  ;;  %v2097_v31 = vsel %vm5194_vm3, %v2093_v10, inf  ;;  %v2098_v21 = vsel %vm5195_vm5, %v2094_v19, inf  ;;  %v2111_v40 = vsel %vm5197_vm11, %v2016_v53, -inf  ;;  %vm5202_vm14 = vmmov %vm5176_vm0 }
 0x98a   :  { %v2025_v7 = vpop.xlane.xlu1 %2024  ;;  %v2035_v6 = vmin.f32 %v2032_v11, %v2033_v5  ;;  %vm5198_vm13 = vcmp.gt.f32.partialorder %v5181_v30, 0.0  ;;  %vm5199_vm10 = vcmp.gt.f32.partialorder %v5183_v17, 0.0  ;;  %v2100_v0 = vmin.f32 %v2097_v31, %v2098_v21  ;;  %vm5203_vm2 = vmmov %vm5176_vm0 }
 0x98b   :  { %v2049_v59 = vsel %vm5198_vm13, %v2025_v7, -inf  ;;  %v2114_v38 = vsel %vm5199_vm10, %v2025_v7, -inf  ;;  %v2022_v54 = vpop.xlane.xlu0 %2021  ;;  %vm5201_vm4 = vcmp.gt.f32.partialorder %v5187_v50, 0.0  ;;  %v2162_v56 = vsel %vm5202_vm14, %v2158_v61, inf  ;;  %vm5204_vm3 = vmmov %vm5176_vm0 }
 0x98c   :  { %v2053_v28 = vsel %vm5200_vm9, %v2049_v59, -inf  ;;  %v2048_v29 = vsel %vm5201_vm4, %v2022_v54, -inf  ;;  %v2163_v12 = vsel %vm5176_vm0, %v2159_v3, inf  ;;  %v2118_v42 = vsel %vm5203_vm2, %v2114_v38, -inf  ;;  %vm5207_vm11 = vmmov %vm5176_vm0 }
 0x98d   :  { %v2052_v8 = vsel %vm5204_vm3, %v2048_v29, -inf  ;;  %vm5205_vm5 = vcmp.gt.f32.partialorder %v5189_v45, 0.0  ;;  %v2036_v34 = vmin.f32 %v2034_v49, %v2035_v6  ;;  %v2179_v44 = vsel %vm5206_vm8, %v2025_v7, -inf  ;;  %vm5209_vm10 = vmmov %vm5176_vm0 }
 0x98e   :  { %v2113_v37 = vsel %vm5205_vm5, %v2022_v54, -inf  ;;  %v2055_v16 = vmax.f32 %v2052_v8, %v2053_v28  ;;  %vm5208_vm13 = vcmp.gt.f32.partialorder %v5191_v32, 0.0  ;;  %v2116_v15 = vsel %vm5209_vm10, %v2112_v58, -inf  ;;  %vm5210_vm9 = vmmov %vm5176_vm0 }
 0x98f   :  { %v2117_v22 = vsel %vm5207_vm11, %v2113_v37, -inf  ;;  %v2178_v52 = vsel %vm5208_vm13, %v2022_v54, -inf  ;;  %v2115_v39 = vsel %vm5210_vm9, %v2111_v40, -inf  ;;  %2037 = vmin.xlane.f32.xlu0 %v2036_v34  ;;  %vm5211_vm4 = vmmov %vm5176_vm0  ;;  %vm5212_vm14 = vcmp.gt.f32.partialorder %v5172_v23, 0.0 }
 0x990   :  { %v2161_v35 = vsel %vm5211_vm4, %v2157_v9, inf  ;;  %v2177_v55 = vsel %vm5212_vm14, %v2019_v13, -inf  ;;  %vm5213_vm0 = vcmp.gt.f32.partialorder %v5168_v51, 0.0  ;;  %v2120_v19 = vmax.f32 %v2117_v22, %v2118_v42  ;;  %vm5214_vm3 = vmmov %vm5203_vm2 }
 0x991   :  { %v2176_v1 = vsel %vm5213_vm0, %v2016_v53, -inf  ;;  %v2056_v25 = vmax.f32 %v2054_v43, %v2055_v16  ;;  %v2183_v3 = vsel %vm5203_vm2, %v2179_v44, -inf  ;;  %v2182_v2 = vsel %vm5214_vm3, %v2178_v52, -inf  ;;  %vm5215_vm5 = vmmov %vm5203_vm2 }
 0x992   :  { %v2101_v10 = vmin.f32 %v2099_v63, %v2100_v0  ;;  %v2165_v61 = vmin.f32 %v2162_v56, %v2163_v12  ;;  %v2119_v11 = vmax.f32 %v2115_v39, %v2116_v15  ;;  %v2181_v26 = vsel %vm5215_vm5, %v2177_v55, -inf  ;;  %vm5216_vm8 = vmmov %vm5203_vm2 }
 0x993   :  { %2057 = vmax.xlane.f32.xlu1 %v2056_v25  ;;  %v2180_v9 = vsel %vm5216_vm8, %v2176_v1, -inf  ;;  %v2164_v18 = vmin.f32 %v2160_v41, %v2161_v35  ;;  %v2185_v13 = vmax.f32 %v2182_v2, %v2183_v3  ;;  %vm2338_vm4 = vcmask 1043456  }
 0x994   :  { %2102 = vmin.xlane.f32.xlu0 %v2101_v10  ;;  %v2121_v5 = vmax.f32 %v2119_v11, %v2120_v19  ;;  %v2184_v53 = vmax.f32 %v2180_v9, %v2181_v26  ;;  %vm5225_vm2 = vcmask 31744  }
 0x995   :  { %v2166_v31 = vmin.f32 %v2164_v18, %v2165_v61  ;;  %vm5226_vm3 = vmmov %vm5225_vm2 }
 0x996   :  { %v2186_v21 = vmax.f32 %v2184_v53, %v2185_v13  ;;  %vm5227_vm5 = vmmov %vm5225_vm2 }
 0x997   :  { %2122 = vmax.xlane.f32.xlu1 %v2121_v5  ;;  %vm5228_vm8 = vmmov %vm5225_vm2 }
 0x998   :  { %2167 = vmin.xlane.f32.xlu0 %v2166_v31 }
 0x99b   :  { %2187 = vmax.xlane.f32.xlu1 %v2186_v21 }
 0xa1c   :  { %v2038_v58 = vpop.xlane.xlu0 %2037 }
 0xa1d   :  { %v2039_v40 = vrot.slane %v2038_v58, 4 }
 0xa1f   :  { %v2040_v7 = vmin.f32 %v2038_v58, %v2039_v40 }
 0xa20   :  { %v2058_v49 = vpop.xlane.xlu1 %2057 }
 0xa21   :  { %v2059_v6 = vrot.slane %v2058_v49, 4  ;;  %v2103_v43 = vpop.xlane.xlu0 %2102  ;;  %v2041_v59 = vrot.slane %v2040_v7, 2 }
 0xa22   :  { %v2104_v38 = vrot.slane %v2103_v43, 4 }
 0xa23   :  { %v2060_v54 = vmax.f32 %v2058_v49, %v2059_v6  ;;  %v2042_v41 = vmin.f32 %v2040_v7, %v2041_v59 }
 0xa24   :  { %v2105_v0 = vmin.f32 %v2103_v43, %v2104_v38  ;;  %v2123_v28 = vpop.xlane.xlu1 %2122 }
 0xa25   :  { %v2061_v29 = vrot.slane %v2060_v54, 2  ;;  %v2124_v56 = vrot.slane %v2123_v28, 4  ;;  %v2168_v12 = vpop.xlane.xlu0 %2167  ;;  %v2043_v37 = vrot.slane %v2042_v41, 1 }
 0xa26   :  { %v2106_v42 = vrot.slane %v2105_v0, 2  ;;  %v2169_v8 = vrot.slane %v2168_v12, 4 }
 0xa27   :  { %v2125_v34 = vmax.f32 %v2123_v28, %v2124_v56  ;;  %v2062_v44 = vmax.f32 %v2060_v54, %v2061_v29  ;;  %v2044_v52 = vmin.f32 %v2042_v41, %v2043_v37 }
 0xa28   :  { %v2170_v16 = vmin.f32 %v2168_v12, %v2169_v8  ;;  %v2188_v22 = vpop.xlane.xlu1 %2187  ;;  %v2107_v15 = vmin.f32 %v2105_v0, %v2106_v42 }
 0xa29   :  { %v2126_v39 = vrot.slane %v2125_v34, 2  ;;  %v2189_v63 = vrot.slane %v2188_v22, 4  ;;  %v2063_v35 = vrot.slane %v2062_v44, 1  ;;  %3413 = vpush %v2044_v52 }
 0xa2a   :  { %v2171_v55 = vrot.slane %v2170_v16, 2  ;;  %v2108_v1 = vrot.slane %v2107_v15, 1 }
 0xa2b   :  { %v2190_v19 = vmax.f32 %v2188_v22, %v2189_v63  ;;  %v2064_v25 = vmax.f32 %v2062_v44, %v2063_v35  ;;  %v2127_v3 = vmax.f32 %v2125_v34, %v2126_v39 }
 0xa2c   :  { %v2109_v2 = vmin.f32 %v2107_v15, %v2108_v1  ;;  %v2172_v10 = vmin.f32 %v2170_v16, %v2171_v55 }
 0xa2d   :  { %v2191_v61 = vrot.slane %v2190_v19, 2  ;;  %3415 = vpush %v2064_v25  ;;  %v2128_v11 = vrot.slane %v2127_v3, 1 }
 0xa2e   :  { %3417 = vpush %v2109_v2  ;;  %v2173_v26 = vrot.slane %v2172_v10, 1 }
 0xa2f   :  { %v2129_v9 = vmax.f32 %v2127_v3, %v2128_v11  ;;  %v2192_v18 = vmax.f32 %v2190_v19, %v2191_v61 }
 0xa30   :  { %v2174_v13 = vmin.f32 %v2172_v10, %v2173_v26 }
 0xa31   :  { %3419 = vpush %v2129_v9  ;;  %v2193_v5 = vrot.slane %v2192_v18, 1 }
 0xa32   :  { %3421 = vpush %v2174_v13 }
 0xa33   :  { %v2194_v31 = vmax.f32 %v2192_v18, %v2193_v5 }
 0xa35   :  { %3423 = vpush %v2194_v31 }
 0xa5a   :  { %s3414_s11 = spop %3413 }
 0xa5e   :  { %s3416_s25 = spop %3415 }
 0xa5f   :  { %s2067_s26 = ssub.f32 %s3416_s25, %s3414_s11  ;;  %p2066_p4 = scmp.ge.f32.partialorder %s3416_s25, %s3414_s11 }
 0xa60   :  { %s3418_s28 = spop %3417 }
 0xa61   :  { %s2070_s27 = smul.f32 0.33333334, %s2067_s26  ;;  %s5271_s11 = smov (!%p2066_p4, %s3414_s11), 0.0 }
 0xa62   :  { %s3420_s29 = spop %3419  ;;  %v2082_v59 = vstv %s5271_s11 }
 0xa63   :  { %s5269_s27 = smov (!%p2066_p4, %s2070_s27), 0.0  ;;  %s2132_s1 = ssub.f32 %s3420_s29, %s3418_s28  ;;  %v2083_v15 = vmul.f32 %v5164_v20, %v2082_v59  ;;  %v2084_v3 = vmul.f32 %v5160_v14, %v2082_v59  ;;  %v2085_v11 = vmul.f32 %v5187_v50, %v2082_v59  ;;  %v2086_v26 = vmul.f32 %v5181_v30, %v2082_v59 }
 0xa64   :  { %p2131_p5 = scmp.ge.f32.partialorder %s3420_s29, %s3418_s28  ;;  %s3422_s3 = spop %3421  ;;  %v2073_v53 = vstv %s5269_s27 }
 0xa65   :  { %s2135_s7 = smul.f32 0.06666667, %s2132_s1  ;;  %v2074_v49 = vmul.f32 %v5164_v20, %v2073_v53  ;;  %v2075_v6 = vmul.f32 %v5160_v14, %v2073_v53  ;;  %v2076_v43 = vmul.f32 %v5187_v50, %v2073_v53  ;;  %v2077_v8 = vmul.f32 %v5181_v30, %v2073_v53  ;;  %v2427_v30 = vld [vmem:[%s5060_s13] sm:$0xf] }
 0xa66   :  { %s3424_s30 = spop %3423  ;;  %s5275_s28 = smov (!%p2131_p5, %s3418_s28), 0.0  ;;  %3273 = vmatprep.subr.msk.mxu0 %vm2338_vm4, %v2427_v30 }
 0xa67   :  { %s5273_s7 = smov (!%p2131_p5, %s2135_s7), 0.0  ;;  %p2196_p6 = scmp.ge.f32.partialorder %s3424_s30, %s3422_s3  ;;  %v2147_v38 = vstv %s5275_s28  ;;  %3274 = vmatpush3.msk.msra.mxu0 %vm2338_vm4, %v2427_v30 }
 0xa68   :  { %s2197_s18 = ssub.f32 %s3424_s30, %s3422_s3  ;;  %v2138_v21 = vstv %s5273_s7  ;;  %v2148_v34 = vmul.f32 %v5166_v27, %v2147_v38  ;;  %v2150_v10 = vmul.f32 %v5189_v45, %v2147_v38 }
 0xa69   :  { %v2139_v58 = vmul.f32 %v5166_v27, %v2138_v21  ;;  %v2140_v40 = vmul.f32 %v5162_v33, %v2138_v21  ;;  %v2141_v7 = vmul.f32 %v5189_v45, %v2138_v21  ;;  %s5277_s3 = smov (!%p2196_p6, %s3422_s3), 0.0  ;;  %v2142_v54 = vmul.f32 %v5183_v17, %v2138_v21 }
 0xa6a   :  { %s2200_s19 = smul.f32 0.003921569, %s2197_s18  ;;  %v2212_v37 = vstv %s5277_s3  ;;  %v2152_v1 = vadd.f32 %v2148_v34, %v2083_v15  ;;  %v2149_v27 = vmul.f32 %v5162_v33, %v2147_v38  ;;  %v5217_v34 = vld [vmem:[#allocation15_spill] sm:$0xff] }
 0xa6b   :  { %v2144_v28 = vadd.f32 %v2140_v40, %v2075_v6  ;;  %v2143_v41 = vadd.f32 %v2139_v58, %v2074_v49  ;;  %v2145_v42 = vadd.f32 %v2141_v7, %v2076_v43  ;;  %v2213_v39 = vmul.f32 %v5168_v51, %v2212_v37 }
 0xa6c   :  { %s5279_s19 = smov (!%p2196_p6, %s2200_s19), 0.0  ;;  %v2146_v63 = vadd.f32 %v2142_v54, %v2077_v8  ;;  %v2214_v2 = vmul.f32 %v5172_v23, %v2212_v37  ;;  %v2153_v61 = vadd.f32 %v2149_v27, %v2084_v3  ;;  %v2215_v33 = vmul.f32 %v5191_v32, %v2212_v37  ;;  %v5219_v27 = vld [vmem:[#allocation19_spill] sm:$0xff] }
 0xa6d   :  { %v2203_v0 = vstv %s5279_s19  ;;  %v2217_v25 = vadd.f32 %v2213_v39, %v2152_v1  ;;  %v2216_v9 = vmul.f32 %v5185_v60, %v2212_v37 }
 0xa6e   :  { %v2205_v29 = vmul.f32 %v5172_v23, %v2203_v0  ;;  %v2206_v56 = vmul.f32 %v5191_v32, %v2203_v0  ;;  %v2204_v12 = vmul.f32 %v5168_v51, %v2203_v0  ;;  %v2207_v44 = vmul.f32 %v5185_v60, %v2203_v0  ;;  %v2325_v60 = vld [vmem:[%s5061_s12] sm:$0xf] }
 0xa6f   :  { %v2151_v51 = vmul.f32 %v5183_v17, %v2147_v38  ;;  %v2218_v14 = vadd.f32 %v2214_v2, %v2153_v61  ;;  %v2154_v23 = vadd.f32 %v2150_v10, %v2085_v11  ;;  %3265 = vmatprep.subr.msk.mxu1 %vm2338_vm4, %v2325_v60  ;;  %v5222_v11 = vld [vmem:[#allocation18_spill] sm:$0xff] }
 0xa70   :  { %v2209_v16 = vadd.f32 %v2205_v29, %v2144_v28  ;;  %v2208_v22 = vadd.f32 %v2204_v12, %v2143_v41  ;;  %v2210_v52 = vadd.f32 %v2206_v56, %v2145_v42  ;;  %v2211_v19 = vadd.f32 %v2207_v44, %v2146_v63  ;;  %3266 = vmatpush3.msk.msra.mxu1 %vm2338_vm4, %v2325_v60  ;;  %vm5235_vm4 = vmmov %vm5225_vm2 }
 0xa71   :  { %v2155_v45 = vadd.f32 %v2151_v51, %v2086_v26  ;;  %v2219_v13 = vadd.f32 %v2215_v33, %v2154_v23  ;;  %vm5223_vm0 = vcmp.eq.s32.totalorder %v5222_v11, 1 }
 0xa72   :  { %vm2222_vm11 = vcmp.gt.f32.partialorder %v2209_v16, 0.0  ;;  %vm2221_vm13 = vcmp.gt.f32.partialorder %v2208_v22, 0.0  ;;  %vm2223_vm10 = vcmp.gt.f32.partialorder %v2210_v52, 0.0  ;;  %vm2224_vm9 = vcmp.gt.f32.partialorder %v2211_v19, 0.0 }
 0xa73   :  { %v2226_v35 = vsel %vm2222_vm11, %v2209_v16, 1.0  ;;  %v2225_v55 = vsel %vm2221_vm13, %v2208_v22, 1.0  ;;  %v2227_v20 = vsel %vm2223_vm10, %v2210_v52, 1.0  ;;  %v2228_v18 = vsel %vm2224_vm9, %v2211_v19, 1.0  ;;  %vm5231_vm13 = vmmov %vm5225_vm2 }
 0xa74   :  { %2260 = vperm.xlu1 %3440, %v2226_v35   ;;  %2255 = vperm.xlu0 %3439, %v2225_v55   ;;  %v2220_v17 = vadd.f32 %v2216_v9, %v2155_v45  ;;  %v5224_v9 = vld [vmem:[#allocation17_spill] sm:$0xff]  ;;  %vm5232_vm10 = vmmov %vm5225_vm2 }
 0xa75   :  { %v5229_v45 = vld [vmem:[#allocation21_spill] sm:$0xff] }
 0xa76   :  { %vm5230_vm11 = vcmp.eq.s32.totalorder %v5229_v45, 1 }
 0xa78   :  { %2265 = vperm.xlu1 %3440, %v2227_v20   ;;  %2231 = vperm.xlu0 %3439, %v2217_v25   ;;  %v5220_v20 = vld [vmem:[#allocation16_spill] sm:$0xff] }
 0xa79   :  { %vm5221_vm14 = vcmp.eq.s32.totalorder %v5220_v20, 1 }
 0xa7c   :  { %2270 = vperm.xlu1 %3440, %v2228_v18   ;;  %2236 = vperm.xlu0 %3439, %v2218_v14  }
 0xa80   :  { %2241 = vperm.xlu1 %3440, %v2219_v13   ;;  %2246 = vperm.xlu0 %3439, %v2220_v17   ;;  %v5233_v17 = vld [vmem:[#allocation20_spill] sm:$0xff] }
 0xa81   :  { %vm5234_vm9 = vcmp.eq.s32.totalorder %v5233_v17, 1 }
 0xa84   :  { %2295 = vperm.xlu1 %3440, %v2208_v22   ;;  %2300 = vperm.xlu0 %3439, %v2209_v16   ;;  %v5218_v22 = vld [vmem:[#allocation14_spill] sm:$0xff] }
 0xa88   :  { %2305 = vperm.xlu1 %3440, %v2210_v52   ;;  %2310 = vperm.xlu0 %3439, %v2211_v19  }
 0xaf3   :  { %v2261_v50 = vpop.permute.xlu1 %2260  ;;  %v2256_v32 = vpop.permute.xlu0 %2255 }
 0xaf4   :  { %3515 = vrcp.f32 %v2261_v50  ;;  %v2517_v50 = vld [vmem:[%s5062_s14 + $0x8] sm:$0xff] }
 0xaf5   :  { %3517 = vrcp.f32 %v2256_v32 }
 0xaf7   :  { %v2266_v5 = vpop.permute.xlu1 %2265  ;;  %v2232_v31 = vpop.permute.xlu0 %2231 }
 0xaf8   :  { %3519 = vrcp.f32 %v2266_v5  ;;  %v2249_v7 = vsub.f32 %v4777_v57, %v2232_v31 }
 0xafb   :  { %v2271_v53 = vpop.permute.xlu1 %2270  ;;  %v2237_v21 = vpop.permute.xlu0 %2236 }
 0xafc   :  { %3521 = vrcp.f32 %v2271_v53  ;;  %v2250_v58 = vsub.f32 %v4775_v62, %v2237_v21 }
 0xafe   :  { %v3516_v40 = vpop.eup %3515 }
 0xaff   :  { %v3518_v49 = vpop.eup %3517  ;;  %v2276_v6 = vmul.f32 %v3516_v40, %v2250_v58  ;;  %v2242_v43 = vpop.permute.xlu1 %2241 }
 0xb00   :  { %v2274_v59 = vmul.f32 %v3518_v49, %v2249_v7  ;;  %v2251_v38 = vsub.f32 %v4787_v36, %v2242_v43  ;;  %v2247_v54 = vpop.permute.xlu0 %2246  ;;  %v2519_v7 = vld [vmem:[%s5062_s14 + $0x18] sm:$0xff]  ;;  %v2518_v49 = vld [vmem:[%s5062_s14 + $0x10] sm:$0xff] }
 0xb01   :  { %v3426_v0 = vround.rtne.f32 %v2276_v6  ;;  %v2252_v37 = vsub.f32 %v4783_v48, %v2247_v54 }
 0xb02   :  { %v3520_v28 = vpop.eup %3519  ;;  %v3425_v41 = vround.rtne.f32 %v2274_v59 }
 0xb03   :  { %v2278_v29 = vmul.f32 %v3520_v28, %v2251_v38  ;;  %v2286_v56 = vmax.f32 %v3426_v0, 0.0  ;;  %v2296_v12 = vpop.permute.xlu1 %2295 }
 0xb04   :  { %v2285_v42 = vmax.f32 %v3425_v41, 0.0  ;;  %v2301_v15 = vpop.permute.xlu0 %2300 }
 0xb05   :  { %v3427_v8 = vround.rtne.f32 %v2278_v29  ;;  %v2290_v44 = vmin.f32 %v5217_v34, %v2286_v56 }
 0xb06   :  { %v3522_v16 = vpop.eup %3521  ;;  %v2289_v52 = vmin.f32 %v5218_v22, %v2285_v42 }
 0xb07   :  { %v2280_v39 = vmul.f32 %v3522_v16, %v2252_v37  ;;  %v2314_v63 = vmul.f32 %v2301_v15, %v2290_v44  ;;  %v2287_v35 = vmax.f32 %v3427_v8, 0.0  ;;  %v2306_v2 = vpop.permute.xlu1 %2305 }
 0xb08   :  { %v2313_v55 = vmul.f32 %v2296_v12, %v2289_v52  ;;  %v2311_v23 = vpop.permute.xlu0 %2310 }
 0xb09   :  { %v3428_v1 = vround.rtne.f32 %v2280_v39  ;;  %v2318_v19 = vadd.f32 %v2314_v63, %v2237_v21  ;;  %v2291_v25 = vmin.f32 %v5219_v27, %v2287_v35 }
 0xb0a   :  { %v2317_v3 = vadd.f32 %v2313_v55, %v2232_v31 }
 0xb0b   :  { %v2322_v10 = vsel %vm5221_vm14, %v2318_v19, %v4775_v62  ;;  %v2315_v51 = vmul.f32 %v2306_v2, %v2291_v25  ;;  %v2288_v61 = vmax.f32 %v3428_v1, 0.0  ;;  %vm5236_vm14 = vmmov %vm5225_vm2 }
 0xb0c   :  { %v2321_v26 = vsel %vm5223_vm0, %v2317_v3, %v4777_v57  ;;  %vm5237_vm0 = vcmask 7168  }
 0xb0d   :  { %v2319_v33 = vadd.f32 %v2315_v51, %v2242_v43  ;;  %v2292_v14 = vmin.f32 %v5224_v9, %v2288_v61  ;;  %3267 = vmatprep.mubr.msk.f32.mxu1 %vm5225_vm2, %v2321_v26  ;;  %3275 = vmatprep.mubr.msk.f32.mxu0 %vm5226_vm3, %v2321_v26  ;;  %v3369_v18 = vpack.c.bf16 %v2322_v10, %v2321_v26  ;;  %vm5238_vm2 = vmmov %vm5237_vm0 }
 0xb0e   :  { %3268 = vmatmul.mubr.msk.f32.vlgmr.msra.gmra.mrb[20].mxu1 %vm5227_vm5, %v2322_v10  ;;  %3276 = vmatmul.mubr.msk.f32.vlgmr.msra.gmra.mrb[28].mxu0 %vm5228_vm8, %v2322_v10  ;;  %vm4938_vm3 = vmpackc.low %vm5238_vm2, %vm5238_vm2 }
 0xb0f   :  { %v2316_v62 = vmul.f32 %v2311_v23, %v2292_v14  ;;  %3370 = vmatprep.subr.bf16.mxu0 %v3369_v18  ;;  %v2323_v13 = vsel %vm5230_vm11, %v2319_v33, %v4787_v36  ;;  %v2516_v36 = vld [vmem:[%s5062_s14] sm:$0xff]  ;;  %vm5241_vm5 = vmmov %vm5237_vm0 }
 0xb10   :  { %3372 = vmatpush3.bf16.msra.mxu0 %v3369_v18  ;;  %3270 = vmatprep.mubr.msk.f32.mxu1 %vm5231_vm13, %v2323_v13  ;;  %vm5242_vm8 = vmmov %vm5237_vm0 }
 0xb11   :  { %v2320_v57 = vadd.f32 %v2316_v62, %v2247_v54  ;;  %3278 = vmatprep.mubr.msk.f32.mxu0 %vm5232_vm10, %v2323_v13  ;;  %vm5243_vm11 = vmmov %vm5237_vm0 }
 0xb13   :  { %v2324_v30 = vsel %vm5234_vm9, %v2320_v57, %v4783_v48 }
 0xb14   :  { %3271 = vmatmul.mubr.msk.f32.gmra.mrb[22].mxu1 %vm5235_vm4, %v2324_v30  ;;  %3279 = vmatmul.mubr.msk.f32.gmra.mrb[30].mxu0 %vm5236_vm14, %v2324_v30  ;;  %v3373_v60 = vpack.c.bf16 %v2324_v30, %v2323_v13 }
 0xb15   :  { %3289 = vmatprep.mubr.msk.f32.mxu1 %vm5237_vm0, %v2516_v36 }
 0xb16   :  { %3374 = vmatprep.subr.bf16.mxu0 %v3373_v60 }
 0xb17   :  { %3376 = vmatpush3.bf16.msra.mxu0 %v3373_v60 }
 0xbe1   :  { %v3269_v32 = vpop.f32.mrb[20].mxu1  ;;  %v3277_v5 = vpop.f32.mrb[28].mxu0 }
 0xbe2   :  { %v2521_v48 = vmul.f32 %v3269_v32, %v2517_v50  ;;  %v2408_v31 = vpop.f32.mrb[21].mxu1  ;;  %v2497_v53 = vpop.f32.mrb[29].mxu0 }
 0xbe3   :  { %v2520_v58 = vmul.f32 %v2516_v36, %v2408_v31  ;;  %v3357_v40 = vpack.c.bf16 %v3277_v5, %v2497_v53 }
 0xbe4   :  { %2644 = vperm.xlu0 %3439, %v2521_v48  }
 0xbe5   :  { %3359 = vmatprep.subr.msk.bf16.mxu1 %vm4938_vm3, %v3357_v40  ;;  %2639 = vperm.xlu1 %3440, %v2520_v58  }
 0xbe6   :  { %3362 = vmatpush3.bf16.xpose.msk.msra.mxu1 %vm4938_vm3, %v3357_v40 }
 0xbe7   :  { %v3272_v6 = vpop.f32.mrb[22].mxu1  ;;  %v3280_v43 = vpop.f32.mrb[30].mxu0 }
 0xbe8   :  { %v2523_v59 = vmul.f32 %v3272_v6, %v2519_v7  ;;  %v2418_v38 = vpop.f32.mrb[23].mxu1  ;;  %v2507_v54 = vpop.f32.mrb[31].mxu0 }
 0xbe9   :  { %v2522_v0 = vmul.f32 %v2518_v49, %v2418_v38  ;;  %v3363_v28 = vpack.c.bf16 %v3280_v43, %v2507_v54 }
 0xbea   :  { %2654 = vperm.xlu0 %3439, %v2523_v59  }
 0xbeb   :  { %3365 = vmatprep.subr.msk.bf16.mxu1 %vm4938_vm3, %v3363_v28  ;;  %2649 = vperm.xlu1 %3440, %v2522_v0  }
 0xbee   :  { %3368 = vmatpush3.bf16.xpose.msk.msra.mxu1 %vm4938_vm3, %v3363_v28 }
 0xbf5   :  { %3290 = vmatmul.mubr.msk.f32.vlgmr.msra.gmra.mrb[24].mxu1 %vm5241_vm5, %v2517_v50 }
 0xbf6   :  { %3292 = vmatprep.mubr.msk.f32.mxu1 %vm5242_vm8, %v2518_v49 }
 0xbf9   :  { %3293 = vmatmul.mubr.msk.f32.gmra.mrb[26].mxu1 %vm5243_vm11, %v2519_v7 }
 0xc63   :  { %v2645_v41 = vpop.permute.xlu0 %2644 }
 0xc64   :  { %v2640_v56 = vpop.permute.xlu1 %2639 }
 0xc69   :  { %v2655_v44 = vpop.permute.xlu0 %2654 }
 0xc6a   :  { %v2650_v15 = vpop.permute.xlu1 %2649 }
 0xcc8   :  { %v3291_v29 = vpop.f32.mrb[24].mxu1 }
 0xcc9   :  { %v4959_v12 = vadd.f32 %v3291_v29, %v2645_v41  ;;  %v2618_v42 = vpop.f32.mrb[25].mxu1 }
 0xcca   :  { %v2657_v8 = vadd.f32 %v2640_v56, %v2618_v42 }
 0xccb   :  { %v2662_v37 = vsel %vm1121_vm12, %v4959_v12, inf  ;;  %v2682_v34 = vsel %vm1121_vm12, %v4959_v12, -inf }
 0xccc   :  { %v2661_v16 = vsel %vm1120_vm7, %v2657_v8, inf  ;;  %v2681_v22 = vsel %vm1120_vm7, %v2657_v8, -inf  ;;  %v3294_v52 = vpop.f32.mrb[26].mxu1  ;;  %v2666_v35 = vsel %vm187_vm1, %v2662_v37, inf  ;;  %v2686_v55 = vsel %vm187_vm1, %v2682_v34, -inf }
 0xccd   :  { %v2660_v39 = vadd.f32 %v3294_v52, %v2655_v44  ;;  %v2628_v63 = vpop.f32.mrb[27].mxu1  ;;  %v2665_v19 = vsel %vm187_vm1, %v2661_v16, inf  ;;  %v2685_v27 = vsel %vm187_vm1, %v2681_v22, -inf }
 0xcce   :  { %v2659_v1 = vadd.f32 %v2650_v15, %v2628_v63  ;;  %v2689_v26 = vmax.f32 %v2685_v27, %v2686_v55  ;;  %v2669_v9 = vmin.f32 %v2665_v19, %v2666_v35 }
 0xccf   :  { %v2664_v25 = vsel %vm1123_vm15, %v2660_v39, inf  ;;  %v2684_v3 = vsel %vm1123_vm15, %v2660_v39, -inf }
 0xcd0   :  { %v2668_v2 = vsel %vm187_vm1, %v2664_v25, inf  ;;  %v2688_v20 = vsel %vm187_vm1, %v2684_v3, -inf  ;;  %v2663_v10 = vsel %vm1122_vm6, %v2659_v1, inf  ;;  %v2683_v51 = vsel %vm1122_vm6, %v2659_v1, -inf }
 0xcd1   :  { %v2667_v61 = vsel %vm187_vm1, %v2663_v10, inf  ;;  %v2687_v11 = vsel %vm187_vm1, %v2683_v51, -inf }
 0xcd2   :  { %v2690_v33 = vmax.f32 %v2687_v11, %v2688_v20  ;;  %v2670_v14 = vmin.f32 %v2667_v61, %v2668_v2 }
 0xcd4   :  { %v2691_v18 = vmax.f32 %v2689_v26, %v2690_v33  ;;  %v2671_v23 = vmin.f32 %v2669_v9, %v2670_v14 }
 0xcd6   :  { %2692 = vmax.xlane.f32.xlu0 %v2691_v18  ;;  %2672 = vmin.xlane.f32.xlu1 %v2671_v23 }
 0xd63   :  { %v2693_v62 = vpop.xlane.xlu0 %2692  ;;  %v2673_v45 = vpop.xlane.xlu1 %2672 }
 0xd64   :  { %v2694_v13 = vrot.slane %v2693_v62, 4  ;;  %v2674_v57 = vrot.slane %v2673_v45, 4 }
 0xd66   :  { %v2695_v17 = vmax.f32 %v2693_v62, %v2694_v13  ;;  %v2675_v30 = vmin.f32 %v2673_v45, %v2674_v57 }
 0xd68   :  { %v2696_v60 = vrot.slane %v2695_v17, 2  ;;  %v2676_v36 = vrot.slane %v2675_v30, 2 }
 0xd6a   :  { %v2677_v50 = vmin.f32 %v2675_v30, %v2676_v36  ;;  %v2697_v32 = vmax.f32 %v2695_v17, %v2696_v60 }
 0xd6c   :  { %v2678_v5 = vrot.slane %v2677_v50, 1  ;;  %v2698_v48 = vrot.slane %v2697_v32, 1 }
 0xd6e   :  { %v2679_v31 = vmin.f32 %v2677_v50, %v2678_v5  ;;  %v2699_v53 = vmax.f32 %v2697_v32, %v2698_v48 }
 0xd70   :  { %3429 = vpush %v2679_v31  ;;  %v3557_v31 = vld [vmem:[%s5055_s2 + $0x8] sm:$0xff] }
 0xd71   :  { %3431 = vpush %v2699_v53 }
 0xda1   :  { %s3430_s14 = spop %3429 }
 0xda2   :  { %s3432_s24 = spop %3431  ;;  %v2707_v58 = vstv %s3430_s14 }
 0xda3   :  { %s2701_s8 = ssub.f32 %s3432_s24, %s3430_s14  ;;  %v2708_v40 = vsub.f32 %v2657_v8, %v2707_v58  ;;  %v2709_v7 = vsub.f32 %v4959_v12, %v2707_v58  ;;  %v2710_v49 = vsub.f32 %v2659_v1, %v2707_v58  ;;  %v2711_v6 = vsub.f32 %v2660_v39, %v2707_v58 }
 0xda5   :  { %s2704_s9 = smul.f32 0.06666667, %s2701_s8 }
 0xda7   :  { %p2705_p7 = scmp.gt.f32.partialorder %s2704_s9, 0.0  ;;  %v2730_v12 = vstv %s2704_s9 }
 0xda9   :  { %s2706_s11 = scalar_select %p2705_p7, %s2704_s9, 1.0 }
 0xdab   :  { %v2712_v21 = vstv %s2706_s11 }
 0xdac   :  { %3523 = vrcp.f32 %v2712_v21  ;;  %v3558_v21 = vld [vmem:[%s5055_s2] sm:$0xff] }
 0xdb6   :  { %v3524_v43 = vpop.eup %3523 }
 0xdb7   :  { %v2714_v59 = vmul.f32 %v3524_v43, %v2708_v40  ;;  %v2715_v38 = vmul.f32 %v3524_v43, %v2709_v7  ;;  %v2716_v54 = vmul.f32 %v3524_v43, %v2710_v49  ;;  %v2717_v0 = vmul.f32 %v3524_v43, %v2711_v6  ;;  %v3559_v43 = vld [vmem:[%s5055_s2 + $0x18] sm:$0xff] }
 0xdb9   :  { %v3433_v28 = vround.rtne.f32 %v2714_v59  ;;  %v3434_v41 = vround.rtne.f32 %v2715_v38  ;;  %v3435_v29 = vround.rtne.f32 %v2716_v54  ;;  %v3436_v56 = vround.rtne.f32 %v2717_v0  ;;  %v3560_v38 = vld [vmem:[%s5055_s2 + $0x10] sm:$0xff] }
 0xdbb   :  { %v2722_v42 = vmax.f32 %v3433_v28, 0.0  ;;  %v2723_v37 = vmax.f32 %v3434_v41, 0.0  ;;  %v2724_v34 = vmax.f32 %v3435_v29, 0.0  ;;  %v2725_v44 = vmax.f32 %v3436_v56, 0.0 }
 0xdbd   :  { %v2726_v16 = vmin.f32 %v2722_v42, 15.0  ;;  %v2727_v22 = vmin.f32 %v2723_v37, 15.0  ;;  %v2728_v8 = vmin.f32 %v2724_v34, 15.0  ;;  %v2729_v52 = vmin.f32 %v2725_v44, 15.0 }
 0xdbf   :  { %v2731_v15 = vmul.f32 %v2730_v12, %v2726_v16  ;;  %v2732_v39 = vmul.f32 %v2730_v12, %v2727_v22  ;;  %v2733_v63 = vmul.f32 %v2730_v12, %v2728_v8  ;;  %v2734_v35 = vmul.f32 %v2730_v12, %v2729_v52 }
 0xdc1   :  { %v2736_v55 = vadd.f32 %v2732_v39, %v2707_v58  ;;  %v2735_v1 = vadd.f32 %v2731_v15, %v2707_v58  ;;  %v2738_v19 = vadd.f32 %v2734_v35, %v2707_v58  ;;  %v2737_v27 = vadd.f32 %v2733_v63, %v2707_v58 }
 0xdc3   :  { %vm2740_vm13 = vcmp.ge.f32.partialorder %v2736_v55, 0.0  ;;  %v2744_v25 = vmul.f32 0.2, %v2736_v55  ;;  %vm2739_vm10 = vcmp.ge.f32.partialorder %v2735_v1, 0.0  ;;  %v2743_v3 = vmul.f32 0.2, %v2735_v1 }
 0xdc4   :  { %vm2742_vm9 = vcmp.ge.f32.partialorder %v2738_v19, 0.0  ;;  %v2746_v2 = vmul.f32 0.2, %v2738_v19  ;;  %vm2741_vm4 = vcmp.ge.f32.partialorder %v2737_v27, 0.0  ;;  %v2745_v20 = vmul.f32 0.2, %v2737_v27 }
 0xdc5   :  { %v2748_v10 = vsel %vm2740_vm13, %v2736_v55, %v2744_v25  ;;  %v2747_v51 = vsel %vm2739_vm10, %v2735_v1, %v2743_v3  ;;  %v3048_v55 = vld [vmem:[%s5063_s16] ss:$0 sm:$0xff] }
 0xdc6   :  { %v2752_v61 = vsel %vm1121_vm12, %v2748_v10, -1e+30  ;;  %v2751_v11 = vsel %vm1120_vm7, %v2747_v51, -1e+30  ;;  %v2750_v26 = vsel %vm2742_vm9, %v2738_v19, %v2746_v2  ;;  %v2749_v33 = vsel %vm2741_vm4, %v2737_v27, %v2745_v20 }
 0xdc7   :  { %v2758_v9 = vsel %vm187_vm1, %v2752_v61, -inf  ;;  %v2755_v14 = vsel %vm187_vm1, %v2751_v11, -inf  ;;  %v2754_v18 = vsel %vm1123_vm15, %v2750_v26, -1e+30  ;;  %v2753_v23 = vsel %vm1122_vm6, %v2749_v33, -1e+30  ;;  %vm5244_vm6 = vmmov %vm5236_vm14 }
 0xdc8   :  { %2759 = vmax.xlane.f32.xlu1 %v2758_v9  ;;  %2756 = vmax.xlane.f32.xlu0 %v2755_v14  ;;  %v2764_v4 = vsel %vm187_vm1, %v2754_v18, -inf  ;;  %v2761_v62 = vsel %vm187_vm1, %v2753_v23, -inf  ;;  %vm5245_vm15 = vmmov %vm5244_vm6 }
 0xdc9   :  { %vm5246_vm7 = vmmov %vm5244_vm6 }
 0xdcc   :  { %2765 = vmax.xlane.f32.xlu1 %v2764_v4  ;;  %2762 = vmax.xlane.f32.xlu0 %v2761_v62 }
 0xe55   :  { %v2760_v24 = vpop.xlane.xlu1 %2759  ;;  %v2757_v45 = vpop.xlane.xlu0 %2756 }
 0xe56   :  { %v2768_v13 = vsub.f32 %v2752_v61, %v2760_v24  ;;  %v2767_v57 = vsub.f32 %v2751_v11, %v2757_v45 }
 0xe58   :  { %v2773_v17 = vmul.f32 1.442695, %v2768_v13  ;;  %v2771_v30 = vmul.f32 1.442695, %v2767_v57 }
 0xe59   :  { %v2766_v60 = vpop.xlane.xlu1 %2765  ;;  %v2763_v36 = vpop.xlane.xlu0 %2762 }
 0xe5a   :  { %3525 = vpow2.f32 %v2773_v17  ;;  %v2770_v46 = vsub.f32 %v2754_v18, %v2766_v60  ;;  %v2769_v50 = vsub.f32 %v2753_v23, %v2763_v36 }
 0xe5b   :  { %3527 = vpow2.f32 %v2771_v30 }
 0xe5c   :  { %v2777_v47 = vmul.f32 1.442695, %v2770_v46  ;;  %v2775_v32 = vmul.f32 1.442695, %v2769_v50 }
 0xe5e   :  { %3529 = vpow2.f32 %v2777_v47 }
 0xe5f   :  { %3531 = vpow2.f32 %v2775_v32 }
 0xe64   :  { %v3526_v5 = vpop.eup %3525 }
 0xe65   :  { %v3528_v48 = vpop.eup %3527  ;;  %v2780_v53 = vmul.f32 %v3557_v31, %v3526_v5 }
 0xe66   :  { %v2779_v58 = vmul.f32 %v3558_v21, %v3528_v48 }
 0xe67   :  { %v2786_v40 = vsel %vm187_vm1, %v2780_v53, 0.0 }
 0xe68   :  { %v3530_v7 = vpop.eup %3529  ;;  %2787 = vadd.xlane.f32.xlu1 %v2786_v40  ;;  %v2783_v49 = vsel %vm187_vm1, %v2779_v58, 0.0 }
 0xe69   :  { %v3532_v6 = vpop.eup %3531  ;;  %2784 = vadd.xlane.f32.xlu0 %v2783_v49  ;;  %v2782_v59 = vmul.f32 %v3559_v43, %v3530_v7 }
 0xe6a   :  { %v2781_v54 = vmul.f32 %v3560_v38, %v3532_v6 }
 0xe6b   :  { %v2792_v0 = vsel %vm187_vm1, %v2782_v59, 0.0 }
 0xe6c   :  { %2793 = vadd.xlane.f32.xlu1 %v2792_v0  ;;  %v2789_v28 = vsel %vm187_vm1, %v2781_v54, 0.0 }
 0xe6d   :  { %2790 = vadd.xlane.f32.xlu0 %v2789_v28 }
 0xef5   :  { %v2788_v41 = vpop.xlane.xlu1 %2787 }
 0xef6   :  { %v2796_v29 = vadd.f32 1e-16, %v2788_v41  ;;  %v2785_v56 = vpop.xlane.xlu0 %2784 }
 0xef7   :  { %v2795_v42 = vadd.f32 1e-16, %v2785_v56 }
 0xef8   :  { %3533 = vrcp.f32 %v2796_v29 }
 0xef9   :  { %3535 = vrcp.f32 %v2795_v42  ;;  %v2794_v37 = vpop.xlane.xlu1 %2793 }
 0xefa   :  { %v2798_v34 = vadd.f32 1e-16, %v2794_v37  ;;  %v2791_v44 = vpop.xlane.xlu0 %2790 }
 0xefb   :  { %v2797_v16 = vadd.f32 1e-16, %v2791_v44 }
 0xefc   :  { %3537 = vrcp.f32 %v2798_v34 }
 0xefd   :  { %3539 = vrcp.f32 %v2797_v16 }
 0xf02   :  { %v3534_v22 = vpop.eup %3533 }
 0xf03   :  { %v3536_v8 = vpop.eup %3535  ;;  %v2802_v52 = vmul.f32 %v3534_v22, %v2780_v53 }
 0xf04   :  { %v2800_v12 = vmul.f32 %v3536_v8, %v2779_v58 }
 0xf06   :  { %v3538_v15 = vpop.eup %3537  ;;  %3303 = vmatprep.mubr.msk.f32.mxu0 %vm187_vm1, %v2800_v12 }
 0xf07   :  { %v3540_v39 = vpop.eup %3539  ;;  %3304 = vmatmul.mubr.msk.f32.vlgmr.msra.gmra.mrb[32].mxu0 %vm187_vm1, %v2802_v52  ;;  %v2806_v63 = vmul.f32 %v3538_v15, %v2782_v59 }
 0xf08   :  { %v2804_v35 = vmul.f32 %v3540_v39, %v2781_v54 }
 0xf0a   :  { %3306 = vmatprep.mubr.msk.f32.mxu0 %vm187_vm1, %v2804_v35 }
 0xf0b   :  { %3307 = vmatmul.mubr.msk.f32.gmra.mrb[34].mxu0 %vm187_vm1, %v2806_v63  ;;  %vm5247_vm1 = vmmov %vm5244_vm6 }
 0xf0c   :  { %vm5248_vm12 = vmmov %vm5247_vm1 }
 0xf0d   :  { %vm5249_vm14 = vmmov %vm5247_vm1 }
 0xf0e   :  { %vm5250_vm0 = vmmov %vm5247_vm1 }
 0xf0f   :  { %vm5251_vm2 = vmmov %vm5250_vm0 }
 0xf10   :  { %vm5252_vm3 = vmmov %vm5250_vm0 }
 0xf11   :  { %vm5253_vm5 = vmmov %vm5250_vm0 }
 0xf12   :  { %vm5254_vm8 = vmmov %vm5250_vm0 }
 0xf13   :  { %vm5255_vm11 = vmmov %vm5250_vm0 }
 0xfda   :  { %v3305_v1 = vpop.f32.mrb[32].mxu0 }
 0xfdb   :  { %v2898_v19 = vadd.f32 %v3305_v1, %v3048_v55  ;;  %v2892_v27 = vpop.f32.mrb[33].mxu0 }
 0xfdc   :  { %v2893_v25 = vadd.f32 %v3048_v55, %v2892_v27 }
 0xfdd   :  { %v2914_v3 = vsel %vm5244_vm6, %v2898_v19, -inf }
 0xfde   :  { %2915 = vmax.xlane.f32.xlu1 %v2914_v3  ;;  %v3308_v2 = vpop.f32.mrb[34].mxu0  ;;  %v2911_v20 = vsel %vm5245_vm15, %v2893_v25, -inf }
 0xfdf   :  { %v2908_v10 = vadd.f32 %v3308_v2, %v3048_v55  ;;  %2912 = vmax.xlane.f32.xlu0 %v2911_v20  ;;  %v2902_v51 = vpop.f32.mrb[35].mxu0 }
 0xfe0   :  { %v2903_v61 = vadd.f32 %v3048_v55, %v2902_v51 }
 0xfe1   :  { %v2920_v11 = vsel %vm5246_vm7, %v2908_v10, -inf }
 0xfe2   :  { %2921 = vmax.xlane.f32.xlu1 %v2920_v11  ;;  %v2917_v26 = vsel %vm5247_vm1, %v2903_v61, -inf }
 0xfe3   :  { %2918 = vmax.xlane.f32.xlu0 %v2917_v26 }
0x106b   :  { %v2916_v33 = vpop.xlane.xlu1 %2915 }
0x106c   :  { %v2924_v9 = vsub.f32 %v2898_v19, %v2916_v33  ;;  %v2913_v14 = vpop.xlane.xlu0 %2912 }
0x106d   :  { %v2923_v18 = vsub.f32 %v2893_v25, %v2913_v14 }
0x106e   :  { %v2929_v23 = vmul.f32 1.442695, %v2924_v9 }
0x106f   :  { %v2927_v4 = vmul.f32 1.442695, %v2923_v18  ;;  %v2922_v62 = vpop.xlane.xlu1 %2921 }
0x1070   :  { %3541 = vpow2.f32 %v2929_v23  ;;  %v2926_v24 = vsub.f32 %v2908_v10, %v2922_v62  ;;  %v2919_v45 = vpop.xlane.xlu0 %2918 }
0x1071   :  { %3543 = vpow2.f32 %v2927_v4  ;;  %v2925_v13 = vsub.f32 %v2903_v61, %v2919_v45 }
0x1072   :  { %v2933_v57 = vmul.f32 1.442695, %v2926_v24 }
0x1073   :  { %v2931_v17 = vmul.f32 1.442695, %v2925_v13 }
0x1074   :  { %3545 = vpow2.f32 %v2933_v57 }
0x1075   :  { %3547 = vpow2.f32 %v2931_v17 }
0x107a   :  { %v3542_v30 = vpop.eup %3541 }
0x107b   :  { %v3544_v60 = vpop.eup %3543  ;;  %v2938_v36 = vsel %vm5248_vm12, %v3542_v30, 0.0 }
0x107c   :  { %2939 = vadd.xlane.f32.xlu1 %v2938_v36  ;;  %v2935_v46 = vsel %vm5249_vm14, %v3544_v60, 0.0 }
0x107d   :  { %2936 = vadd.xlane.f32.xlu0 %v2935_v46 }
0x107e   :  { %v3546_v50 = vpop.eup %3545 }
0x107f   :  { %v3548_v47 = vpop.eup %3547  ;;  %v2944_v32 = vsel %vm5250_vm0, %v3546_v50, 0.0 }
0x1080   :  { %2945 = vadd.xlane.f32.xlu1 %v2944_v32  ;;  %v2941_v5 = vsel %vm5251_vm2, %v3548_v47, 0.0 }
0x1081   :  { %2942 = vadd.xlane.f32.xlu0 %v2941_v5 }
0x1109   :  { %v2940_v48 = vpop.xlane.xlu1 %2939 }
0x110a   :  { %3549 = vrcp.f32 %v2940_v48  ;;  %v2937_v31 = vpop.xlane.xlu0 %2936 }
0x110b   :  { %3551 = vrcp.f32 %v2937_v31 }
0x110d   :  { %v2946_v53 = vpop.xlane.xlu1 %2945 }
0x110e   :  { %3553 = vrcp.f32 %v2946_v53  ;;  %v2943_v21 = vpop.xlane.xlu0 %2942 }
0x110f   :  { %3555 = vrcp.f32 %v2943_v21 }
0x1114   :  { %v3550_v58 = vpop.eup %3549 }
0x1115   :  { %v3552_v40 = vpop.eup %3551  ;;  %v2950_v7 = vmul.f32 %v3550_v58, %v3542_v30 }
0x1116   :  { %v2948_v49 = vmul.f32 %v3552_v40, %v3544_v60 }
0x1117   :  { %2956 = vst.msk [vmem:[%s5064_s17 + $0x8] sm:$0xff] %vm5252_vm3, %v2950_v7 }
0x1118   :  { %v3554_v6 = vpop.eup %3553  ;;  %2955 = vst.msk [vmem:[%s5064_s17] sm:$0xff] %vm5253_vm5, %v2948_v49 }
0x1119   :  { %v3556_v43 = vpop.eup %3555  ;;  %v2954_v59 = vmul.f32 %v3554_v6, %v3546_v50 }
0x111a   :  { %v2952_v38 = vmul.f32 %v3556_v43, %v3548_v47 }
0x111b   :  { %2958 = vst.msk [vmem:[%s5064_s17 + $0x18] sm:$0xff] %vm5254_vm8, %v2954_v59 }
0x111c   :  { %2957 = vst.msk [vmem:[%s5064_s17 + $0x10] sm:$0xff] %vm5255_vm11, %v2952_v38 }

</bundles_post_ra>
